<compile_context>
chip_gen: v5e
topology: v5e:2x2
jax: 0.10.0
libtpu: 0.0.40
codegen_flags: <defaults>
</compile_context>

<pallas_src>
import functools

import jax
import jax.numpy as jnp
from jax.experimental import pallas as pl
from jax.experimental.pallas import tpu as pltpu


def convlstm_cell_kernel(comb_ref, w_ref, b_ref, c_prev_ref,
                         h_next_ref, c_next_ref, acc_ref,
                         *, k, H, W, Ch, bb):
    """One ConvLSTM cell step for `bb` batch elements (grid over batch blocks).

    comb_ref   : (bb, H+k-1, WP, C)   bf16  zero-padded cat([x, h_prev], C)
                                            (WP = padded width, mult. of 8)
    w_ref      : (k*k, 4*Ch, C)       bf16  conv weight, tap-major
    b_ref      : (4*Ch, 1)            f32   conv bias
    c_prev_ref : (bb, Ch, H*W)              previous cell state (flat NCHW)
    h_next_ref : (bb, Ch, H*W)              output (flat NCHW), input dtype
    c_next_ref : (bb, Ch, H*W)        f32   output (flat NCHW)
    acc_ref    : (4*Ch, bb*H*W)       f32   VMEM conv accumulator
    """
    HW = H * W
    N = bb * HW
    C = comb_ref.shape[-1]

    # --- conv: k*k accumulating per-tap matmuls straight from comb ----------
    # Window slice -> (bb, H, W, C) bf16; merging the leading dims into
    # (N, C) is layout-preserving when W is a multiple of the bf16 sublane
    # tile (16) -- true for the 16x16 demo, otherwise Mosaic inserts a cheap
    # relayout.  The dot contracts dim 1 of both operands (transposed-RHS MXU
    # path, no explicit transpose of the patch), accumulating f32 in VMEM.
    for t in range(k * k):
        dy, dx = divmod(t, k)
        patch = comb_ref[:, dy:dy + H, dx:dx + W, :]          # (bb,H,W,C) bf16
        patch = patch.reshape(N, C)                           # (N, C)
        part = jax.lax.dot_general(
            w_ref[t], patch,                                  # (4Ch,C),(N,C)
            dimension_numbers=(((1,), (1,)), ((), ())),
            preferred_element_type=jnp.float32)               # (4Ch, N) f32
        if t == 0:
            acc_ref[...] = part
        else:
            acc_ref[...] += part

    # --- gates + LSTM state update, f32, one batch element at a time --------
    # Row slices are sublane-aligned (Ch % 8 == 0), column slices are
    # lane-aligned (HW % 128 == 0); per-batch processing keeps the live vreg
    # set small (no spills).  Gate order matches torch.split: i, f, o, g.
    for j in range(bb):
        c0 = j * HW
        cc_i = acc_ref[0 * Ch:1 * Ch, c0:c0 + HW] + b_ref[0 * Ch:1 * Ch, :]
        cc_f = acc_ref[1 * Ch:2 * Ch, c0:c0 + HW] + b_ref[1 * Ch:2 * Ch, :]
        cc_g = acc_ref[3 * Ch:4 * Ch, c0:c0 + HW] + b_ref[3 * Ch:4 * Ch, :]

        c_prev = c_prev_ref[j].astype(jnp.float32)            # (Ch, HW)
        gi = jax.nn.sigmoid(cc_i)
        gf = jax.nn.sigmoid(cc_f)
        gg = jnp.tanh(cc_g)
        c_next = gf * c_prev + gi * gg                        # consume early

        cc_o = acc_ref[2 * Ch:3 * Ch, c0:c0 + HW] + b_ref[2 * Ch:3 * Ch, :]
        go = jax.nn.sigmoid(cc_o)
        h_next = go * jnp.tanh(c_next)

        c_next_ref[j] = c_next.astype(c_next_ref.dtype)       # stays f32
        h_next_ref[j] = h_next.astype(h_next_ref.dtype)


def _round_up(x, m):
    return ((x + m - 1) // m) * m


def _pick_batch_block(B):
    # >= 2 grid steps whenever B >= 2 (keeps both v7x TensorCores busy);
    # merge batches per step as B grows (amortizes ~0.35 us/step on v5e/v6e).
    if B <= 2:
        return 1
    if B % 2 == 0:
        return B // 2
    return 1


@functools.partial(jax.jit, static_argnames=("padding", "batch_block"))
def convlstm_cell_forward(x_nchw, h_prev_nchw, c_prev_nchw, w_oihw, bias,
                          padding, batch_block=None):
    """Matches ConvLSTMCell.forward semantics (NCHW in / NCHW out)."""
    B, Cx, H, W = x_nchw.shape
    Ch = h_prev_nchw.shape[1]
    C4, Cin_w, k, _ = w_oihw.shape
    p = padding

    # Conv2d output spatial size (stride 1).  The elementwise LSTM update
    # needs it to equal c_prev's spatial size (PyTorch fails there too).
    Ho = H + 2 * p - (k - 1)
    Wo = W + 2 * p - (k - 1)
    HWo = Ho * Wo
    if c_prev_nchw.shape != (B, Ch, Ho, Wo):
        raise ValueError(
            f"c_prev shape {c_prev_nchw.shape} incompatible with conv output "
            f"({B},{Ch},{Ho},{Wo}).")
    if Cin_w != Cx + Ch or C4 != 4 * Ch:
        raise ValueError("conv weight shape inconsistent with x / h_prev.")
    # Fast-path alignment prerequisites (otherwise masked stores / relayouts).
    if Ch % 8 != 0:
        raise ValueError(f"hidden_channels={Ch} must be a multiple of 8.")
    if HWo % 128 != 0:
        raise ValueError(f"H*W={HWo} must be a multiple of 128.")

    Ctot = Cx + Ch

    bb = batch_block if batch_block is not None else _pick_batch_block(B)
    # Cap so the f32 conv accumulator scratch stays <= ~4 MiB, and make sure
    # bb divides B.
    max_bb = max(1, (4 * 1024 * 1024) // (C4 * HWo * 4))
    bb = max(1, min(bb, max_bb, B))
    while B % bb != 0:
        bb -= 1

    HP = Ho + k - 1                    # padded conv-input height (= H + 2p)
    WP = _round_up(Wo + k - 1, 8)      # padded width, sublane-friendly

    # --- glue (plain JAX): padded bf16 NHWC conv input ----------------------
    x = jnp.transpose(x_nchw, (0, 2, 3, 1))
    h = jnp.transpose(h_prev_nchw, (0, 2, 3, 1))
    comb = jnp.concatenate([x, h], axis=-1).astype(jnp.bfloat16)
    comb = jnp.pad(comb, ((0, 0), (p, HP - H - p), (p, WP - W - p), (0, 0)))

    # Weight OIHW (4Ch, Ctot, k, k) -> tap-major (k*k, 4Ch, Ctot) bf16.
    w_t = jnp.transpose(w_oihw, (2, 3, 0, 1)).reshape(k * k, C4, Ctot)
    w_t = w_t.astype(jnp.bfloat16)
    b2d = bias.reshape(C4, 1).astype(jnp.float32)

    # Cell state stays in (flattened) NCHW on both sides -> no transposes.
    c_prev = c_prev_nchw.reshape(B, Ch, HWo)

    kernel = functools.partial(convlstm_cell_kernel,
                               k=k, H=Ho, W=Wo, Ch=Ch, bb=bb)

    h_next, c_next = pl.pallas_call(
        kernel,
        out_shape=(jax.ShapeDtypeStruct((B, Ch, HWo), x_nchw.dtype),
                   # c_next always f32: the recurrent state must not be
                   # truncated to bf16 across time steps.
                   jax.ShapeDtypeStruct((B, Ch, HWo), jnp.float32)),
        grid=(B // bb,),
        in_specs=[
            pl.BlockSpec((bb, HP, WP, Ctot), lambda i: (i, 0, 0, 0)),
            pl.BlockSpec((k * k, C4, Ctot), lambda i: (0, 0, 0)),   # resident
            pl.BlockSpec((C4, 1), lambda i: (0, 0)),                # resident
            pl.BlockSpec((bb, Ch, HWo), lambda i: (i, 0, 0)),
        ],
        out_specs=(pl.BlockSpec((bb, Ch, HWo), lambda i: (i, 0, 0)),
                   pl.BlockSpec((bb, Ch, HWo), lambda i: (i, 0, 0))),
        scratch_shapes=[pltpu.VMEM((C4, bb * HWo), jnp.float32)],
        compiler_params=pltpu.CompilerParams(
            dimension_semantics=("parallel",)),   # batch blocks split across TCs
    )(comb, w_t, b2d, c_prev)

    # Flattened NCHW -> NCHW: free reshapes, no output transpose needed.
    return (h_next.reshape(B, Ch, Ho, Wo), c_next.reshape(B, Ch, Ho, Wo))


def reference_forward(x_nchw, h_prev_nchw, c_prev_nchw, w_oihw, bias, padding):
    """Pure-JAX f32 reference (mirrors the PyTorch forward exactly)."""
    comb = jnp.concatenate([x_nchw, h_prev_nchw], axis=1)
    conv = jax.lax.conv_general_dilated(
        comb, w_oihw, window_strides=(1, 1),
        padding=[(padding, padding), (padding, padding)],
        dimension_numbers=("NCHW", "OIHW", "NCHW"),
        precision=jax.lax.Precision.HIGHEST)
    conv = conv + bias.reshape(1, -1, 1, 1)
    cc_i, cc_f, cc_o, cc_g = jnp.split(conv, 4, axis=1)
    i = jax.nn.sigmoid(cc_i)
    f = jax.nn.sigmoid(cc_f)
    o = jax.nn.sigmoid(cc_o)
    g = jnp.tanh(cc_g)
    c_next = f * c_prev_nchw + i * g
    h_next = o * jnp.tanh(c_next)
    return h_next, c_next


if __name__ == "__main__":
    # Module config (small, consistent with the PyTorch module).
    input_channels = 4
    hidden_channels = 32
    kernel_size = 3
    padding = 1
    B, H, W = 2, 16, 16

    key = jax.random.PRNGKey(0)
    k_x, k_h, k_c, k_w = jax.random.split(key, 4)

    x = jax.random.normal(k_x, (B, input_channels, H, W), jnp.float32)
    h_prev = jax.random.normal(k_h, (B, hidden_channels, H, W), jnp.float32)
    c_prev = jax.random.normal(k_c, (B, hidden_channels, H, W), jnp.float32)

    # Deterministic parameter init: xavier_normal_ for conv weight, zero bias.
    c_in = input_channels + hidden_channels
    c_out = 4 * hidden_channels
    fan_in = c_in * kernel_size * kernel_size
    fan_out = c_out * kernel_size * kernel_size
    xavier_std = (2.0 / (fan_in + fan_out)) ** 0.5
    w_oihw = xavier_std * jax.random.normal(
        k_w, (c_out, c_in, kernel_size, kernel_size), jnp.float32)
    bias = jnp.zeros((c_out,), jnp.float32)

    h_next, c_next = convlstm_cell_forward(x, h_prev, c_prev, w_oihw, bias,
                                           padding=padding)
    jax.block_until_ready((h_next, c_next))

    # Sanity-check against the exact-f32 reference.  The kernel feeds the MXU
    # bf16 operands (f32 accumulation, f32 gate/state math), so tolerances
    # are loosened accordingly.
    h_ref, c_ref = reference_forward(x, h_prev, c_prev, w_oihw, bias, padding)
    assert h_next.shape == (B, hidden_channels, H, W)
    assert c_next.shape == (B, hidden_channels, H, W)
    assert c_next.dtype == jnp.float32
    assert jnp.allclose(h_next, h_ref, atol=5e-2, rtol=5e-2)
    assert jnp.allclose(c_next, c_ref, atol=5e-2, rtol=5e-2)

    print("KERNEL_OK")
</pallas_src>

<mosaic_0001>
module attributes {stable_mosaic.version = 11 : i64} {
  func.func @convlstm_cell_kernel(%arg0: i32, %arg1: memref<1x18x24x36xbf16, #tpu.memory_space<vmem>>, %arg2: memref<9x128x36xbf16, #tpu.memory_space<vmem>>, %arg3: memref<128x1xf32, #tpu.memory_space<vmem>>, %arg4: memref<1x32x256xf32, #tpu.memory_space<vmem>>, %arg5: memref<1x32x256xf32, #tpu.memory_space<vmem>>, %arg6: memref<1x32x256xf32, #tpu.memory_space<vmem>>, %arg7: memref<128x256xf32, #tpu.memory_space<vmem>>) attributes {dimension_semantics = [#tpu.dimension_semantics<parallel>], iteration_bounds = array<i64: 2>, scalar_prefetch = 0 : i64, scratch_operands = 1 : i64, tpu.core_type = #tpu.core_type<tc>, window_params = [{transform_indices = @transform_0, window_bounds = array<i64: 1, 18, 24, 36>}, {pipeline_mode = #tpu.pipeline_mode<synchronous>, transform_indices = @transform_1, window_bounds = array<i64: 9, 128, 36>}, {pipeline_mode = #tpu.pipeline_mode<synchronous>, transform_indices = @transform_2, window_bounds = array<i64: 128, 1>}, {transform_indices = @transform_3, window_bounds = array<i64: 1, 32, 256>}, {transform_indices = @transform_4, window_bounds = array<i64: 1, 32, 256>}, {transform_indices = @transform_5, window_bounds = array<i64: 1, 32, 256>}]} {
    %c0 = arith.constant 0 : index
    %c0_0 = arith.constant 0 : index
    %c0_1 = arith.constant 0 : index
    %c0_2 = arith.constant 0 : index
    %0 = vector.load %arg1[%c0, %c0_0, %c0_1, %c0_2] : memref<1x18x24x36xbf16, #tpu.memory_space<vmem>>, vector<1x16x16x36xbf16>
    %1 = vector.shape_cast %0 : vector<1x16x16x36xbf16> to vector<256x36xbf16>
    %c0_3 = arith.constant 0 : index
    %c0_4 = arith.constant 0 : index
    %c0_5 = arith.constant 0 : index
    %2 = vector.load %arg2[%c0_3, %c0_4, %c0_5] : memref<9x128x36xbf16, #tpu.memory_space<vmem>>, vector<1x128x36xbf16>
    %3 = vector.shape_cast %2 : vector<1x128x36xbf16> to vector<128x36xbf16>
    %cst = arith.constant dense<0.000000e+00> : vector<128x256xf32>
    %4 = tpu.matmul %3, %1, %cst {dimension_numbers = #tpu.dot_dimension_numbers<[1], [1], [0], [0], [0, 0, 1, 0], [], []>} : vector<128x36xbf16>, vector<256x36xbf16>, vector<128x256xf32> -> vector<128x256xf32>
    %c0_6 = arith.constant 0 : index
    %c0_7 = arith.constant 0 : index
    %5 = vector.load %arg7[%c0_6, %c0_7] : memref<128x256xf32, #tpu.memory_space<vmem>>, vector<128x256xf32>
    tpu.vector_store %arg7[%c0_6, %c0_7], %4 {strides = array<i32>} : memref<128x256xf32, #tpu.memory_space<vmem>>, vector<128x256xf32>,
    %c0_8 = arith.constant 0 : index
    %c0_9 = arith.constant 0 : index
    %c1 = arith.constant 1 : index
    %c0_10 = arith.constant 0 : index
    %6 = vector.load %arg1[%c0_8, %c0_9, %c1, %c0_10] : memref<1x18x24x36xbf16, #tpu.memory_space<vmem>>, vector<1x16x16x36xbf16>
    %7 = vector.shape_cast %6 : vector<1x16x16x36xbf16> to vector<256x36xbf16>
    %c1_11 = arith.constant 1 : index
    %c0_12 = arith.constant 0 : index
    %c0_13 = arith.constant 0 : index
    %8 = vector.load %arg2[%c1_11, %c0_12, %c0_13] : memref<9x128x36xbf16, #tpu.memory_space<vmem>>, vector<1x128x36xbf16>
    %9 = vector.shape_cast %8 : vector<1x128x36xbf16> to vector<128x36xbf16>
    %cst_14 = arith.constant dense<0.000000e+00> : vector<128x256xf32>
    %10 = tpu.matmul %9, %7, %cst_14 {dimension_numbers = #tpu.dot_dimension_numbers<[1], [1], [0], [0], [0, 0, 1, 0], [], []>} : vector<128x36xbf16>, vector<256x36xbf16>, vector<128x256xf32> -> vector<128x256xf32>
    %c0_15 = arith.constant 0 : index
    %c0_16 = arith.constant 0 : index
    %11 = vector.load %arg7[%c0_15, %c0_16] : memref<128x256xf32, #tpu.memory_space<vmem>>, vector<128x256xf32>
    %12 = arith.addf %11, %10 : vector<128x256xf32>
    %c0_17 = arith.constant 0 : index
    %c0_18 = arith.constant 0 : index
    %13 = vector.load %arg7[%c0_17, %c0_18] : memref<128x256xf32, #tpu.memory_space<vmem>>, vector<128x256xf32>
    tpu.vector_store %arg7[%c0_17, %c0_18], %12 {strides = array<i32>} : memref<128x256xf32, #tpu.memory_space<vmem>>, vector<128x256xf32>,
    %c0_19 = arith.constant 0 : index
    %c0_20 = arith.constant 0 : index
    %c2 = arith.constant 2 : index
    %c0_21 = arith.constant 0 : index
    %14 = vector.load %arg1[%c0_19, %c0_20, %c2, %c0_21] : memref<1x18x24x36xbf16, #tpu.memory_space<vmem>>, vector<1x16x16x36xbf16>
    %15 = vector.shape_cast %14 : vector<1x16x16x36xbf16> to vector<256x36xbf16>
    %c2_22 = arith.constant 2 : index
    %c0_23 = arith.constant 0 : index
    %c0_24 = arith.constant 0 : index
    %16 = vector.load %arg2[%c2_22, %c0_23, %c0_24] : memref<9x128x36xbf16, #tpu.memory_space<vmem>>, vector<1x128x36xbf16>
    %17 = vector.shape_cast %16 : vector<1x128x36xbf16> to vector<128x36xbf16>
    %cst_25 = arith.constant dense<0.000000e+00> : vector<128x256xf32>
    %18 = tpu.matmul %17, %15, %cst_25 {dimension_numbers = #tpu.dot_dimension_numbers<[1], [1], [0], [0], [0, 0, 1, 0], [], []>} : vector<128x36xbf16>, vector<256x36xbf16>, vector<128x256xf32> -> vector<128x256xf32>
    %c0_26 = arith.constant 0 : index
    %c0_27 = arith.constant 0 : index
    %19 = vector.load %arg7[%c0_26, %c0_27] : memref<128x256xf32, #tpu.memory_space<vmem>>, vector<128x256xf32>
    %20 = arith.addf %19, %18 : vector<128x256xf32>
    %c0_28 = arith.constant 0 : index
    %c0_29 = arith.constant 0 : index
    %21 = vector.load %arg7[%c0_28, %c0_29] : memref<128x256xf32, #tpu.memory_space<vmem>>, vector<128x256xf32>
    tpu.vector_store %arg7[%c0_28, %c0_29], %20 {strides = array<i32>} : memref<128x256xf32, #tpu.memory_space<vmem>>, vector<128x256xf32>,
    %c0_30 = arith.constant 0 : index
    %c1_31 = arith.constant 1 : index
    %c0_32 = arith.constant 0 : index
    %c0_33 = arith.constant 0 : index
    %22 = vector.load %arg1[%c0_30, %c1_31, %c0_32, %c0_33] : memref<1x18x24x36xbf16, #tpu.memory_space<vmem>>, vector<1x16x16x36xbf16>
    %23 = vector.shape_cast %22 : vector<1x16x16x36xbf16> to vector<256x36xbf16>
    %c3 = arith.constant 3 : index
    %c0_34 = arith.constant 0 : index
    %c0_35 = arith.constant 0 : index
    %24 = vector.load %arg2[%c3, %c0_34, %c0_35] : memref<9x128x36xbf16, #tpu.memory_space<vmem>>, vector<1x128x36xbf16>
    %25 = vector.shape_cast %24 : vector<1x128x36xbf16> to vector<128x36xbf16>
    %cst_36 = arith.constant dense<0.000000e+00> : vector<128x256xf32>
    %26 = tpu.matmul %25, %23, %cst_36 {dimension_numbers = #tpu.dot_dimension_numbers<[1], [1], [0], [0], [0, 0, 1, 0], [], []>} : vector<128x36xbf16>, vector<256x36xbf16>, vector<128x256xf32> -> vector<128x256xf32>
    %c0_37 = arith.constant 0 : index
    %c0_38 = arith.constant 0 : index
    %27 = vector.load %arg7[%c0_37, %c0_38] : memref<128x256xf32, #tpu.memory_space<vmem>>, vector<128x256xf32>
    %28 = arith.addf %27, %26 : vector<128x256xf32>
    %c0_39 = arith.constant 0 : index
    %c0_40 = arith.constant 0 : index
    %29 = vector.load %arg7[%c0_39, %c0_40] : memref<128x256xf32, #tpu.memory_space<vmem>>, vector<128x256xf32>
    tpu.vector_store %arg7[%c0_39, %c0_40], %28 {strides = array<i32>} : memref<128x256xf32, #tpu.memory_space<vmem>>, vector<128x256xf32>,
    %c0_41 = arith.constant 0 : index
    %c1_42 = arith.constant 1 : index
    %c1_43 = arith.constant 1 : index
    %c0_44 = arith.constant 0 : index
    %30 = vector.load %arg1[%c0_41, %c1_42, %c1_43, %c0_44] : memref<1x18x24x36xbf16, #tpu.memory_space<vmem>>, vector<1x16x16x36xbf16>
    %31 = vector.shape_cast %30 : vector<1x16x16x36xbf16> to vector<256x36xbf16>
    %c4 = arith.constant 4 : index
    %c0_45 = arith.constant 0 : index
    %c0_46 = arith.constant 0 : index
    %32 = vector.load %arg2[%c4, %c0_45, %c0_46] : memref<9x128x36xbf16, #tpu.memory_space<vmem>>, vector<1x128x36xbf16>
    %33 = vector.shape_cast %32 : vector<1x128x36xbf16> to vector<128x36xbf16>
    %cst_47 = arith.constant dense<0.000000e+00> : vector<128x256xf32>
    %34 = tpu.matmul %33, %31, %cst_47 {dimension_numbers = #tpu.dot_dimension_numbers<[1], [1], [0], [0], [0, 0, 1, 0], [], []>} : vector<128x36xbf16>, vector<256x36xbf16>, vector<128x256xf32> -> vector<128x256xf32>
    %c0_48 = arith.constant 0 : index
    %c0_49 = arith.constant 0 : index
    %35 = vector.load %arg7[%c0_48, %c0_49] : memref<128x256xf32, #tpu.memory_space<vmem>>, vector<128x256xf32>
    %36 = arith.addf %35, %34 : vector<128x256xf32>
    %c0_50 = arith.constant 0 : index
    %c0_51 = arith.constant 0 : index
    %37 = vector.load %arg7[%c0_50, %c0_51] : memref<128x256xf32, #tpu.memory_space<vmem>>, vector<128x256xf32>
    tpu.vector_store %arg7[%c0_50, %c0_51], %36 {strides = array<i32>} : memref<128x256xf32, #tpu.memory_space<vmem>>, vector<128x256xf32>,
    %c0_52 = arith.constant 0 : index
    %c1_53 = arith.constant 1 : index
    %c2_54 = arith.constant 2 : index
    %c0_55 = arith.constant 0 : index
    %38 = vector.load %arg1[%c0_52, %c1_53, %c2_54, %c0_55] : memref<1x18x24x36xbf16, #tpu.memory_space<vmem>>, vector<1x16x16x36xbf16>
    %39 = vector.shape_cast %38 : vector<1x16x16x36xbf16> to vector<256x36xbf16>
    %c5 = arith.constant 5 : index
    %c0_56 = arith.constant 0 : index
    %c0_57 = arith.constant 0 : index
    %40 = vector.load %arg2[%c5, %c0_56, %c0_57] : memref<9x128x36xbf16, #tpu.memory_space<vmem>>, vector<1x128x36xbf16>
    %41 = vector.shape_cast %40 : vector<1x128x36xbf16> to vector<128x36xbf16>
    %cst_58 = arith.constant dense<0.000000e+00> : vector<128x256xf32>
    %42 = tpu.matmul %41, %39, %cst_58 {dimension_numbers = #tpu.dot_dimension_numbers<[1], [1], [0], [0], [0, 0, 1, 0], [], []>} : vector<128x36xbf16>, vector<256x36xbf16>, vector<128x256xf32> -> vector<128x256xf32>
    %c0_59 = arith.constant 0 : index
    %c0_60 = arith.constant 0 : index
    %43 = vector.load %arg7[%c0_59, %c0_60] : memref<128x256xf32, #tpu.memory_space<vmem>>, vector<128x256xf32>
    %44 = arith.addf %43, %42 : vector<128x256xf32>
    %c0_61 = arith.constant 0 : index
    %c0_62 = arith.constant 0 : index
    %45 = vector.load %arg7[%c0_61, %c0_62] : memref<128x256xf32, #tpu.memory_space<vmem>>, vector<128x256xf32>
    tpu.vector_store %arg7[%c0_61, %c0_62], %44 {strides = array<i32>} : memref<128x256xf32, #tpu.memory_space<vmem>>, vector<128x256xf32>,
    %c0_63 = arith.constant 0 : index
    %c2_64 = arith.constant 2 : index
    %c0_65 = arith.constant 0 : index
    %c0_66 = arith.constant 0 : index
    %46 = vector.load %arg1[%c0_63, %c2_64, %c0_65, %c0_66] : memref<1x18x24x36xbf16, #tpu.memory_space<vmem>>, vector<1x16x16x36xbf16>
    %47 = vector.shape_cast %46 : vector<1x16x16x36xbf16> to vector<256x36xbf16>
    %c6 = arith.constant 6 : index
    %c0_67 = arith.constant 0 : index
    %c0_68 = arith.constant 0 : index
    %48 = vector.load %arg2[%c6, %c0_67, %c0_68] : memref<9x128x36xbf16, #tpu.memory_space<vmem>>, vector<1x128x36xbf16>
    %49 = vector.shape_cast %48 : vector<1x128x36xbf16> to vector<128x36xbf16>
    %cst_69 = arith.constant dense<0.000000e+00> : vector<128x256xf32>
    %50 = tpu.matmul %49, %47, %cst_69 {dimension_numbers = #tpu.dot_dimension_numbers<[1], [1], [0], [0], [0, 0, 1, 0], [], []>} : vector<128x36xbf16>, vector<256x36xbf16>, vector<128x256xf32> -> vector<128x256xf32>
    %c0_70 = arith.constant 0 : index
    %c0_71 = arith.constant 0 : index
    %51 = vector.load %arg7[%c0_70, %c0_71] : memref<128x256xf32, #tpu.memory_space<vmem>>, vector<128x256xf32>
    %52 = arith.addf %51, %50 : vector<128x256xf32>
    %c0_72 = arith.constant 0 : index
    %c0_73 = arith.constant 0 : index
    %53 = vector.load %arg7[%c0_72, %c0_73] : memref<128x256xf32, #tpu.memory_space<vmem>>, vector<128x256xf32>
    tpu.vector_store %arg7[%c0_72, %c0_73], %52 {strides = array<i32>} : memref<128x256xf32, #tpu.memory_space<vmem>>, vector<128x256xf32>,
    %c0_74 = arith.constant 0 : index
    %c2_75 = arith.constant 2 : index
    %c1_76 = arith.constant 1 : index
    %c0_77 = arith.constant 0 : index
    %54 = vector.load %arg1[%c0_74, %c2_75, %c1_76, %c0_77] : memref<1x18x24x36xbf16, #tpu.memory_space<vmem>>, vector<1x16x16x36xbf16>
    %55 = vector.shape_cast %54 : vector<1x16x16x36xbf16> to vector<256x36xbf16>
    %c7 = arith.constant 7 : index
    %c0_78 = arith.constant 0 : index
    %c0_79 = arith.constant 0 : index
    %56 = vector.load %arg2[%c7, %c0_78, %c0_79] : memref<9x128x36xbf16, #tpu.memory_space<vmem>>, vector<1x128x36xbf16>
    %57 = vector.shape_cast %56 : vector<1x128x36xbf16> to vector<128x36xbf16>
    %cst_80 = arith.constant dense<0.000000e+00> : vector<128x256xf32>
    %58 = tpu.matmul %57, %55, %cst_80 {dimension_numbers = #tpu.dot_dimension_numbers<[1], [1], [0], [0], [0, 0, 1, 0], [], []>} : vector<128x36xbf16>, vector<256x36xbf16>, vector<128x256xf32> -> vector<128x256xf32>
    %c0_81 = arith.constant 0 : index
    %c0_82 = arith.constant 0 : index
    %59 = vector.load %arg7[%c0_81, %c0_82] : memref<128x256xf32, #tpu.memory_space<vmem>>, vector<128x256xf32>
    %60 = arith.addf %59, %58 : vector<128x256xf32>
    %c0_83 = arith.constant 0 : index
    %c0_84 = arith.constant 0 : index
    %61 = vector.load %arg7[%c0_83, %c0_84] : memref<128x256xf32, #tpu.memory_space<vmem>>, vector<128x256xf32>
    tpu.vector_store %arg7[%c0_83, %c0_84], %60 {strides = array<i32>} : memref<128x256xf32, #tpu.memory_space<vmem>>, vector<128x256xf32>,
    %c0_85 = arith.constant 0 : index
    %c2_86 = arith.constant 2 : index
    %c2_87 = arith.constant 2 : index
    %c0_88 = arith.constant 0 : index
    %62 = vector.load %arg1[%c0_85, %c2_86, %c2_87, %c0_88] : memref<1x18x24x36xbf16, #tpu.memory_space<vmem>>, vector<1x16x16x36xbf16>
    %63 = vector.shape_cast %62 : vector<1x16x16x36xbf16> to vector<256x36xbf16>
    %c8 = arith.constant 8 : index
    %c0_89 = arith.constant 0 : index
    %c0_90 = arith.constant 0 : index
    %64 = vector.load %arg2[%c8, %c0_89, %c0_90] : memref<9x128x36xbf16, #tpu.memory_space<vmem>>, vector<1x128x36xbf16>
    %65 = vector.shape_cast %64 : vector<1x128x36xbf16> to vector<128x36xbf16>
    %cst_91 = arith.constant dense<0.000000e+00> : vector<128x256xf32>
    %66 = tpu.matmul %65, %63, %cst_91 {dimension_numbers = #tpu.dot_dimension_numbers<[1], [1], [0], [0], [0, 0, 1, 0], [], []>} : vector<128x36xbf16>, vector<256x36xbf16>, vector<128x256xf32> -> vector<128x256xf32>
    %c0_92 = arith.constant 0 : index
    %c0_93 = arith.constant 0 : index
    %67 = vector.load %arg7[%c0_92, %c0_93] : memref<128x256xf32, #tpu.memory_space<vmem>>, vector<128x256xf32>
    %68 = arith.addf %67, %66 : vector<128x256xf32>
    %c0_94 = arith.constant 0 : index
    %c0_95 = arith.constant 0 : index
    %69 = vector.load %arg7[%c0_94, %c0_95] : memref<128x256xf32, #tpu.memory_space<vmem>>, vector<128x256xf32>
    tpu.vector_store %arg7[%c0_94, %c0_95], %68 {strides = array<i32>} : memref<128x256xf32, #tpu.memory_space<vmem>>, vector<128x256xf32>,
    %c0_96 = arith.constant 0 : index
    %c0_97 = arith.constant 0 : index
    %70 = vector.load %arg7[%c0_96, %c0_97] : memref<128x256xf32, #tpu.memory_space<vmem>>, vector<32x256xf32>
    %c0_98 = arith.constant 0 : index
    %c0_99 = arith.constant 0 : index
    %71 = vector.load %arg3[%c0_98, %c0_99] : memref<128x1xf32, #tpu.memory_space<vmem>>, vector<32x1xf32>
    %72 = vector.broadcast %71 : vector<32x1xf32> to vector<32x256xf32>
    %73 = arith.addf %70, %72 : vector<32x256xf32>
    %c32 = arith.constant 32 : index
    %c0_100 = arith.constant 0 : index
    %74 = vector.load %arg7[%c32, %c0_100] : memref<128x256xf32, #tpu.memory_space<vmem>>, vector<32x256xf32>
    %c32_101 = arith.constant 32 : index
    %c0_102 = arith.constant 0 : index
    %75 = vector.load %arg3[%c32_101, %c0_102] : memref<128x1xf32, #tpu.memory_space<vmem>>, vector<32x1xf32>
    %76 = vector.broadcast %75 : vector<32x1xf32> to vector<32x256xf32>
    %77 = arith.addf %74, %76 : vector<32x256xf32>
    %c96 = arith.constant 96 : index
    %c0_103 = arith.constant 0 : index
    %78 = vector.load %arg7[%c96, %c0_103] : memref<128x256xf32, #tpu.memory_space<vmem>>, vector<32x256xf32>
    %c96_104 = arith.constant 96 : index
    %c0_105 = arith.constant 0 : index
    %79 = vector.load %arg3[%c96_104, %c0_105] : memref<128x1xf32, #tpu.memory_space<vmem>>, vector<32x1xf32>
    %80 = vector.broadcast %79 : vector<32x1xf32> to vector<32x256xf32>
    %81 = arith.addf %78, %80 : vector<32x256xf32>
    %c0_106 = arith.constant 0 : index
    %c0_107 = arith.constant 0 : index
    %c0_108 = arith.constant 0 : index
    %82 = vector.load %arg4[%c0_106, %c0_107, %c0_108] : memref<1x32x256xf32, #tpu.memory_space<vmem>>, vector<1x32x256xf32>
    %83 = vector.shape_cast %82 : vector<1x32x256xf32> to vector<32x256xf32>
    %84 = arith.negf %73 : vector<32x256xf32>
    %85 = math.exp %84 : vector<32x256xf32>
    %cst_109 = arith.constant 1.000000e+00 : f32
    %86 = vector.broadcast %cst_109 : f32 to vector<32x256xf32>
    %87 = arith.addf %86, %85 : vector<32x256xf32>
    %88 = arith.divf %86, %87 : vector<32x256xf32>
    %89 = arith.negf %77 : vector<32x256xf32>
    %90 = math.exp %89 : vector<32x256xf32>
    %cst_110 = arith.constant 1.000000e+00 : f32
    %91 = vector.broadcast %cst_110 : f32 to vector<32x256xf32>
    %92 = arith.addf %91, %90 : vector<32x256xf32>
    %93 = arith.divf %91, %92 : vector<32x256xf32>
    %94 = math.tanh %81 : vector<32x256xf32>
    %95 = arith.mulf %93, %83 : vector<32x256xf32>
    %96 = arith.mulf %88, %94 : vector<32x256xf32>
    %97 = arith.addf %95, %96 : vector<32x256xf32>
    %c64 = arith.constant 64 : index
    %c0_111 = arith.constant 0 : index
    %98 = vector.load %arg7[%c64, %c0_111] : memref<128x256xf32, #tpu.memory_space<vmem>>, vector<32x256xf32>
    %c64_112 = arith.constant 64 : index
    %c0_113 = arith.constant 0 : index
    %99 = vector.load %arg3[%c64_112, %c0_113] : memref<128x1xf32, #tpu.memory_space<vmem>>, vector<32x1xf32>
    %100 = vector.broadcast %99 : vector<32x1xf32> to vector<32x256xf32>
    %101 = arith.addf %98, %100 : vector<32x256xf32>
    %102 = arith.negf %101 : vector<32x256xf32>
    %103 = math.exp %102 : vector<32x256xf32>
    %cst_114 = arith.constant 1.000000e+00 : f32
    %104 = vector.broadcast %cst_114 : f32 to vector<32x256xf32>
    %105 = arith.addf %104, %103 : vector<32x256xf32>
    %106 = arith.divf %104, %105 : vector<32x256xf32>
    %107 = math.tanh %97 : vector<32x256xf32>
    %108 = arith.mulf %106, %107 : vector<32x256xf32>
    %c0_115 = arith.constant 0 : index
    %c0_116 = arith.constant 0 : index
    %c0_117 = arith.constant 0 : index
    %109 = vector.load %arg6[%c0_115, %c0_116, %c0_117] : memref<1x32x256xf32, #tpu.memory_space<vmem>>, vector<1x32x256xf32>
    %110 = vector.shape_cast %109 : vector<1x32x256xf32> to vector<32x256xf32>
    %111 = vector.shape_cast %97 : vector<32x256xf32> to vector<1x32x256xf32>
    tpu.vector_store %arg6[%c0_115, %c0_116, %c0_117], %111 {strides = array<i32>} : memref<1x32x256xf32, #tpu.memory_space<vmem>>, vector<1x32x256xf32>,
    %c0_118 = arith.constant 0 : index
    %c0_119 = arith.constant 0 : index
    %c0_120 = arith.constant 0 : index
    %112 = vector.load %arg5[%c0_118, %c0_119, %c0_120] : memref<1x32x256xf32, #tpu.memory_space<vmem>>, vector<1x32x256xf32>
    %113 = vector.shape_cast %112 : vector<1x32x256xf32> to vector<32x256xf32>
    %114 = vector.shape_cast %108 : vector<32x256xf32> to vector<1x32x256xf32>
    tpu.vector_store %arg5[%c0_118, %c0_119, %c0_120], %114 {strides = array<i32>} : memref<1x32x256xf32, #tpu.memory_space<vmem>>, vector<1x32x256xf32>,
    return
  }
  func.func @transform_0(%arg0: i32) -> (i32, i32, i32, i32) {
    %c0_i32 = arith.constant 0 : i32
    %c0_i32_0 = arith.constant 0 : i32
    %c0_i32_1 = arith.constant 0 : i32
    %c0_i32_2 = arith.constant 0 : i32
    return %arg0, %c0_i32, %c0_i32_0, %c0_i32_1 : i32, i32, i32, i32
  }
  func.func @transform_1(%arg0: i32) -> (i32, i32, i32) {
    %c0_i32 = arith.constant 0 : i32
    %c0_i32_0 = arith.constant 0 : i32
    %c0_i32_1 = arith.constant 0 : i32
    %c0_i32_2 = arith.constant 0 : i32
    return %c0_i32, %c0_i32_0, %c0_i32_1 : i32, i32, i32
  }
  func.func @transform_2(%arg0: i32) -> (i32, i32) {
    %c0_i32 = arith.constant 0 : i32
    %c0_i32_0 = arith.constant 0 : i32
    %c0_i32_1 = arith.constant 0 : i32
    return %c0_i32, %c0_i32_0 : i32, i32
  }
  func.func @transform_3(%arg0: i32) -> (i32, i32, i32) {
    %c0_i32 = arith.constant 0 : i32
    %c0_i32_0 = arith.constant 0 : i32
    %c0_i32_1 = arith.constant 0 : i32
    return %arg0, %c0_i32, %c0_i32_0 : i32, i32, i32
  }
  func.func @transform_4(%arg0: i32) -> (i32, i32, i32) {
    %c0_i32 = arith.constant 0 : i32
    %c0_i32_0 = arith.constant 0 : i32
    %c0_i32_1 = arith.constant 0 : i32
    return %arg0, %c0_i32, %c0_i32_0 : i32, i32, i32
  }
  func.func @transform_5(%arg0: i32) -> (i32, i32, i32) {
    %c0_i32 = arith.constant 0 : i32
    %c0_i32_0 = arith.constant 0 : i32
    %c0_i32_1 = arith.constant 0 : i32
    return %arg0, %c0_i32, %c0_i32_0 : i32, i32, i32
  }
}

</mosaic_0001>

<bundles_post_ra>
// kernel: convlstm_cell_forward.1
= control target key start
LH: loop header
LB: loop body
LE: loop exit
PB: predicated region body
PF: predicated region fallthrough
CT: control target
= control target key end

     0   :  { %s7854_s18 = smov 0   ;;  %s10841_s0 = inlined_call_operand.vmem [shape: bf16[2,18,24,36], index: 0, kind: input, shape index: {}]   ;;  %s10842_s1 = inlined_call_operand.vmem [shape: bf16[9,128,36], index: 1, kind: input, shape index: {}]   ;;  %s10843_s2 = inlined_call_operand.vmem [shape: f32[128,1], index: 2, kind: input, shape index: {}]   ;;  %s10844_s3 = inlined_call_operand.vmem [shape: f32[2,32,256], index: 3, kind: input, shape index: {}]   ;;  %s10845_s4 = inlined_call_operand.vmem [shape: f32[2,32,256], index: 4, kind: output, shape index: {0}]   ;;  %s10846_s5 = inlined_call_operand.vmem [shape: f32[2,32,256], index: 5, kind: output, shape index: {1}]  }
   0x1 LB: > { %s6441_s19 = sadd.s32 4294967295, %s7821_s18   ;;  %p6445_p0 = scmp.ge.s32.totalorder %s7821_s18, 1  ;;  %s7821_s18 = sphi %s7854_s18, %s16_s18  }
   0x2   : > { %p200_p1 = scmp.lt.s32.totalorder %s7821_s18, 3 }
   0x4   : > { %p201_p2 = pnand %p6445_p0, %p200_p1 }
   0x6   : > { %204 = sbr.rel (%p201_p2) target bundleno = 862 (0x35e), region = 36 }
   0xb   : > { %p238_p3 = scmp.lt.s32.totalorder %s6441_s19, 1  ;;  %vm426_vm0 = vcmask 293888   ;;  %vm677_vm1 = vsmask.f32 3328  ;;  %vm678_vm2 = vsmask.f32 7440 }
   0xc   : > { %vm7926_vm3 = vmor %vm677_vm1, %vm678_vm2  ;;  %vm1531_vm4 = vcmask 1042432   ;;  %vm1532_vm5 = vcmask 1046532  }
   0xd   : > { %s11072_s19 = smov (!%p238_p3, %s6441_s19), 1  ;;  %vm7936_vm6 = vmor %vm1531_vm4, %vm1532_vm5 }
   0xe   : > { %s7674_s20 = smul.u32 216, %s11072_s19 }
  0x10   : > { %s7868_s23 = scalar_lea.vmem %s10841_s0, %s7674_s20  ;;  %s10356_s20 = sshll.u32 %s11072_s19, 6 }
  0x11   : > { %v7545_v0 = vld [vmem:[%s7868_s23 + $0x54] sm:$0xff]  ;;  %v7544_v4 = vld [vmem:[%s7868_s23 + $0x48] sm:$0xff]  ;;  %v7543_v8 = vld [vmem:[%s7868_s23 + $0x3c] sm:$0xff]  ;;  %s10386_s21 = scalar_lea.vmem %s10844_s3, %s10356_s20  ;;  %s10482_s25 = scalar_lea.vmem %s10846_s5, %s10356_s20 }
  0x12   : > { %v7553_v1 = vld [vmem:[%s7868_s23 + $0xb4] sm:$0xff]  ;;  %v473_v2 = vsel %vm426_vm0, %v7545_v0, 0  ;;  %v7552_v5 = vld [vmem:[%s7868_s23 + $0xa8] sm:$0xff]  ;;  %v470_v6 = vsel %vm426_vm0, %v7544_v4, 0  ;;  %v7551_v9 = vld [vmem:[%s7868_s23 + $0x9c] sm:$0xff]  ;;  %v467_v13 = vsel %vm426_vm0, %v7543_v8, 0  ;;  %s10583_s28 = scalar_lea.vmem %s10845_s4, %s10356_s20 }
  0x13   : > { %v497_v3 = vsel %vm426_vm0, %v7553_v1, 0  ;;  %499 = vmatpush.bf16.xpose.msra.mxu0 %v473_v2  ;;  %7658 = vmatpush.bf16.xpose.msra.mxu2 %v473_v2  ;;  %v494_v7 = vsel %vm426_vm0, %v7552_v5, 0  ;;  %v7542_v10 = vld [vmem:[%s7868_s23 + $0x30] sm:$0xff]  ;;  %v7541_v12 = vld [vmem:[%s7868_s23 + $0x24] sm:$0xff]  ;;  %v7540_v15 = vld [vmem:[%s7868_s23 + $0x18] sm:$0xff]  ;;  %v491_v17 = vsel %vm426_vm0, %v7551_v9, 0 }
  0x14   : > { %548 = vmatpush.bf16.xpose.msra.mxu1 %v497_v3  ;;  %7666 = vmatpush.bf16.xpose.msra.mxu3 %v497_v3  ;;  %v7550_v11 = vld [vmem:[%s7868_s23 + $0x90] sm:$0xff]  ;;  %v7549_v14 = vld [vmem:[%s7868_s23 + $0x84] sm:$0xff]  ;;  %v7548_v16 = vld [vmem:[%s7868_s23 + $0x78] sm:$0xff]  ;;  %v464_v19 = vsel %vm426_vm0, %v7542_v10, 0  ;;  %v7892_v21 = vsel %vm426_vm0, %v7541_v12, 0  ;;  %v7898_v23 = vsel %vm426_vm0, %v7540_v15, 0 }
  0x15   : > { %v7539_v18 = vld [vmem:[%s7868_s23 + $0xc] sm:$0xff]  ;;  %v488_v20 = vsel %vm426_vm0, %v7550_v11, 0  ;;  %v7895_v22 = vsel %vm426_vm0, %v7549_v14, 0  ;;  %v7901_v24 = vsel %vm426_vm0, %v7548_v16, 0  ;;  %v7538_v26 = vld [vmem:[%s7868_s23] sm:$0xff]  ;;  %v7617_v10 = vld [vmem:[%s10842_s1 + $0x178] sm:$0xff] }
  0x16   : > { %v7547_v25 = vld [vmem:[%s7868_s23 + $0x6c] sm:$0xff]  ;;  %v650_v27 = vld [vmem:[%s7868_s23 + $0x54] sm:$0xf]  ;;  %v651_v28 = vld [vmem:[%s7868_s23 + $0x58] sm:$0xf]  ;;  %v7909_v30 = vsel %vm426_vm0, %v7539_v18, 0 }
  0x17   : > { %v674_v29 = vld [vmem:[%s7868_s23 + $0xb4] sm:$0xf]  ;;  %v849_v31 = vshrl.u32 %v650_v27, 16  ;;  %v852_v32 = vshll.u32 %v650_v27, 16  ;;  %v858_v33 = vshll.u32 %v651_v28, 16  ;;  %v862_v35 = vshrl.u32 %v651_v28, 16 }
  0x18   : > { %v675_v34 = vld [vmem:[%s7868_s23 + $0xb8] sm:$0xf]  ;;  %v1041_v36 = vshrl.u32 %v674_v29, 16  ;;  %v1044_v37 = vshll.u32 %v674_v29, 16  ;;  %v7913_v43 = vsel %vm426_vm0, %v7547_v25, 0  ;;  %v7916_v44 = vsel %vm426_vm0, %v7538_v26, 0 }
  0x19   : > { %v1050_v38 = vshll.u32 %v675_v34, 16  ;;  %v851_v39 = vrot.slane %v849_v31, 4  ;;  %v854_v40 = vrot.slane %v852_v32, 5  ;;  %v860_v41 = vrot.slane %v858_v33, 5  ;;  %v7546_v45 = vld [vmem:[%s7868_s23 + $0x60] sm:$0xff] }
  0x1a   : > { %v1054_v42 = vshrl.u32 %v675_v34, 16  ;;  %v652_v46 = vld [vmem:[%s7868_s23 + $0x5c] sm:$0x1]  ;;  %v864_v47 = vrot.slane %v862_v35, 4  ;;  %v1043_v51 = vrot.slane %v1041_v36, 4  ;;  %v1046_v52 = vrot.slane %v1044_v37, 5 }
  0x1b   : > { %500 = vmatpush.bf16.xpose.msra.mxu0 %v470_v6  ;;  %7659 = vmatpush.bf16.xpose.msra.mxu2 %v470_v6  ;;  %v855_v48 = vor.u32 %v854_v40, %v851_v39  ;;  %v868_v49 = vshll.u32 %v652_v46, 16  ;;  %v676_v50 = vld [vmem:[%s7868_s23 + $0xbc] sm:$0x1]  ;;  %v7922_v53 = vsel %vm426_vm0, %v7546_v45, 0  ;;  %v1052_v55 = vrot.slane %v1050_v38, 5 }
  0x1c   : > { %549 = vmatpush.bf16.xpose.msra.mxu1 %v494_v7  ;;  %7667 = vmatpush.bf16.xpose.msra.mxu3 %v494_v7  ;;  %v865_v54 = vor.u32 %v864_v47, %v860_v41  ;;  %v1056_v56 = vrot.slane %v1054_v42, 4  ;;  %v1456_v57 = vld [vmem:[%s7868_s23 + $0x54] sm:$0xe]  ;;  %v1457_v58 = vld [vmem:[%s7868_s23 + $0x58] sm:$0xf]  ;;  %v1047_v60 = vor.u32 %v1046_v52, %v1043_v51  ;;  %v1060_v1 = vshll.u32 %v676_v50, 16 }
  0x1d   : > { %v856_v59 = vrot.slane %v855_v48, 4  ;;  %v870_v63 = vrot.slane %v868_v49, 5  ;;  %v1458_v2 = vld [vmem:[%s7868_s23 + $0x5c] sm:$0x1]  ;;  %v1480_v5 = vld [vmem:[%s7868_s23 + $0xb4] sm:$0xe] }
  0x1e   : > { %v866_v62 = vrot.slane %v865_v54, 4  ;;  %v1057_v0 = vor.u32 %v1056_v56, %v1052_v55  ;;  %v1048_v4 = vrot.slane %v1047_v60, 4  ;;  %v1062_v9 = vrot.slane %v1060_v1, 5  ;;  %v1481_v11 = vld [vmem:[%s7868_s23 + $0xb8] sm:$0xf] }
  0x1f   : > { %v861_v3 = vsel %vm7926_vm3, %v856_v59, %v860_v41  ;;  %v6636_v14 = vrot.slane %v1456_v57, 9  ;;  %v1585_v15 = vrot.slane %v1457_v58, 5  ;;  %v1482_v16 = vld [vmem:[%s7868_s23 + $0xbc] sm:$0x1]  ;;  %v6644_v25 = vrot.slane %v1480_v5, 9 }
  0x20   : > { %v871_v6 = vsel %vm7926_vm3, %v866_v62, %v870_v63  ;;  %v1135_v7 = vunpack.c.l.b16 %v861_v3  ;;  %v1058_v8 = vrot.slane %v1057_v0, 4  ;;  %v1641_v32 = vrot.slane %v1481_v11, 5  ;;  %v648_v34 = vld [vmem:[%s7868_s23 + $0x4c] sm:$0xf]  ;;  %v649_v39 = vld [vmem:[%s7868_s23 + $0x50] sm:$0x1] }
  0x21   : > { %v1136_v12 = vunpack.c.l.b16 %v871_v6  ;;  %v1586_v28 = vsel %vm7936_vm6, %v6636_v14, %v1585_v15  ;;  %v1587_v29 = vrot.slane %v1585_v15, 4  ;;  %v1644_v33 = vrot.slane %v1482_v16, 5  ;;  %v671_v46 = vld [vmem:[%s7868_s23 + $0xa8] sm:$0xf]  ;;  %v673_v59 = vld [vmem:[%s7868_s23 + $0xb0] sm:$0x1] }
  0x22   : > { %v1063_v18 = vsel %vm7926_vm3, %v1058_v8, %v1062_v9  ;;  %v1717_v31 = vunpack.c.l.b16 %v1586_v28  ;;  %v1642_v41 = vsel %vm7936_vm6, %v6644_v25, %v1641_v32  ;;  %v1643_v42 = vrot.slane %v1641_v32, 4  ;;  %v1453_v62 = vld [vmem:[%s7868_s23 + $0x48] sm:$0xe]  ;;  %v1454_v3 = vld [vmem:[%s7868_s23 + $0x4c] sm:$0xf] }
  0x23   : > { %501 = vmatpush.bf16.xpose.msra.mxu0 %v467_v13  ;;  %7660 = vmatpush.bf16.xpose.msra.mxu2 %v467_v13  ;;  %v1053_v13 = vsel %vm7926_vm3, %v1048_v4, %v1052_v55  ;;  %v1160_v26 = vpack.c.b16 %v1136_v12, %v1135_v7  ;;  %v1152_v27 = vunpack.c.l.b16 %v1063_v18  ;;  %v1733_v47 = vunpack.c.l.b16 %v1642_v41  ;;  %v672_v55 = vld [vmem:[%s7868_s23 + $0xac] sm:$0xf]  ;;  %v1455_v8 = vld [vmem:[%s7868_s23 + $0x50] sm:$0x1]  ;;  %v1477_v14 = vld [vmem:[%s7868_s23 + $0xa8] sm:$0xe] }
  0x24   : > { %550 = vmatpush.bf16.xpose.msra.mxu1 %v491_v17  ;;  %7668 = vmatpush.bf16.xpose.msra.mxu3 %v491_v17  ;;  %v647_v17 = vld [vmem:[%s7868_s23 + $0x48] sm:$0xf]  ;;  %v834_v49 = vshll.u32 %v648_v34, 16  ;;  %v1645_v51 = vsel %vm7936_vm6, %v1643_v42, %v1644_v33  ;;  %v838_v52 = vshrl.u32 %v648_v34, 16  ;;  %v844_v54 = vshll.u32 %v649_v39, 16 }
  0x25   : > { %v825_v35 = vshrl.u32 %v647_v17, 16  ;;  %v7955_v36 = vsel %vm426_vm0, %v1160_v26, 0  ;;  %v1734_v56 = vunpack.c.l.b16 %v1645_v51  ;;  %v1017_v60 = vshrl.u32 %v671_v46, 16  ;;  %v645_v51 = vld [vmem:[%s7868_s23 + $0x40] sm:$0xf] }
  0x26   : > { %v836_v58 = vrot.slane %v834_v49, 5  ;;  %v840_v0 = vrot.slane %v838_v52, 4  ;;  %v846_v1 = vrot.slane %v844_v54, 5  ;;  %v1026_v7 = vshll.u32 %v672_v55, 16 }
  0x27   : > { %v827_v45 = vrot.slane %v825_v35, 4  ;;  %v1750_v4 = vpack.c.b16 %v1734_v56, %v1733_v47  ;;  %v1019_v6 = vrot.slane %v1017_v60, 4  ;;  %v1030_v12 = vshrl.u32 %v672_v55, 16  ;;  %v646_v56 = vld [vmem:[%s7868_s23 + $0x44] sm:$0x1] }
  0x28   : > { %v841_v9 = vor.u32 %v840_v0, %v836_v58  ;;  %v6635_v18 = vrot.slane %v1453_v62, 9  ;;  %v6643_v32 = vrot.slane %v1477_v14, 9  ;;  %v668_v62 = vld [vmem:[%s7868_s23 + $0x9c] sm:$0xf] }
  0x29   : > { %v7982_v15 = vsel %vm426_vm0, %v1750_v4, 0  ;;  %v1032_v26 = vrot.slane %v1030_v12, 4  ;;  %v669_v4 = vld [vmem:[%s7868_s23 + $0xa0] sm:$0xf]  ;;  %v1450_v14 = vld [vmem:[%s7868_s23 + $0x3c] sm:$0xe] }
  0x2b   : > { %502 = vmatpush.bf16.xpose.msra.mxu0 %v464_v19  ;;  %7661 = vmatpush.bf16.xpose.msra.mxu2 %v464_v19  ;;  %v1151_v19 = vunpack.c.l.b16 %v1053_v13  ;;  %v1036_v13 = vshll.u32 %v673_v59, 16 }
  0x2c   : > { %551 = vmatpush.bf16.xpose.msra.mxu1 %v488_v20  ;;  %7669 = vmatpush.bf16.xpose.msra.mxu3 %v488_v20  ;;  %v1588_v20 = vrot.slane %v1458_v2, 5  ;;  %v1020_v2 = vshll.u32 %v671_v46, 16 }
  0x2d   : > { %v1168_v37 = vpack.c.b16 %v1152_v27, %v1151_v19  ;;  %v1478_v19 = vld [vmem:[%s7868_s23 + $0xac] sm:$0xf]  ;;  %v1479_v27 = vld [vmem:[%s7868_s23 + $0xb0] sm:$0x1]  ;;  %v1038_v28 = vrot.slane %v1036_v13, 5  ;;  %v993_v13 = vshrl.u32 %v668_v62, 16 }
  0x2e   : > { %v1589_v38 = vsel %vm7936_vm6, %v1587_v29, %v1588_v20  ;;  %v1022_v11 = vrot.slane %v1020_v2, 5  ;;  %v1578_v29 = vrot.slane %v1454_v3, 5  ;;  %v1634_v35 = vrot.slane %v1478_v19, 5 }
  0x2f   : > { %v1718_v40 = vunpack.c.l.b16 %v1589_v38  ;;  %v810_v3 = vshll.u32 %v645_v51, 16 }
  0x30   : > { %v1023_v25 = vor.u32 %v1022_v11, %v1019_v6  ;;  %v1579_v38 = vsel %vm7936_vm6, %v6635_v18, %v1578_v29  ;;  %v1580_v39 = vrot.slane %v1578_v29, 4  ;;  %v1635_v46 = vsel %vm7936_vm6, %v6643_v32, %v1634_v35 }
  0x31   : > { %v1742_v50 = vpack.c.b16 %v1718_v40, %v1717_v31  ;;  %v1581_v31 = vrot.slane %v1455_v8, 5  ;;  %v644_v40 = vld [vmem:[%s7868_s23 + $0x3c] sm:$0xf]  ;;  %v1731_v55 = vunpack.c.l.b16 %v1635_v46  ;;  %v670_v8 = vld [vmem:[%s7868_s23 + $0xa4] sm:$0x1]  ;;  %v812_v12 = vrot.slane %v810_v3, 5 }
  0x32   : > { %v1024_v33 = vrot.slane %v1023_v25, 4  ;;  %v804_v60 = vshll.u32 %v644_v40, 16  ;;  %v995_v25 = vrot.slane %v993_v13, 4  ;;  %v1012_v32 = vshll.u32 %v670_v8, 16  ;;  %v665_v13 = vld [vmem:[%s7868_s23 + $0x90] sm:$0xf] }
  0x33   : > { %503 = vmatpush.bf16.xpose.msra.mxu0 %v7892_v21  ;;  %7662 = vmatpush.bf16.xpose.msra.mxu2 %v7892_v21  ;;  %v828_v21 = vshll.u32 %v647_v17, 16  ;;  %v7972_v63 = vsel %vm426_vm0, %v1742_v50, 0  ;;  %v1028_v17 = vrot.slane %v1026_v7, 5  ;;  %v1582_v49 = vsel %vm7936_vm6, %v1580_v39, %v1581_v31 }
  0x34   : > { %552 = vmatpush.bf16.xpose.msra.mxu1 %v7895_v22  ;;  %7670 = vmatpush.bf16.xpose.msra.mxu3 %v7895_v22  ;;  %v7964_v22 = vsel %vm426_vm0, %v1168_v37, 0  ;;  %v1636_v50 = vrot.slane %v1634_v35, 4  ;;  %v1716_v54 = vunpack.c.l.b16 %v1582_v49  ;;  %v806_v6 = vrot.slane %v804_v60, 5  ;;  %v641_v49 = vld [vmem:[%s7868_s23 + $0x30] sm:$0xf] }
  0x35   : > { %v830_v48 = vrot.slane %v828_v21, 5  ;;  %v1033_v34 = vor.u32 %v1032_v26, %v1028_v17  ;;  %v1637_v21 = vrot.slane %v1479_v27, 5  ;;  %v1029_v41 = vsel %vm7926_vm3, %v1024_v33, %v1028_v17 }
  0x36   : > { %v814_v7 = vshrl.u32 %v645_v51, 16  ;;  %v996_v26 = vshll.u32 %v668_v62, 16  ;;  %v1002_v27 = vshll.u32 %v669_v4, 16  ;;  %v1006_v31 = vshrl.u32 %v669_v4, 16 }
  0x37   : > { %v831_v57 = vor.u32 %v830_v48, %v827_v45  ;;  %v1034_v42 = vrot.slane %v1033_v34, 4  ;;  %v1715_v45 = vunpack.c.l.b16 %v1579_v38  ;;  %v1149_v48 = vunpack.c.l.b16 %v1029_v41  ;;  %v1474_v38 = vld [vmem:[%s7868_s23 + $0x9c] sm:$0xe] }
  0x38   : > { %v816_v18 = vrot.slane %v814_v7, 4  ;;  %v998_v33 = vrot.slane %v996_v26, 5  ;;  %v1004_v34 = vrot.slane %v1002_v27, 5  ;;  %v6634_v35 = vrot.slane %v1450_v14, 9  ;;  %v643_v7 = vld [vmem:[%s7868_s23 + $0x38] sm:$0x1] }
  0x39   : > { %v832_v5 = vrot.slane %v831_v57, 4  ;;  %v1039_v52 = vsel %vm7926_vm3, %v1034_v42, %v1038_v28  ;;  %v801_v57 = vshrl.u32 %v644_v40, 16  ;;  %v1741_v0 = vpack.c.b16 %v1716_v54, %v1715_v45  ;;  %v1475_v42 = vld [vmem:[%s7868_s23 + $0xa0] sm:$0xf] }
  0x3a   : > { %v1150_v59 = vunpack.c.l.b16 %v1039_v52  ;;  %v817_v29 = vor.u32 %v816_v18, %v812_v12  ;;  %v1008_v40 = vrot.slane %v1006_v31, 4  ;;  %v1014_v41 = vrot.slane %v1012_v32, 5 }
  0x3b   : > { %504 = vmatpush.bf16.xpose.msra.mxu0 %v7898_v23  ;;  %7663 = vmatpush.bf16.xpose.msra.mxu2 %v7898_v23  ;;  %v837_v16 = vsel %vm7926_vm3, %v832_v5, %v836_v58  ;;  %v842_v23 = vrot.slane %v841_v9, 4  ;;  %v803_v2 = vrot.slane %v801_v57, 4  ;;  %v8016_v9 = vsel %vm426_vm0, %v1741_v0, 0 }
  0x3c   : > { %553 = vmatpush.bf16.xpose.msra.mxu1 %v7901_v24  ;;  %7671 = vmatpush.bf16.xpose.msra.mxu3 %v7901_v24  ;;  %v1133_v20 = vunpack.c.l.b16 %v837_v16  ;;  %v1167_v5 = vpack.c.b16 %v1150_v59, %v1149_v48  ;;  %v999_v45 = vor.u32 %v998_v33, %v995_v25  ;;  %v1476_v48 = vld [vmem:[%s7868_s23 + $0xa4] sm:$0x1]  ;;  %v1627_v57 = vrot.slane %v1475_v42, 5 }
  0x3d   : > { %v847_v24 = vsel %vm7926_vm3, %v842_v23, %v846_v1  ;;  %v807_v17 = vor.u32 %v806_v6, %v803_v2  ;;  %v1451_v23 = vld [vmem:[%s7868_s23 + $0x40] sm:$0xf]  ;;  %v1630_v60 = vrot.slane %v1476_v48, 5  ;;  %v642_v2 = vld [vmem:[%s7868_s23 + $0x34] sm:$0xf]  ;;  %v796_v27 = vshll.u32 %v643_v7, 16 }
  0x3e   : > { %v1134_v37 = vunpack.c.l.b16 %v847_v24  ;;  %v8020_v16 = vsel %vm426_vm0, %v1167_v5, 0  ;;  %v1452_v24 = vld [vmem:[%s7868_s23 + $0x44] sm:$0x1]  ;;  %v1629_v5 = vrot.slane %v1627_v57, 4  ;;  %v786_v18 = vshll.u32 %v642_v2, 16 }
  0x3f   : > { %v808_v28 = vrot.slane %v807_v17, 4  ;;  %v1574_v51 = vrot.slane %v1452_v24, 5  ;;  %v780_v17 = vshll.u32 %v641_v49, 16  ;;  %v667_v24 = vld [vmem:[%s7868_s23 + $0x98] sm:$0x1] }
  0x40   : > { %v1159_v47 = vpack.c.b16 %v1134_v37, %v1133_v20  ;;  %v1571_v37 = vrot.slane %v1451_v23, 5  ;;  %v1631_v14 = vsel %vm7936_vm6, %v1629_v5, %v1630_v60  ;;  %v788_v31 = vrot.slane %v786_v18, 5 }
  0x41   : > { %v813_v39 = vsel %vm7926_vm3, %v808_v28, %v812_v12  ;;  %v1730_v26 = vunpack.c.l.b16 %v1631_v14  ;;  %v666_v28 = vld [vmem:[%s7868_s23 + $0x94] sm:$0xf] }
  0x42   : > { %v8008_v58 = vsel %vm426_vm0, %v1159_v47, 0  ;;  %v1572_v46 = vsel %vm7936_vm6, %v6634_v35, %v1571_v37  ;;  %v1573_v47 = vrot.slane %v1571_v37, 4  ;;  %v972_v35 = vshll.u32 %v665_v13, 16  ;;  %v1447_v37 = vld [vmem:[%s7868_s23 + $0x30] sm:$0xe] }
  0x43   : > { %505 = vmatpush.bf16.xpose.msra.mxu0 %v7909_v30  ;;  %7664 = vmatpush.bf16.xpose.msra.mxu2 %v7909_v30  ;;  %v1638_v30 = vsel %vm7936_vm6, %v1636_v50, %v1637_v21  ;;  %v818_v21 = vrot.slane %v817_v29, 4  ;;  %v7558_v50 = vld [vmem:[%s10842_s1 + $0x20] sm:$0xff]  ;;  %v1713_v52 = vunpack.c.l.b16 %v1572_v46  ;;  %v782_v29 = vrot.slane %v780_v17, 5  ;;  %v1471_v46 = vld [vmem:[%s7868_s23 + $0x90] sm:$0xe] }
  0x44   : > { %554 = vmatpush.bf16.xpose.msra.mxu1 %v7913_v43  ;;  %7672 = vmatpush.bf16.xpose.msra.mxu3 %v7913_v43  ;;  %v1732_v1 = vunpack.c.l.b16 %v1638_v30  ;;  %v820_v43 = vshll.u32 %v646_v56, 16  ;;  %v6642_v56 = vrot.slane %v1474_v38, 9  ;;  %v1575_v30 = vsel %vm7936_vm6, %v1573_v47, %v1574_v51  ;;  %v639_v17 = vld [vmem:[%s7868_s23 + $0x28] sm:$0xf] }
  0x45   : > { %v1714_v0 = vunpack.c.l.b16 %v1575_v30  ;;  %v974_v42 = vrot.slane %v972_v35, 5 }
  0x46   : > { %v1749_v11 = vpack.c.b16 %v1732_v1, %v1731_v55  ;;  %v822_v19 = vrot.slane %v820_v43, 5  ;;  %v1000_v55 = vrot.slane %v999_v45, 4  ;;  %v1628_v1 = vsel %vm7936_vm6, %v6642_v56, %v1627_v57 }
  0x47   : > { %v1729_v6 = vunpack.c.l.b16 %v1628_v1  ;;  %v988_v45 = vshll.u32 %v667_v24, 16 }
  0x48   : > { %v8024_v20 = vsel %vm426_vm0, %v1749_v11, 0  ;;  %v1740_v11 = vpack.c.b16 %v1714_v0, %v1713_v52  ;;  %v7559_v0 = vld [vmem:[%s10842_s1 + $0x28] sm:$0xff] }
  0x49   : > { %v1748_v33 = vpack.c.b16 %v1730_v26, %v1729_v6  ;;  %v990_v51 = vrot.slane %v988_v45, 5  ;;  %v640_v26 = vld [vmem:[%s7868_s23 + $0x2c] sm:$0x1] }
  0x4a   : > { %v1791_v25 = vsel %vm426_vm0, %v1740_v11, 0 }
  0x4b   : > { %506 = vmatpush.bf16.xpose.msra.mxu0 %v7916_v44  ;;  %7665 = vmatpush.bf16.xpose.msra.mxu2 %v7916_v44  ;;  %v1131_v44 = vunpack.c.l.b16 %v813_v39 }
  0x4c   : > { %555 = vmatpush.bf16.xpose.msra.mxu1 %v7922_v53  ;;  %7673 = vmatpush.bf16.xpose.msra.mxu3 %v7922_v53  ;;  %v7554_v53 = vld [vmem:[%s10842_s1] sm:$0xff] }
  0x52   : > { %6549 = vmatmul.msk.bf16.vlgmr.msra.gmra.mxu0 %vm426_vm0, %v7554_v53  ;;  %6553 = vmatmul.msk.bf16.vlgmr.msra.gmra.mxu2 %vm426_vm0, %v7558_v50 }
  0x53   : > { %1241 = vmatpush.bf16.xpose.msrb.mxu2 %v7955_v36  ;;  %1823 = vmatpush.bf16.xpose.msrb.mxu0 %v7972_v63  ;;  %v823_v36 = vsel %vm7926_vm3, %v818_v21, %v822_v19  ;;  %v777_v63 = vshrl.u32 %v641_v49, 16  ;;  %v790_v19 = vshrl.u32 %v642_v2, 16  ;;  %v978_v21 = vshll.u32 %v666_v28, 16 }
  0x54   : > { %1290 = vmatpush.bf16.xpose.msrb.mxu3 %v7964_v22  ;;  %1872 = vmatpush.bf16.xpose.msrb.mxu1 %v7982_v15  ;;  %v1009_v22 = vor.u32 %v1008_v40, %v1004_v34  ;;  %v1132_v54 = vunpack.c.l.b16 %v823_v36  ;;  %v1005_v15 = vsel %vm7926_vm3, %v1000_v55, %v1004_v34  ;;  %v798_v34 = vrot.slane %v796_v27, 5  ;;  %v1448_v40 = vld [vmem:[%s7868_s23 + $0x34] sm:$0xf] }
  0x55   : > { %v1147_v4 = vunpack.c.l.b16 %v1005_v15  ;;  %6557 = vmatmul.msk.bf16.vlgmr.msra.gmra.mxu1 %vm426_vm0, %v7554_v53  ;;  %6561 = vmatmul.msk.bf16.vlgmr.msra.gmra.mxu3 %vm426_vm0, %v7558_v50  ;;  %v779_v12 = vrot.slane %v777_v63, 4  ;;  %v792_v32 = vrot.slane %v790_v19, 4  ;;  %v980_v49 = vrot.slane %v978_v21, 5  ;;  %v1472_v50 = vld [vmem:[%s7868_s23 + $0x94] sm:$0xf]  ;;  %v7555_v15 = vld [vmem:[%s10842_s1 + $0x8] sm:$0xff] }
  0x56   : > { %v1010_v59 = vrot.slane %v1009_v22, 4  ;;  %v1158_v62 = vpack.c.b16 %v1132_v54, %v1131_v44  ;;  %v982_v44 = vshrl.u32 %v666_v28, 16  ;;  %v6633_v53 = vrot.slane %v1447_v37, 9  ;;  %v1473_v54 = vld [vmem:[%s7868_s23 + $0x98] sm:$0x1] }
  0x57   : > { %v783_v38 = vor.u32 %v782_v29, %v779_v12  ;;  %v793_v39 = vor.u32 %v792_v32, %v788_v31  ;;  %v1564_v52 = vrot.slane %v1448_v40, 5 }
  0x58   : > { %v1015_v3 = vsel %vm7926_vm3, %v1010_v59, %v1014_v41  ;;  %v1209_v43 = vsel %vm426_vm0, %v1158_v62, 0  ;;  %v1815_v41 = vsel %vm426_vm0, %v1748_v33, 0  ;;  %v984_v22 = vrot.slane %v982_v44, 4  ;;  %v662_v33 = vld [vmem:[%s7868_s23 + $0x84] sm:$0xf] }
  0x59   : > { %v1148_v8 = vunpack.c.l.b16 %v1015_v3  ;;  %v784_v47 = vrot.slane %v783_v38, 4  ;;  %v794_v48 = vrot.slane %v793_v39, 4  ;;  %v6641_v59 = vrot.slane %v1471_v46, 9  ;;  %v663_v39 = vld [vmem:[%s7868_s23 + $0x88] sm:$0xf] }
  0x5a   : > { %v985_v62 = vor.u32 %v984_v22, %v980_v49  ;;  %v1565_v1 = vsel %vm7936_vm6, %v6633_v53, %v1564_v52  ;;  %v1566_v2 = vrot.slane %v1564_v52, 4  ;;  %v1620_v3 = vrot.slane %v1472_v50, 5 }
  0x5b   : > { %1242 = vmatpush.bf16.xpose.msrb.mxu2 %v8008_v58  ;;  %v1166_v23 = vpack.c.b16 %v1148_v8, %v1147_v4  ;;  %1824 = vmatpush.bf16.xpose.msrb.mxu0 %v8016_v9  ;;  %v969_v58 = vshrl.u32 %v665_v13, 16  ;;  %v789_v55 = vsel %vm7926_vm3, %v784_v47, %v788_v31  ;;  %v799_v56 = vsel %vm7926_vm3, %v794_v48, %v798_v34  ;;  %v638_v8 = vld [vmem:[%s7868_s23 + $0x24] sm:$0xf] }
  0x5c   : > { %1291 = vmatpush.bf16.xpose.msrb.mxu3 %v8020_v16  ;;  %1873 = vmatpush.bf16.xpose.msrb.mxu1 %v8024_v20  ;;  %v1449_v20 = vld [vmem:[%s7868_s23 + $0x38] sm:$0x1]  ;;  %v1129_v30 = vunpack.c.l.b16 %v789_v55  ;;  %v1130_v60 = vunpack.c.l.b16 %v799_v56  ;;  %v1623_v4 = vrot.slane %v1473_v54, 5  ;;  %v986_v7 = vrot.slane %v985_v62, 4  ;;  %v1444_v47 = vld [vmem:[%s7868_s23 + $0x24] sm:$0xe] }
  0x5d   : > { %v1233_v16 = vsel %vm426_vm0, %v1166_v23, 0  ;;  %v971_v9 = vrot.slane %v969_v58, 4  ;;  %v1567_v57 = vrot.slane %v1449_v20, 5  ;;  %v1621_v13 = vsel %vm7936_vm6, %v6641_v59, %v1620_v3  ;;  %v1446_v55 = vld [vmem:[%s7868_s23 + $0x2c] sm:$0x1] }
  0x5e   : > { %v1157_v5 = vpack.c.b16 %v1130_v60, %v1129_v30  ;;  %v1622_v14 = vrot.slane %v1620_v3, 4  ;;  %v991_v19 = vsel %vm7926_vm3, %v986_v7, %v990_v51  ;;  %v753_v29 = vshrl.u32 %v638_v8, 16  ;;  %v1468_v60 = vld [vmem:[%s7868_s23 + $0x84] sm:$0xe] }
  0x5f   : > { %v975_v36 = vor.u32 %v974_v42, %v971_v9  ;;  %v1568_v12 = vsel %vm7936_vm6, %v1566_v2, %v1567_v57  ;;  %v1146_v27 = vunpack.c.l.b16 %v991_v19  ;;  %v756_v31 = vshll.u32 %v638_v8, 16  ;;  %v7560_v19 = vld [vmem:[%s10842_s1 + $0x30] sm:$0xff] }
  0x60   : > { %v1206_v18 = vsel %vm426_vm0, %v1157_v5, 0  ;;  %v1712_v23 = vunpack.c.l.b16 %v1568_v12  ;;  %v1624_v28 = vsel %vm7936_vm6, %v1622_v14, %v1623_v4  ;;  %v762_v58 = vshll.u32 %v639_v17, 16 }
  0x61   : > { %v976_v63 = vrot.slane %v975_v36, 4  ;;  %v1728_v24 = vunpack.c.l.b16 %v1624_v28  ;;  %v755_v35 = vrot.slane %v753_v29, 4  ;;  %v758_v37 = vrot.slane %v756_v31, 5  ;;  %v1445_v36 = vld [vmem:[%s7868_s23 + $0x28] sm:$0xf] }
  0x62   : > { %6550 = vmatmul.msk.bf16.gmra.mxu0 %vm426_vm0, %v7555_v15  ;;  %6554 = vmatmul.msk.bf16.gmra.mxu2 %vm426_vm0, %v7559_v0  ;;  %v772_v38 = vshll.u32 %v640_v26, 16  ;;  %v764_v40 = vrot.slane %v762_v58, 5  ;;  %v945_v46 = vshrl.u32 %v662_v33, 16  ;;  %v948_v53 = vshll.u32 %v662_v33, 16  ;;  %v635_v28 = vld [vmem:[%s7868_s23 + $0x18] sm:$0xf] }
  0x63   : > { %1243 = vmatpush.bf16.xpose.msrb.mxu2 %v1209_v43  ;;  %1825 = vmatpush.bf16.xpose.msrb.mxu0 %v1791_v25  ;;  %v981_v6 = vsel %vm7926_vm3, %v976_v63, %v980_v49  ;;  %v1711_v43 = vunpack.c.l.b16 %v1565_v1  ;;  %v1727_v25 = vunpack.c.l.b16 %v1621_v13  ;;  %v759_v44 = vor.u32 %v758_v37, %v755_v35  ;;  %v1469_v1 = vld [vmem:[%s7868_s23 + $0x88] sm:$0xf]  ;;  %v636_v58 = vld [vmem:[%s7868_s23 + $0x1c] sm:$0xf]  ;;  %v637_v37 = vld [vmem:[%s7868_s23 + $0x20] sm:$0x1] }
  0x64   : > { %1292 = vmatpush.bf16.xpose.msrb.mxu3 %v1233_v16  ;;  %1874 = vmatpush.bf16.xpose.msrb.mxu1 %v1815_v41  ;;  %v1145_v11 = vunpack.c.l.b16 %v981_v6  ;;  %v766_v16 = vshrl.u32 %v639_v17, 16  ;;  %v664_v41 = vld [vmem:[%s7868_s23 + $0x8c] sm:$0x1]  ;;  %v774_v45 = vrot.slane %v772_v38, 5  ;;  %v954_v50 = vshll.u32 %v663_v39, 16 }
  0x65   : > { %6558 = vmatmul.msk.bf16.gmra.mxu1 %vm426_vm0, %v7555_v15  ;;  %6562 = vmatmul.msk.bf16.gmra.mxu3 %vm426_vm0, %v7559_v0  ;;  %v1739_v32 = vpack.c.b16 %v1712_v23, %v1711_v43  ;;  %v1747_v21 = vpack.c.b16 %v1728_v24, %v1727_v25  ;;  %v760_v22 = vrot.slane %v759_v44, 4  ;;  %v947_v51 = vrot.slane %v945_v46, 4  ;;  %v1470_v6 = vld [vmem:[%s7868_s23 + $0x8c] sm:$0x1]  ;;  %v659_v44 = vld [vmem:[%s7868_s23 + $0x78] sm:$0xf] }
  0x66   : > { %v1165_v34 = vpack.c.b16 %v1146_v27, %v1145_v11  ;;  %v768_v20 = vrot.slane %v766_v16, 4  ;;  %v958_v52 = vshrl.u32 %v663_v39, 16  ;;  %v964_v54 = vshll.u32 %v664_v41, 16 }
  0x67   : > { %v1788_v9 = vsel %vm426_vm0, %v1739_v32, 0  ;;  %v1812_v48 = vsel %vm426_vm0, %v1747_v21, 0  ;;  %v950_v57 = vrot.slane %v948_v53, 5  ;;  %v956_v59 = vrot.slane %v954_v50, 5 }
  0x68   : > { %v1230_v42 = vsel %vm426_vm0, %v1165_v34, 0  ;;  %v769_v49 = vor.u32 %v768_v20, %v764_v40  ;;  %v6632_v30 = vrot.slane %v1444_v47, 9  ;;  %v765_v63 = vsel %vm7926_vm3, %v760_v22, %v764_v40 }
  0x69   : > { %v960_v62 = vrot.slane %v958_v52, 4  ;;  %v966_v15 = vrot.slane %v964_v54, 5  ;;  %v1557_v0 = vrot.slane %v1445_v36, 5  ;;  %v1127_v3 = vunpack.c.l.b16 %v765_v63 }
  0x6a   : > { %v770_v56 = vrot.slane %v769_v49, 4  ;;  %v951_v4 = vor.u32 %v950_v57, %v947_v51  ;;  %v1560_v5 = vrot.slane %v1446_v55, 5  ;;  %v6640_v14 = vrot.slane %v1468_v60, 9  ;;  %v660_v49 = vld [vmem:[%s7868_s23 + $0x7c] sm:$0xf] }
  0x6b   : > { %1244 = vmatpush.bf16.xpose.msrb.mxu2 %v1206_v18  ;;  %1826 = vmatpush.bf16.xpose.msrb.mxu0 %v1788_v9  ;;  %v961_v43 = vor.u32 %v960_v62, %v956_v59  ;;  %v1558_v8 = vsel %vm7936_vm6, %v6632_v30, %v1557_v0  ;;  %v1559_v11 = vrot.slane %v1557_v0, 4  ;;  %v1613_v17 = vrot.slane %v1469_v1, 5  ;;  %v7556_v18 = vld [vmem:[%s10842_s1 + $0x10] sm:$0xff]  ;;  %v661_v51 = vld [vmem:[%s7868_s23 + $0x80] sm:$0x1] }
  0x6c   : > { %1293 = vmatpush.bf16.xpose.msrb.mxu3 %v1230_v42  ;;  %1875 = vmatpush.bf16.xpose.msrb.mxu1 %v1812_v48  ;;  %v775_v2 = vsel %vm7926_vm3, %v770_v56, %v774_v45  ;;  %v952_v12 = vrot.slane %v951_v4, 4  ;;  %v1709_v13 = vunpack.c.l.b16 %v1558_v8  ;;  %v1616_v27 = vrot.slane %v1470_v6, 5  ;;  %v1441_v57 = vld [vmem:[%s7868_s23 + $0x18] sm:$0xe]  ;;  %v1442_v62 = vld [vmem:[%s7868_s23 + $0x1c] sm:$0xf] }
  0x6d   : > { %v1128_v7 = vunpack.c.l.b16 %v775_v2  ;;  %v962_v25 = vrot.slane %v961_v43, 4  ;;  %v1561_v26 = vsel %vm7936_vm6, %v1559_v11, %v1560_v5  ;;  %v1614_v32 = vsel %vm7936_vm6, %v6640_v14, %v1613_v17  ;;  %v1465_v4 = vld [vmem:[%s7868_s23 + $0x78] sm:$0xe]  ;;  %v1466_v8 = vld [vmem:[%s7868_s23 + $0x7c] sm:$0xf] }
  0x6e   : > { %v957_v29 = vsel %vm7926_vm3, %v952_v12, %v956_v59  ;;  %v1710_v31 = vunpack.c.l.b16 %v1561_v26  ;;  %v1615_v24 = vrot.slane %v1613_v17, 4  ;;  %v1725_v35 = vunpack.c.l.b16 %v1614_v32  ;;  %v1467_v17 = vld [vmem:[%s7868_s23 + $0x80] sm:$0x1] }
  0x6f   : > { %v1156_v23 = vpack.c.b16 %v1128_v7, %v1127_v3  ;;  %v967_v33 = vsel %vm7926_vm3, %v962_v25, %v966_v15  ;;  %v1143_v34 = vunpack.c.l.b16 %v957_v29  ;;  %v729_v21 = vshrl.u32 %v635_v28, 16  ;;  %v1443_v15 = vld [vmem:[%s7868_s23 + $0x20] sm:$0x1] }
  0x70   : > { %v1144_v38 = vunpack.c.l.b16 %v967_v33  ;;  %v1738_v39 = vpack.c.b16 %v1710_v31, %v1709_v13  ;;  %v1617_v9 = vsel %vm7936_vm6, %v1615_v24, %v1616_v27  ;;  %v732_v20 = vshll.u32 %v635_v28, 16 }
  0x71   : > { %v1203_v16 = vsel %vm426_vm0, %v1156_v23, 0  ;;  %v1726_v40 = vunpack.c.l.b16 %v1617_v9  ;;  %v738_v41 = vshll.u32 %v636_v58, 16  ;;  %v742_v42 = vshrl.u32 %v636_v58, 16 }
  0x72   : > { %6551 = vmatmul.msk.bf16.gmra.mxu0 %vm426_vm0, %v7556_v18  ;;  %6555 = vmatmul.msk.bf16.gmra.mxu2 %vm426_vm0, %v7560_v19  ;;  %v1164_v45 = vpack.c.b16 %v1144_v38, %v1143_v34  ;;  %v1785_v46 = vsel %vm426_vm0, %v1738_v39, 0  ;;  %v731_v47 = vrot.slane %v729_v21, 4  ;;  %v748_v48 = vshll.u32 %v637_v37, 16  ;;  %v632_v37 = vld [vmem:[%s7868_s23 + $0xc] sm:$0xf] }
  0x73   : > { %1245 = vmatpush.bf16.xpose.msrb.mxu2 %v1203_v16  ;;  %1827 = vmatpush.bf16.xpose.msrb.mxu0 %v1785_v46  ;;  %v1746_v53 = vpack.c.b16 %v1726_v40, %v1725_v35  ;;  %v734_v50 = vrot.slane %v732_v20, 5  ;;  %v740_v36 = vrot.slane %v738_v41, 5  ;;  %v744_v22 = vrot.slane %v742_v42, 4  ;;  %v7557_v40 = vld [vmem:[%s10842_s1 + $0x18] sm:$0xff]  ;;  %v633_v41 = vld [vmem:[%s7868_s23 + $0x10] sm:$0xf] }
  0x74   : > { %v1227_v52 = vsel %vm426_vm0, %v1164_v45, 0  ;;  %v750_v54 = vrot.slane %v748_v48, 5  ;;  %v921_v55 = vshrl.u32 %v659_v44, 16  ;;  %v924_v56 = vshll.u32 %v659_v44, 16  ;;  %v7561_v20 = vld [vmem:[%s10842_s1 + $0x38] sm:$0xff] }
  0x75   : > { %6559 = vmatmul.msk.bf16.gmra.mxu1 %vm426_vm0, %v7556_v18  ;;  %6563 = vmatmul.msk.bf16.gmra.mxu3 %vm426_vm0, %v7560_v19  ;;  %v1809_v59 = vsel %vm426_vm0, %v1746_v53, 0  ;;  %v735_v30 = vor.u32 %v734_v50, %v731_v47  ;;  %v745_v60 = vor.u32 %v744_v22, %v740_v36  ;;  %v930_v63 = vshll.u32 %v660_v49, 16  ;;  %v634_v47 = vld [vmem:[%s7868_s23 + $0x14] sm:$0x1] }
  0x76   : > { %1294 = vmatpush.bf16.xpose.msrb.mxu3 %v1227_v52  ;;  %1876 = vmatpush.bf16.xpose.msrb.mxu1 %v1809_v59  ;;  %v923_v0 = vrot.slane %v921_v55, 4  ;;  %v926_v1 = vrot.slane %v924_v56, 5  ;;  %v934_v2 = vshrl.u32 %v660_v49, 16  ;;  %v940_v3 = vshll.u32 %v661_v51, 16 }
  0x77   : > { %v736_v5 = vrot.slane %v735_v30, 4  ;;  %v746_v6 = vrot.slane %v745_v60, 4  ;;  %v932_v7 = vrot.slane %v930_v63, 5  ;;  %v6631_v43 = vrot.slane %v1441_v57, 9  ;;  %v657_v30 = vld [vmem:[%s7868_s23 + $0x70] sm:$0xf] }
  0x78   : > { %v927_v11 = vor.u32 %v926_v1, %v923_v0  ;;  %v936_v12 = vrot.slane %v934_v2, 4  ;;  %v942_v13 = vrot.slane %v940_v3, 5  ;;  %v1550_v14 = vrot.slane %v1442_v62, 5  ;;  %v658_v0 = vld [vmem:[%s7868_s23 + $0x74] sm:$0x1] }
  0x79   : > { %v741_v18 = vsel %vm7926_vm3, %v736_v5, %v740_v36  ;;  %v751_v19 = vsel %vm7926_vm3, %v746_v6, %v750_v54  ;;  %v1553_v23 = vrot.slane %v1443_v15, 5  ;;  %v6639_v25 = vrot.slane %v1465_v4, 9  ;;  %v656_v54 = vld [vmem:[%s7868_s23 + $0x6c] sm:$0xf] }
  0x7a   : > { %v1125_v26 = vunpack.c.l.b16 %v741_v18  ;;  %v1126_v27 = vunpack.c.l.b16 %v751_v19  ;;  %v928_v28 = vrot.slane %v927_v11, 4  ;;  %v937_v29 = vor.u32 %v936_v12, %v932_v7  ;;  %v1438_v5 = vld [vmem:[%s7868_s23 + $0xc] sm:$0xe]  ;;  %v1439_v11 = vld [vmem:[%s7868_s23 + $0x10] sm:$0xf] }
  0x7b   : > { %v1551_v31 = vsel %vm7936_vm6, %v6631_v43, %v1550_v14  ;;  %v1552_v32 = vrot.slane %v1550_v14, 4  ;;  %v1606_v24 = vrot.slane %v1466_v8, 5  ;;  %v1609_v58 = vrot.slane %v1467_v17, 5  ;;  %v1440_v18 = vld [vmem:[%s7868_s23 + $0x14] sm:$0x1] }
  0x7c   : > { %v1155_v16 = vpack.c.b16 %v1126_v27, %v1125_v26  ;;  %v933_v33 = vsel %vm7926_vm3, %v928_v28, %v932_v7  ;;  %v938_v34 = vrot.slane %v937_v29, 4  ;;  %v1707_v35 = vunpack.c.l.b16 %v1551_v31  ;;  %v1463_v27 = vld [vmem:[%s7868_s23 + $0x70] sm:$0xf] }
  0x7d   : > { %v1141_v38 = vunpack.c.l.b16 %v933_v33  ;;  %v1554_v39 = vsel %vm7936_vm6, %v1552_v32, %v1553_v23  ;;  %v1607_v9 = vsel %vm7936_vm6, %v6639_v25, %v1606_v24  ;;  %v1608_v21 = vrot.slane %v1606_v24, 4  ;;  %v1462_v24 = vld [vmem:[%s7868_s23 + $0x6c] sm:$0xe] }
  0x7e   : > { %v1200_v42 = vsel %vm426_vm0, %v1155_v16, 0  ;;  %v943_v44 = vsel %vm7926_vm3, %v938_v34, %v942_v13  ;;  %v1708_v45 = vunpack.c.l.b16 %v1554_v39  ;;  %v1723_v46 = vunpack.c.l.b16 %v1607_v9 }
  0x7f   : > { %1246 = vmatpush.bf16.xpose.msrb.mxu2 %v1200_v42  ;;  %v1142_v48 = vunpack.c.l.b16 %v943_v44  ;;  %v1610_v49 = vsel %vm7936_vm6, %v1608_v21, %v1609_v58  ;;  %v705_v53 = vshrl.u32 %v632_v37, 16  ;;  %v708_v50 = vshll.u32 %v632_v37, 16 }
  0x80   : > { %v1737_v36 = vpack.c.b16 %v1708_v45, %v1707_v35  ;;  %v1724_v22 = vunpack.c.l.b16 %v1610_v49  ;;  %v714_v51 = vshll.u32 %v633_v41, 16  ;;  %v718_v52 = vshrl.u32 %v633_v41, 16  ;;  %v1464_v35 = vld [vmem:[%s7868_s23 + $0x74] sm:$0x1] }
  0x81   : > { %v1163_v55 = vpack.c.b16 %v1142_v48, %v1141_v38  ;;  %v707_v56 = vrot.slane %v705_v53, 4  ;;  %v710_v57 = vrot.slane %v708_v50, 5  ;;  %v724_v59 = vshll.u32 %v634_v47, 16  ;;  %v629_v47 = vld [vmem:[%s7868_s23] sm:$0xf] }
  0x82   : > { %6552 = vmatmul.msk.bf16.gmra.mxu0 %vm426_vm0, %v7557_v40  ;;  %6556 = vmatmul.msk.bf16.gmra.mxu2 %vm426_vm0, %v7561_v20  ;;  %v1782_v60 = vsel %vm426_vm0, %v1737_v36, 0  ;;  %v1745_v63 = vpack.c.b16 %v1724_v22, %v1723_v46  ;;  %v716_v62 = vrot.slane %v714_v51, 5  ;;  %v720_v15 = vrot.slane %v718_v52, 4  ;;  %v630_v36 = vld [vmem:[%s7868_s23 + $0x4] sm:$0xf] }
  0x83   : > { %v1224_v1 = vsel %vm426_vm0, %v1163_v55, 0  ;;  %1828 = vmatpush.bf16.xpose.msrb.mxu0 %v1782_v60  ;;  %v711_v2 = vor.u32 %v710_v57, %v707_v56  ;;  %v726_v3 = vrot.slane %v724_v59, 5  ;;  %v897_v4 = vshrl.u32 %v656_v54, 16  ;;  %v631_v55 = vld [vmem:[%s7868_s23 + $0x8] sm:$0x1] }
  0x84   : > { %1295 = vmatpush.bf16.xpose.msrb.mxu3 %v1224_v1  ;;  %v1806_v6 = vsel %vm426_vm0, %v1745_v63, 0  ;;  %v721_v7 = vor.u32 %v720_v15, %v716_v62  ;;  %v900_v43 = vshll.u32 %v656_v54, 16  ;;  %v906_v8 = vshll.u32 %v657_v30, 16 }
  0x85   : > { %6560 = vmatmul.msk.bf16.gmra.mxu1 %vm426_vm0, %v7557_v40  ;;  %6564 = vmatmul.msk.bf16.gmra.mxu3 %vm426_vm0, %v7561_v20  ;;  %v712_v12 = vrot.slane %v711_v2, 4  ;;  %v899_v13 = vrot.slane %v897_v4, 4  ;;  %v910_v14 = vshrl.u32 %v657_v30, 16  ;;  %v916_v17 = vshll.u32 %v658_v0, 16  ;;  %v653_v0 = vld [vmem:[%s7868_s23 + $0x60] sm:$0xf] }
  0x86   : > { %1877 = vmatpush.bf16.xpose.msrb.mxu1 %v1806_v6  ;;  %v722_v19 = vrot.slane %v721_v7, 4  ;;  %v902_v23 = vrot.slane %v900_v43, 5  ;;  %v908_v25 = vrot.slane %v906_v8, 5  ;;  %v6630_v26 = vrot.slane %v1438_v5, 9  ;;  %v654_v5 = vld [vmem:[%s7868_s23 + $0x64] sm:$0xf] }
  0x87   : > { %v717_v28 = vsel %vm7926_vm3, %v712_v12, %v716_v62  ;;  %v912_v29 = vrot.slane %v910_v14, 4  ;;  %v918_v31 = vrot.slane %v916_v17, 5  ;;  %v1543_v32 = vrot.slane %v1439_v11, 5  ;;  %v655_v11 = vld [vmem:[%s7868_s23 + $0x68] sm:$0x1] }
  0x88   : > { %v727_v58 = vsel %vm7926_vm3, %v722_v19, %v726_v3  ;;  %v1123_v16 = vunpack.c.l.b16 %v717_v28  ;;  %v903_v33 = vor.u32 %v902_v23, %v899_v13  ;;  %v1546_v34 = vrot.slane %v1440_v18, 5  ;;  %v1435_v18 = vld [vmem:[%s7868_s23] sm:$0xe]  ;;  %v1437_v28 = vld [vmem:[%s7868_s23 + $0x8] sm:$0x1] }
  0x89   : > { %v1124_v37 = vunpack.c.l.b16 %v727_v58  ;;  %v913_v38 = vor.u32 %v912_v29, %v908_v25  ;;  %v1544_v39 = vsel %vm7936_vm6, %v6630_v26, %v1543_v32  ;;  %v1545_v9 = vrot.slane %v1543_v32, 4  ;;  %v1459_v58 = vld [vmem:[%s7868_s23 + $0x60] sm:$0xe] }
  0x8a   : > { %v904_v21 = vrot.slane %v903_v33, 4  ;;  %v1705_v40 = vunpack.c.l.b16 %v1544_v39  ;;  %v6638_v20 = vrot.slane %v1462_v24, 9  ;;  %v1599_v41 = vrot.slane %v1463_v27, 5  ;;  %v1436_v27 = vld [vmem:[%s7868_s23 + $0x4] sm:$0xf] }
  0x8b   : > { %v1154_v42 = vpack.c.b16 %v1124_v37, %v1123_v16  ;;  %v914_v44 = vrot.slane %v913_v38, 4  ;;  %v1547_v45 = vsel %vm7936_vm6, %v1545_v9, %v1546_v34  ;;  %v1602_v46 = vrot.slane %v1464_v35, 5  ;;  %v1460_v37 = vld [vmem:[%s7868_s23 + $0x64] sm:$0xf] }
  0x8c   : > { %v909_v48 = vsel %vm7926_vm3, %v904_v21, %v908_v25  ;;  %v1706_v49 = vunpack.c.l.b16 %v1547_v45  ;;  %v1600_v53 = vsel %vm7936_vm6, %v6638_v20, %v1599_v41  ;;  %v1601_v50 = vrot.slane %v1599_v41, 4 }
  0x8d   : > { %v1197_v22 = vsel %vm426_vm0, %v1154_v42, 0  ;;  %v919_v51 = vsel %vm7926_vm3, %v914_v44, %v918_v31  ;;  %v1139_v52 = vunpack.c.l.b16 %v909_v48  ;;  %v1721_v54 = vunpack.c.l.b16 %v1600_v53 }
  0x8e   : > { %1247 = vmatpush.bf16.xpose.msrb.mxu2 %v1197_v22  ;;  %v1140_v56 = vunpack.c.l.b16 %v919_v51  ;;  %v1736_v57 = vpack.c.b16 %v1706_v49, %v1705_v40  ;;  %v1603_v59 = vsel %vm7936_vm6, %v1601_v50, %v1602_v46  ;;  %v681_v30 = vshrl.u32 %v629_v47, 16  ;;  %v1461_v40 = vld [vmem:[%s7868_s23 + $0x68] sm:$0x1]  ;;  %v7585_v22 = vld [vmem:[%s7868_s23 + $0x60] sm:$0xff] }
  0x8f   : > { %v1722_v60 = vunpack.c.l.b16 %v1603_v59  ;;  %v684_v63 = vshll.u32 %v629_v47, 16  ;;  %v690_v62 = vshll.u32 %v630_v36, 16  ;;  %v694_v15 = vshrl.u32 %v630_v36, 16  ;;  %v7593_v51 = vld [vmem:[%s7868_s23 + $0xc0] sm:$0xff] }
  0x90   : > { %v1162_v1 = vpack.c.b16 %v1140_v56, %v1139_v52  ;;  %v1779_v2 = vsel %vm426_vm0, %v1736_v57, 0  ;;  %v683_v3 = vrot.slane %v681_v30, 4  ;;  %v700_v4 = vshll.u32 %v631_v55, 16 }
  0x91   : > { %1829 = vmatpush.bf16.xpose.msrb.mxu0 %v1779_v2  ;;  %v1744_v6 = vpack.c.b16 %v1722_v60, %v1721_v54  ;;  %v686_v7 = vrot.slane %v684_v63, 5  ;;  %v692_v43 = vrot.slane %v690_v62, 5  ;;  %v696_v8 = vrot.slane %v694_v15, 4  ;;  %v6890_v63 = vld [vmem:[%s7868_s23 + $0x60] sm:$0xf] }
  0x92   : > { %v1221_v12 = vsel %vm426_vm0, %v1162_v1, 0  ;;  %v702_v13 = vrot.slane %v700_v4, 5  ;;  %v873_v14 = vshrl.u32 %v653_v0, 16  ;;  %v876_v17 = vshll.u32 %v653_v0, 16  ;;  %v6891_v2 = vld [vmem:[%s7868_s23 + $0x64] sm:$0xf] }
  0x93   : > { %1296 = vmatpush.bf16.xpose.msrb.mxu3 %v1221_v12  ;;  %v1803_v19 = vsel %vm426_vm0, %v1744_v6, 0  ;;  %v687_v23 = vor.u32 %v686_v7, %v683_v3  ;;  %v697_v25 = vor.u32 %v696_v8, %v692_v43  ;;  %v882_v26 = vshll.u32 %v654_v5, 16  ;;  %v6892_v3 = vld [vmem:[%s7868_s23 + $0x68] sm:$0x1] }
  0x94   : > { %1878 = vmatpush.bf16.xpose.msrb.mxu1 %v1803_v19  ;;  %v875_v29 = vrot.slane %v873_v14, 4  ;;  %v878_v31 = vrot.slane %v876_v17, 5  ;;  %v886_v32 = vshrl.u32 %v654_v5, 16  ;;  %v892_v24 = vshll.u32 %v655_v11, 16  ;;  %v7562_v17 = vld [vmem:[%s10842_s1 + $0x40] sm:$0xff] }
  0x95   : > { %v688_v16 = vrot.slane %v687_v23, 4  ;;  %v698_v33 = vrot.slane %v697_v25, 4  ;;  %v884_v34 = vrot.slane %v882_v26, 5  ;;  %v6629_v35 = vrot.slane %v1435_v18, 9  ;;  %v6915_v25 = vld [vmem:[%s7868_s23 + $0xc4] sm:$0xf] }
  0x96   : > { %v879_v38 = vor.u32 %v878_v31, %v875_v29  ;;  %v888_v39 = vrot.slane %v886_v32, 4  ;;  %v894_v9 = vrot.slane %v892_v24, 5  ;;  %v1536_v21 = vrot.slane %v1436_v27, 5  ;;  %v6916_v31 = vld [vmem:[%s7868_s23 + $0xc8] sm:$0x1]  ;;  %v7584_v32 = vld [vmem:[%s7868_s23 + $0x54] sm:$0xff] }
  0x97   : > { %v693_v20 = vsel %vm7926_vm3, %v688_v16, %v692_v43  ;;  %v703_v41 = vsel %vm7926_vm3, %v698_v33, %v702_v13  ;;  %v1539_v42 = vrot.slane %v1437_v28, 5  ;;  %v6637_v44 = vrot.slane %v1459_v58, 9  ;;  %v6914_v13 = vld [vmem:[%s7868_s23 + $0xc0] sm:$0xf] }
  0x98   : > { %v1121_v45 = vunpack.c.l.b16 %v693_v20  ;;  %v1122_v46 = vunpack.c.l.b16 %v703_v41  ;;  %v880_v47 = vrot.slane %v879_v38, 4  ;;  %v889_v48 = vor.u32 %v888_v39, %v884_v34  ;;  %v7592_v39 = vld [vmem:[%s7868_s23 + $0xb4] sm:$0xff] }
  0x99   : > { %v1537_v49 = vsel %vm7936_vm6, %v6629_v35, %v1536_v21  ;;  %v1538_v53 = vrot.slane %v1536_v21, 4  ;;  %v1592_v50 = vrot.slane %v1460_v37, 5  ;;  %v1595_v36 = vrot.slane %v1461_v40, 5  ;;  %v6887_v41 = vld [vmem:[%s7868_s23 + $0x54] sm:$0xf] }
  0x9a   : > { %v1153_v52 = vpack.c.b16 %v1122_v46, %v1121_v45  ;;  %v885_v54 = vsel %vm7926_vm3, %v880_v47, %v884_v34  ;;  %v890_v55 = vrot.slane %v889_v48, 4  ;;  %v1703_v56 = vunpack.c.l.b16 %v1537_v49 }
  0x9b   : > { %v1137_v57 = vunpack.c.l.b16 %v885_v54  ;;  %v1540_v59 = vsel %vm7936_vm6, %v1538_v53, %v1539_v42  ;;  %v1593_v30 = vsel %vm7936_vm6, %v6637_v44, %v1592_v50  ;;  %v1594_v60 = vrot.slane %v1592_v50, 4  ;;  %v7570_v42 = vld [vmem:[%s10842_s1 + $0x80] sm:$0xff]  ;;  %v6889_v54 = vld [vmem:[%s7868_s23 + $0x5c] sm:$0x1] }
  0x9c   : > { %v1194_v62 = vsel %vm426_vm0, %v1153_v52, 0  ;;  %v895_v15 = vsel %vm7926_vm3, %v890_v55, %v894_v9  ;;  %v1704_v0 = vunpack.c.l.b16 %v1540_v59  ;;  %v1719_v1 = vunpack.c.l.b16 %v1593_v30 }
  0x9d   : > { %1248 = vmatpush.bf16.xpose.msrb.mxu2 %v1194_v62  ;;  %v1138_v4 = vunpack.c.l.b16 %v895_v15  ;;  %v1596_v5 = vsel %vm7936_vm6, %v1594_v60, %v1595_v36  ;;  %v2233_v6 = vsel %vm426_vm0, %v7585_v22, 0  ;;  %v2257_v7 = vsel %vm426_vm0, %v7593_v51, 0  ;;  %v6888_v36 = vld [vmem:[%s7868_s23 + $0x58] sm:$0xf]  ;;  %v6911_v60 = vld [vmem:[%s7868_s23 + $0xb4] sm:$0xf] }
  0x9e   : > { %v1735_v43 = vpack.c.b16 %v1704_v0, %v1703_v56  ;;  %v1720_v8 = vunpack.c.l.b16 %v1596_v5  ;;  %v2670_v11 = vshrl.u32 %v6890_v63, 16  ;;  %v2673_v12 = vshll.u32 %v6890_v63, 16 }
  0x9f   : > { %v1161_v14 = vpack.c.b16 %v1138_v4, %v1137_v57  ;;  %v2679_v18 = vshll.u32 %v6891_v2, 16  ;;  %v2683_v19 = vshrl.u32 %v6891_v2, 16  ;;  %v2689_v23 = vshll.u32 %v6892_v3, 16 }
  0xa0   : > { %v1776_v26 = vsel %vm426_vm0, %v1735_v43, 0  ;;  %v1743_v27 = vpack.c.b16 %v1720_v8, %v1719_v1  ;;  %v2672_v28 = vrot.slane %v2670_v11, 4  ;;  %v2675_v29 = vrot.slane %v2673_v12, 5  ;;  %v6912_v43 = vld [vmem:[%s7868_s23 + $0xb8] sm:$0xf]  ;;  %v7583_v11 = vld [vmem:[%s7868_s23 + $0x48] sm:$0xff] }
  0xa1   : > { %v1218_v24 = vsel %vm426_vm0, %v1161_v14, 0  ;;  %1830 = vmatpush.bf16.xpose.msrb.mxu0 %v1776_v26  ;;  %v2681_v58 = vrot.slane %v2679_v18, 5  ;;  %v2685_v16 = vrot.slane %v2683_v19, 4  ;;  %v2691_v33 = vrot.slane %v2689_v23, 5  ;;  %v6913_v18 = vld [vmem:[%s7868_s23 + $0xbc] sm:$0x1] }
  0xa2   : > { %1297 = vmatpush.bf16.xpose.msrb.mxu3 %v1218_v24  ;;  %v1800_v34 = vsel %vm426_vm0, %v1743_v27, 0  ;;  %v2676_v35 = vor.u32 %v2675_v29, %v2672_v28  ;;  %v2862_v37 = vshrl.u32 %v6914_v13, 16  ;;  %v2865_v38 = vshll.u32 %v6914_v13, 16 }
  0xa3   : > { %1879 = vmatpush.bf16.xpose.msrb.mxu1 %v1800_v34  ;;  %v2686_v9 = vor.u32 %v2685_v16, %v2681_v58  ;;  %v2871_v21 = vshll.u32 %v6915_v25, 16  ;;  %v2875_v40 = vshrl.u32 %v6915_v25, 16  ;;  %v2881_v20 = vshll.u32 %v6916_v31, 16  ;;  %v6884_v34 = vld [vmem:[%s7868_s23 + $0x48] sm:$0xf] }
  0xa4   : > { %6613 = vmatmul.msk.bf16.vlgmr.msrb.gmra.mxu2 %vm426_vm0, %v7562_v17  ;;  %v2677_v44 = vrot.slane %v2676_v35, 4  ;;  %v2864_v45 = vrot.slane %v2862_v37, 4  ;;  %v2867_v46 = vrot.slane %v2865_v38, 5  ;;  %v2230_v47 = vsel %vm426_vm0, %v7584_v32, 0  ;;  %v7591_v32 = vld [vmem:[%s7868_s23 + $0xa8] sm:$0xff] }
  0xa5   : > { %2259 = vmatpush.bf16.xpose.msra.mxu2 %v2233_v6  ;;  %v2687_v48 = vrot.slane %v2686_v9, 4  ;;  %v2873_v49 = vrot.slane %v2871_v21, 5  ;;  %v2877_v53 = vrot.slane %v2875_v40, 4  ;;  %v2883_v50 = vrot.slane %v2881_v20, 5  ;;  %v6885_v9 = vld [vmem:[%s7868_s23 + $0x4c] sm:$0xf] }
  0xa6   : > { %v2682_v22 = vsel %vm7926_vm3, %v2677_v44, %v2681_v58  ;;  %v2868_v51 = vor.u32 %v2867_v46, %v2864_v45  ;;  %v2254_v52 = vsel %vm426_vm0, %v7592_v39, 0  ;;  %v2646_v55 = vshrl.u32 %v6887_v41, 16  ;;  %v7563_v40 = vld [vmem:[%s10842_s1 + $0x48] sm:$0xff]  ;;  %v6886_v44 = vld [vmem:[%s7868_s23 + $0x50] sm:$0x1] }
  0xa7   : > { %v2692_v56 = vsel %vm7926_vm3, %v2687_v48, %v2691_v33  ;;  %v2956_v57 = vunpack.c.l.b16 %v2682_v22  ;;  %v2878_v59 = vor.u32 %v2877_v53, %v2873_v49  ;;  %v2649_v30 = vshll.u32 %v6887_v41, 16  ;;  %v6908_v22 = vld [vmem:[%s7868_s23 + $0xa8] sm:$0xf] }
  0xa8   : > { %6693 = vmatmul.msk.bf16.vlgmr.msrb.gmra.mxu0 %vm426_vm0, %v7570_v42  ;;  %v2957_v63 = vunpack.c.l.b16 %v2692_v56  ;;  %v2869_v62 = vrot.slane %v2868_v51, 4  ;;  %v2648_v15 = vrot.slane %v2646_v55, 4  ;;  %v2655_v0 = vshll.u32 %v6888_v36, 16  ;;  %v7571_v56 = vld [vmem:[%s10842_s1 + $0x88] sm:$0xff] }
  0xa9   : > { %6621 = vmatmul.msk.bf16.vlgmr.msrb.gmra.mxu3 %vm426_vm0, %v7562_v17  ;;  %v2879_v1 = vrot.slane %v2878_v59, 4  ;;  %v2651_v2 = vrot.slane %v2649_v30, 5  ;;  %v2659_v3 = vshrl.u32 %v6888_v36, 16  ;;  %v2665_v4 = vshll.u32 %v6889_v54, 16 }
  0xaa   : > { %2308 = vmatpush.bf16.xpose.msra.mxu3 %v2257_v7  ;;  %6701 = vmatmul.msk.bf16.vlgmr.msrb.gmra.mxu1 %vm426_vm0, %v7570_v42  ;;  %v2981_v5 = vpack.c.b16 %v2957_v63, %v2956_v57  ;;  %v2874_v6 = vsel %vm7926_vm3, %v2869_v62, %v2873_v49  ;;  %v2657_v7 = vrot.slane %v2655_v0, 5  ;;  %v2838_v8 = vshrl.u32 %v6911_v60, 16  ;;  %v6909_v63 = vld [vmem:[%s7868_s23 + $0xac] sm:$0xf] }
  0xab   : > { %v2884_v12 = vsel %vm7926_vm3, %v2879_v1, %v2883_v50  ;;  %v2972_v13 = vunpack.c.l.b16 %v2874_v6  ;;  %v2652_v14 = vor.u32 %v2651_v2, %v2648_v15  ;;  %v2661_v17 = vrot.slane %v2659_v3, 4  ;;  %v6910_v1 = vld [vmem:[%s7868_s23 + $0xb0] sm:$0x1] }
  0xac   : > { %v3036_v19 = vsel %vm426_vm0, %v2981_v5, 0  ;;  %v2973_v23 = vunpack.c.l.b16 %v2884_v12  ;;  %v2667_v25 = vrot.slane %v2665_v4, 5  ;;  %v2840_v26 = vrot.slane %v2838_v8, 4 }
  0xad   : > { %2260 = vmatpush.bf16.xpose.msra.mxu2 %v2230_v47  ;;  %3062 = vmatpush.bf16.xpose.msra.mxu0 %v3036_v19  ;;  %v2653_v27 = vrot.slane %v2652_v14, 4  ;;  %v2662_v28 = vor.u32 %v2661_v17, %v2657_v7  ;;  %v2841_v29 = vshll.u32 %v6911_v60, 16  ;;  %v2847_v31 = vshll.u32 %v6912_v43, 16 }
  0xae   : > { %v2989_v24 = vpack.c.b16 %v2973_v23, %v2972_v13  ;;  %v2851_v58 = vshrl.u32 %v6912_v43, 16  ;;  %v2857_v16 = vshll.u32 %v6913_v18, 16  ;;  %v2227_v33 = vsel %vm426_vm0, %v7583_v11, 0 }
  0xaf   : > { %v2658_v35 = vsel %vm7926_vm3, %v2653_v27, %v2657_v7  ;;  %v2663_v37 = vrot.slane %v2662_v28, 4  ;;  %v2843_v38 = vrot.slane %v2841_v29, 5  ;;  %v2849_v39 = vrot.slane %v2847_v31, 5  ;;  %v7582_v29 = vld [vmem:[%s7868_s23 + $0x3c] sm:$0xff] }
  0xb0   : > { %v3060_v21 = vsel %vm426_vm0, %v2989_v24, 0  ;;  %v2954_v20 = vunpack.c.l.b16 %v2658_v35  ;;  %v2853_v41 = vrot.slane %v2851_v58, 4  ;;  %v2859_v42 = vrot.slane %v2857_v16, 5  ;;  %v7590_v31 = vld [vmem:[%s7868_s23 + $0x9c] sm:$0xff] }
  0xb1   : > { %3111 = vmatpush.bf16.xpose.msra.mxu1 %v3060_v21  ;;  %v2668_v45 = vsel %vm7926_vm3, %v2663_v37, %v2667_v25  ;;  %v2844_v46 = vor.u32 %v2843_v38, %v2840_v26  ;;  %v2251_v47 = vsel %vm426_vm0, %v7591_v32, 0  ;;  %v2622_v48 = vshrl.u32 %v6884_v34, 16 }
  0xb2   : > { %2309 = vmatpush.bf16.xpose.msra.mxu3 %v2254_v52  ;;  %v2955_v49 = vunpack.c.l.b16 %v2668_v45  ;;  %v2854_v53 = vor.u32 %v2853_v41, %v2849_v39  ;;  %v2625_v50 = vshll.u32 %v6884_v34, 16  ;;  %v2631_v36 = vshll.u32 %v6885_v9, 16  ;;  %v6882_v34 = vld [vmem:[%s7868_s23 + $0x40] sm:$0xf] }
  0xb3   : > { %v2845_v51 = vrot.slane %v2844_v46, 4  ;;  %v2624_v52 = vrot.slane %v2622_v48, 4  ;;  %v2635_v54 = vshrl.u32 %v6885_v9, 16  ;;  %v2641_v55 = vshll.u32 %v6886_v44, 16  ;;  %v6883_v9 = vld [vmem:[%s7868_s23 + $0x44] sm:$0x1] }
  0xb4   : > { %6614 = vmatmul.msk.bf16.gmra.mxu2 %vm426_vm0, %v7563_v40  ;;  %v2980_v57 = vpack.c.b16 %v2955_v49, %v2954_v20  ;;  %v2855_v59 = vrot.slane %v2854_v53, 4  ;;  %v2627_v30 = vrot.slane %v2625_v50, 5  ;;  %v2633_v60 = vrot.slane %v2631_v36, 5  ;;  %v6906_v36 = vld [vmem:[%s7868_s23 + $0xa0] sm:$0xf] }
  0xb5   : > { %2261 = vmatpush.bf16.xpose.msra.mxu2 %v2227_v33  ;;  %v2850_v62 = vsel %vm7926_vm3, %v2845_v51, %v2849_v39  ;;  %v2637_v15 = vrot.slane %v2635_v54, 4  ;;  %v2643_v0 = vrot.slane %v2641_v55, 5  ;;  %v2814_v2 = vshrl.u32 %v6908_v22, 16  ;;  %v6881_v33 = vld [vmem:[%s7868_s23 + $0x3c] sm:$0xf] }
  0xb6   : > { %v3033_v3 = vsel %vm426_vm0, %v2980_v57, 0  ;;  %v2860_v4 = vsel %vm7926_vm3, %v2855_v59, %v2859_v42  ;;  %v2970_v5 = vunpack.c.l.b16 %v2850_v62  ;;  %v2628_v6 = vor.u32 %v2627_v30, %v2624_v52 }
  0xb7   : > { %3063 = vmatpush.bf16.xpose.msra.mxu0 %v3033_v3  ;;  %v2971_v7 = vunpack.c.l.b16 %v2860_v4  ;;  %v2638_v43 = vor.u32 %v2637_v15, %v2633_v60  ;;  %v2816_v8 = vrot.slane %v2814_v2, 4  ;;  %v2817_v11 = vshll.u32 %v6908_v22, 16  ;;  %v7564_v22 = vld [vmem:[%s10842_s1 + $0x50] sm:$0xff] }
  0xb8   : > { %6694 = vmatmul.msk.bf16.gmra.mxu0 %vm426_vm0, %v7571_v56  ;;  %v2629_v12 = vrot.slane %v2628_v6, 4  ;;  %v2823_v13 = vshll.u32 %v6909_v63, 16  ;;  %v2827_v14 = vshrl.u32 %v6909_v63, 16  ;;  %v2833_v17 = vshll.u32 %v6910_v1, 16 }
  0xb9   : > { %6622 = vmatmul.msk.bf16.gmra.mxu3 %vm426_vm0, %v7563_v40  ;;  %v2988_v18 = vpack.c.b16 %v2971_v7, %v2970_v5  ;;  %v2639_v19 = vrot.slane %v2638_v43, 4  ;;  %v2819_v23 = vrot.slane %v2817_v11, 5  ;;  %v2224_v38 = vsel %vm426_vm0, %v7582_v29, 0  ;;  %v7572_v5 = vld [vmem:[%s10842_s1 + $0x90] sm:$0xff] }
  0xba   : > { %2310 = vmatpush.bf16.xpose.msra.mxu3 %v2251_v47  ;;  %6702 = vmatmul.msk.bf16.gmra.mxu1 %vm426_vm0, %v7571_v56  ;;  %v2634_v25 = vsel %vm7926_vm3, %v2629_v12, %v2633_v60  ;;  %v2825_v26 = vrot.slane %v2823_v13, 5  ;;  %v2829_v27 = vrot.slane %v2827_v14, 4  ;;  %v2835_v28 = vrot.slane %v2833_v17, 5  ;;  %v6905_v47 = vld [vmem:[%s7868_s23 + $0x9c] sm:$0xf] }
  0xbb   : > { %v3057_v32 = vsel %vm426_vm0, %v2988_v18, 0  ;;  %v2644_v24 = vsel %vm7926_vm3, %v2639_v19, %v2643_v0  ;;  %v2952_v58 = vunpack.c.l.b16 %v2634_v25  ;;  %v2820_v16 = vor.u32 %v2819_v23, %v2816_v8  ;;  %v6907_v56 = vld [vmem:[%s7868_s23 + $0xa4] sm:$0x1] }
  0xbc   : > { %3112 = vmatpush.bf16.xpose.msra.mxu1 %v3057_v32  ;;  %v2953_v35 = vunpack.c.l.b16 %v2644_v24  ;;  %v2830_v37 = vor.u32 %v2829_v27, %v2825_v26  ;;  %v2248_v39 = vsel %vm426_vm0, %v7590_v31, 0  ;;  %v2598_v40 = vshrl.u32 %v6881_v33, 16  ;;  %v7581_v31 = vld [vmem:[%s7868_s23 + $0x30] sm:$0xff] }
  0xbd   : > { %v2821_v21 = vrot.slane %v2820_v16, 4  ;;  %2262 = vmatpush.bf16.xpose.msra.mxu2 %v2224_v38  ;;  %v2601_v20 = vshll.u32 %v6881_v33, 16  ;;  %v2607_v41 = vshll.u32 %v6882_v34, 16  ;;  %v2611_v45 = vshrl.u32 %v6882_v34, 16  ;;  %v7589_v32 = vld [vmem:[%s7868_s23 + $0x90] sm:$0xff] }
  0xbe   : > { %v2979_v42 = vpack.c.b16 %v2953_v35, %v2952_v58  ;;  %v2831_v44 = vrot.slane %v2830_v37, 4  ;;  %v2617_v46 = vshll.u32 %v6883_v9, 16  ;;  %v2600_v49 = vrot.slane %v2598_v40, 4  ;;  %v6878_v24 = vld [vmem:[%s7868_s23 + $0x30] sm:$0xf] }
  0xbf   : > { %v2826_v48 = vsel %vm7926_vm3, %v2821_v21, %v2825_v26  ;;  %v2603_v53 = vrot.slane %v2601_v20, 5  ;;  %v2609_v50 = vrot.slane %v2607_v41, 5  ;;  %v2613_v55 = vrot.slane %v2611_v45, 4  ;;  %v6879_v34 = vld [vmem:[%s7868_s23 + $0x34] sm:$0xf] }
  0xc0   : > { %v3030_v51 = vsel %vm426_vm0, %v2979_v42, 0  ;;  %v2836_v52 = vsel %vm7926_vm3, %v2831_v44, %v2835_v28  ;;  %v2968_v54 = vunpack.c.l.b16 %v2826_v48  ;;  %v2619_v30 = vrot.slane %v2617_v46, 5  ;;  %v6880_v35 = vld [vmem:[%s7868_s23 + $0x38] sm:$0x1]  ;;  %v6902_v40 = vld [vmem:[%s7868_s23 + $0x90] sm:$0xf] }
  0xc1   : > { %3064 = vmatpush.bf16.xpose.msra.mxu0 %v3030_v51  ;;  %v2969_v57 = vunpack.c.l.b16 %v2836_v52  ;;  %v2604_v59 = vor.u32 %v2603_v53, %v2600_v49  ;;  %v2790_v60 = vshrl.u32 %v6905_v47, 16  ;;  %v2614_v63 = vor.u32 %v2613_v55, %v2609_v50  ;;  %v6903_v45 = vld [vmem:[%s7868_s23 + $0x94] sm:$0xf]  ;;  %v6904_v48 = vld [vmem:[%s7868_s23 + $0x98] sm:$0x1] }
  0xc2   : > { %2311 = vmatpush.bf16.xpose.msra.mxu3 %v2248_v39  ;;  %v2793_v62 = vshll.u32 %v6905_v47, 16  ;;  %v2799_v15 = vshll.u32 %v6906_v36, 16  ;;  %v2803_v0 = vshrl.u32 %v6906_v36, 16  ;;  %v2809_v4 = vshll.u32 %v6907_v56, 16  ;;  %v7565_v51 = vld [vmem:[%s10842_s1 + $0x58] sm:$0xff] }
  0xc3   : > { %v2987_v1 = vpack.c.b16 %v2969_v57, %v2968_v54  ;;  %v2605_v2 = vrot.slane %v2604_v59, 4  ;;  %v2792_v3 = vrot.slane %v2790_v60, 4  ;;  %v2615_v6 = vrot.slane %v2614_v63, 4 }
  0xc4   : > { %6615 = vmatmul.msk.bf16.gmra.mxu2 %vm426_vm0, %v7564_v22  ;;  %v2795_v7 = vrot.slane %v2793_v62, 5  ;;  %v2801_v43 = vrot.slane %v2799_v15, 5  ;;  %v2805_v8 = vrot.slane %v2803_v0, 4  ;;  %v2811_v13 = vrot.slane %v2809_v4, 5 }
  0xc5   : > { %v3054_v11 = vsel %vm426_vm0, %v2987_v1, 0  ;;  %v2610_v12 = vsel %vm7926_vm3, %v2605_v2, %v2609_v50  ;;  %v2620_v14 = vsel %vm7926_vm3, %v2615_v6, %v2619_v30  ;;  %v2574_v37 = vshrl.u32 %v6878_v24, 16  ;;  %v7573_v1 = vld [vmem:[%s10842_s1 + $0x98] sm:$0xff] }
  0xc6   : > { %3113 = vmatpush.bf16.xpose.msra.mxu1 %v3054_v11  ;;  %v2950_v17 = vunpack.c.l.b16 %v2610_v12  ;;  %v2796_v18 = vor.u32 %v2795_v7, %v2792_v3  ;;  %v2806_v19 = vor.u32 %v2805_v8, %v2801_v43  ;;  %v2951_v23 = vunpack.c.l.b16 %v2620_v14 }
  0xc7   : > { %v2221_v38 = vsel %vm426_vm0, %v7581_v31, 0  ;;  %v2245_v39 = vsel %vm426_vm0, %v7589_v32, 0  ;;  %v2577_v9 = vshll.u32 %v6878_v24, 16  ;;  %v2583_v21 = vshll.u32 %v6879_v34, 16  ;;  %v6876_v31 = vld [vmem:[%s7868_s23 + $0x28] sm:$0xf] }
  0xc8   : > { %6695 = vmatmul.msk.bf16.gmra.mxu0 %vm426_vm0, %v7572_v5  ;;  %v2797_v25 = vrot.slane %v2796_v18, 4  ;;  %v2807_v26 = vrot.slane %v2806_v19, 4  ;;  %v2978_v27 = vpack.c.b16 %v2951_v23, %v2950_v17  ;;  %2263 = vmatpush.bf16.xpose.msra.mxu2 %v2221_v38  ;;  %v2576_v41 = vrot.slane %v2574_v37, 4  ;;  %v6877_v32 = vld [vmem:[%s7868_s23 + $0x2c] sm:$0x1] }
  0xc9   : > { %6623 = vmatmul.msk.bf16.gmra.mxu3 %vm426_vm0, %v7564_v22  ;;  %v2587_v42 = vshrl.u32 %v6879_v34, 16  ;;  %v2593_v44 = vshll.u32 %v6880_v35, 16  ;;  %v2579_v46 = vrot.slane %v2577_v9, 5  ;;  %v2585_v47 = vrot.slane %v2583_v21, 5  ;;  %v6899_v38 = vld [vmem:[%s7868_s23 + $0x84] sm:$0xf] }
  0xca   : > { %6703 = vmatmul.msk.bf16.gmra.mxu1 %vm426_vm0, %v7572_v5  ;;  %v2802_v28 = vsel %vm7926_vm3, %v2797_v25, %v2801_v43  ;;  %v2812_v29 = vsel %vm7926_vm3, %v2807_v26, %v2811_v13  ;;  %v3027_v58 = vsel %vm426_vm0, %v2978_v27, 0  ;;  %2312 = vmatpush.bf16.xpose.msra.mxu3 %v2245_v39  ;;  %v2766_v49 = vshrl.u32 %v6902_v40, 16  ;;  %v7580_v26 = vld [vmem:[%s7868_s23 + $0x24] sm:$0xff] }
  0xcb   : > { %v2966_v16 = vunpack.c.l.b16 %v2802_v28  ;;  %v2967_v33 = vunpack.c.l.b16 %v2812_v29  ;;  %3065 = vmatpush.bf16.xpose.msra.mxu0 %v3027_v58  ;;  %v2769_v53 = vshll.u32 %v6902_v40, 16  ;;  %v2589_v36 = vrot.slane %v2587_v42, 4  ;;  %v7588_v27 = vld [vmem:[%s7868_s23 + $0x84] sm:$0xff] }
  0xcc   : > { %v2775_v22 = vshll.u32 %v6903_v45, 16  ;;  %v2580_v52 = vor.u32 %v2579_v46, %v2576_v41  ;;  %v2768_v54 = vrot.slane %v2766_v49, 4  ;;  %v2779_v56 = vshrl.u32 %v6903_v45, 16  ;;  %v6875_v28 = vld [vmem:[%s7868_s23 + $0x24] sm:$0xf] }
  0xcd   : > { %v2986_v20 = vpack.c.b16 %v2967_v33, %v2966_v16  ;;  %v2771_v55 = vrot.slane %v2769_v53, 5  ;;  %v2590_v57 = vor.u32 %v2589_v36, %v2585_v47  ;;  %v2595_v59 = vrot.slane %v2593_v44, 5  ;;  %v6901_v44 = vld [vmem:[%s7868_s23 + $0x8c] sm:$0x1]  ;;  %v7566_v36 = vld [vmem:[%s10842_s1 + $0x60] sm:$0xff] }
  0xce   : > { %v2777_v30 = vrot.slane %v2775_v22, 5  ;;  %v2785_v60 = vshll.u32 %v6904_v48, 16  ;;  %v2581_v63 = vrot.slane %v2580_v52, 4  ;;  %v2781_v15 = vrot.slane %v2779_v56, 4 }
  0xcf   : > { %v3051_v50 = vsel %vm426_vm0, %v2986_v20, 0  ;;  %v2772_v62 = vor.u32 %v2771_v55, %v2768_v54  ;;  %v2591_v0 = vrot.slane %v2590_v57, 4  ;;  %v8391_v6 = vpop.f32.mrf.mxu0  ;;  %v2550_v24 = vshrl.u32 %v6875_v28, 16  ;;  %v6900_v20 = vld [vmem:[%s7868_s23 + $0x88] sm:$0xf] }
  0xd0   : > { %3114 = vmatpush.bf16.xpose.msra.mxu1 %v3051_v50  ;;  %v2586_v2 = vsel %vm7926_vm3, %v2581_v63, %v2585_v47  ;;  %v2782_v4 = vor.u32 %v2781_v15, %v2777_v30  ;;  %v2787_v5 = vrot.slane %v2785_v60, 5  ;;  %v2553_v58 = vshll.u32 %v6875_v28, 16  ;;  %v6872_v28 = vld [vmem:[%s7868_s23 + $0x18] sm:$0xf] }
  0xd1   : > { %v2773_v3 = vrot.slane %v2772_v62, 4  ;;  %v2596_v7 = vsel %vm7926_vm3, %v2591_v0, %v2595_v59  ;;  %v2948_v43 = vunpack.c.l.b16 %v2586_v2  ;;  %v2218_v33 = vsel %vm426_vm0, %v7580_v26, 0  ;;  %v7579_v26 = vld [vmem:[%s7868_s23 + $0x18] sm:$0xff] }
  0xd2   : > { %v2949_v8 = vunpack.c.l.b16 %v2596_v7  ;;  %v2783_v12 = vrot.slane %v2782_v4, 4  ;;  %v8397_v13 = vpop.f32.mrf.mxu1  ;;  %v2242_v34 = vsel %vm426_vm0, %v7588_v27, 0  ;;  %v2559_v35 = vshll.u32 %v6876_v31, 16  ;;  %2264 = vmatpush.bf16.xpose.msra.mxu2 %v2218_v33  ;;  %v7587_v27 = vld [vmem:[%s7868_s23 + $0x78] sm:$0xff] }
  0xd3   : > { %v2778_v11 = vsel %vm7926_vm3, %v2773_v3, %v2777_v30  ;;  %v2563_v37 = vshrl.u32 %v6876_v31, 16  ;;  %2313 = vmatpush.bf16.xpose.msra.mxu3 %v2242_v34  ;;  %v2552_v9 = vrot.slane %v2550_v24, 4  ;;  %v2555_v21 = vrot.slane %v2553_v58, 5  ;;  %v6874_v24 = vld [vmem:[%s7868_s23 + $0x20] sm:$0x1] }
  0xd4   : > { %6616 = vmatmul.msk.bf16.gmra.mxu2 %vm426_vm0, %v7565_v51  ;;  %v2964_v17 = vunpack.c.l.b16 %v2778_v11  ;;  %v2977_v18 = vpack.c.b16 %v2949_v8, %v2948_v43  ;;  %v2788_v19 = vsel %vm7926_vm3, %v2783_v12, %v2787_v5  ;;  %v2569_v40 = vshll.u32 %v6877_v32, 16  ;;  %v6873_v32 = vld [vmem:[%s7868_s23 + $0x1c] sm:$0xf] }
  0xd5   : > { %v8399_v14 = vpop.f32.mrf.mxu2  ;;  %v2965_v23 = vunpack.c.l.b16 %v2788_v19  ;;  %v2561_v41 = vrot.slane %v2559_v35, 5  ;;  %v2565_v42 = vrot.slane %v2563_v37, 4  ;;  %v2742_v45 = vshrl.u32 %v6899_v38, 16 }
  0xd6   : > { %v3024_v25 = vsel %vm426_vm0, %v2977_v18, 0  ;;  %v2745_v46 = vshll.u32 %v6899_v38, 16  ;;  %v2556_v48 = vor.u32 %v2555_v21, %v2552_v9  ;;  %v2571_v49 = vrot.slane %v2569_v40, 5 }
  0xd7   : > { %3066 = vmatpush.bf16.xpose.msra.mxu0 %v3024_v25  ;;  %v2985_v29 = vpack.c.b16 %v2965_v23, %v2964_v17  ;;  %v8420_v47 = vpop.f32.mrf.mxu0  ;;  %v2751_v53 = vshll.u32 %v6900_v20, 16  ;;  %v2755_v50 = vshrl.u32 %v6900_v20, 16  ;;  %v2566_v22 = vor.u32 %v2565_v42, %v2561_v41 }
  0xd8   : > { %6696 = vmatmul.msk.bf16.gmra.mxu0 %vm426_vm0, %v7573_v1  ;;  %v8412_v16 = vpop.f32.mrf.mxu3  ;;  %v2747_v52 = vrot.slane %v2745_v46, 5  ;;  %v2761_v54 = vshll.u32 %v6901_v44, 16  ;;  %v2557_v57 = vrot.slane %v2556_v48, 4  ;;  %v2526_v58 = vshrl.u32 %v6872_v28, 16  ;;  %v6898_v44 = vld [vmem:[%s7868_s23 + $0x80] sm:$0x1] }
  0xd9   : > { %6624 = vmatmul.msk.bf16.gmra.mxu3 %vm426_vm0, %v7565_v51  ;;  %v3048_v39 = vsel %vm426_vm0, %v2985_v29, 0  ;;  %v2744_v51 = vrot.slane %v2742_v45, 4  ;;  %v2753_v59 = vrot.slane %v2751_v53, 5  ;;  %v2757_v30 = vrot.slane %v2755_v50, 4 }
  0xda   : > { %6704 = vmatmul.msk.bf16.gmra.mxu1 %vm426_vm0, %v7573_v1  ;;  %v8425_v55 = vpop.f32.mrf.mxu1  ;;  %v2567_v60 = vrot.slane %v2566_v22, 4  ;;  %v2562_v62 = vsel %vm7926_vm3, %v2557_v57, %v2561_v41  ;;  %v2763_v0 = vrot.slane %v2761_v54, 5  ;;  %v7574_v1 = vld [vmem:[%s10842_s1 + $0xa0] sm:$0xff]  ;;  %v2529_v33 = vshll.u32 %v6872_v28, 16  ;;  %v6897_v41 = vld [vmem:[%s7868_s23 + $0x7c] sm:$0xf] }
  0xdb   : > { %3115 = vmatpush.bf16.xpose.msra.mxu1 %v3048_v39  ;;  %v2748_v63 = vor.u32 %v2747_v52, %v2744_v51  ;;  %v2758_v15 = vor.u32 %v2757_v30, %v2753_v59  ;;  %v2946_v3 = vunpack.c.l.b16 %v2562_v62  ;;  %v2215_v35 = vsel %vm426_vm0, %v7579_v26, 0  ;;  %v6896_v39 = vld [vmem:[%s7868_s23 + $0x78] sm:$0xf] }
  0xdc   : > { %v2572_v2 = vsel %vm7926_vm3, %v2567_v60, %v2571_v49  ;;  %v2239_v37 = vsel %vm426_vm0, %v7587_v27, 0  ;;  %v2535_v38 = vshll.u32 %v6873_v32, 16  ;;  %2265 = vmatpush.bf16.xpose.msra.mxu2 %v2215_v35  ;;  %v2528_v9 = vrot.slane %v2526_v58, 4  ;;  %v6893_v58 = vld [vmem:[%s7868_s23 + $0x6c] sm:$0xf] }
  0xdd   : > { %v8427_v56 = vpop.f32.mrf.mxu2  ;;  %v2749_v4 = vrot.slane %v2748_v63, 4  ;;  %v2947_v5 = vunpack.c.l.b16 %v2572_v2  ;;  %v2759_v7 = vrot.slane %v2758_v15, 4  ;;  %v2531_v21 = vrot.slane %v2529_v33, 5  ;;  %2314 = vmatpush.bf16.xpose.msra.mxu3 %v2239_v37 }
  0xde   : > { %v2539_v40 = vshrl.u32 %v6873_v32, 16  ;;  %v2545_v20 = vshll.u32 %v6874_v24, 16  ;;  %v2537_v42 = vrot.slane %v2535_v38, 5  ;;  %v2718_v45 = vshrl.u32 %v6896_v39, 16  ;;  %v6894_v38 = vld [vmem:[%s7868_s23 + $0x70] sm:$0xf] }
  0xdf   : > { %v2754_v8 = vsel %vm7926_vm3, %v2749_v4, %v2753_v59  ;;  %v2976_v11 = vpack.c.b16 %v2947_v5, %v2946_v3  ;;  %v2764_v12 = vsel %vm7926_vm3, %v2759_v7, %v2763_v0  ;;  %v8445_v19 = vpop.f32.mrf.mxu0  ;;  %v2721_v46 = vshll.u32 %v6896_v39, 16  ;;  %v7575_v4 = vld [vmem:[%s10842_s1 + $0xa8] sm:$0xff] }
  0xe0   : > { %v8437_v43 = vpop.f32.mrf.mxu3  ;;  %v2962_v17 = vunpack.c.l.b16 %v2754_v8  ;;  %v2963_v18 = vunpack.c.l.b16 %v2764_v12  ;;  %v2727_v48 = vshll.u32 %v6897_v41, 16  ;;  %v2532_v49 = vor.u32 %v2531_v21, %v2528_v9  ;;  %v6869_v8 = vld [vmem:[%s7868_s23 + $0xc] sm:$0xf]  ;;  %v6871_v21 = vld [vmem:[%s7868_s23 + $0x14] sm:$0x1] }
  0xe1   : > { %v3021_v23 = vsel %vm426_vm0, %v2976_v11, 0  ;;  %v2541_v53 = vrot.slane %v2539_v40, 4  ;;  %v2731_v50 = vshrl.u32 %v6897_v41, 16  ;;  %v2720_v51 = vrot.slane %v2718_v45, 4  ;;  %v6870_v11 = vld [vmem:[%s7868_s23 + $0x10] sm:$0xf] }
  0xe2   : > { %3067 = vmatpush.bf16.xpose.msra.mxu0 %v3021_v23  ;;  %v2984_v25 = vpack.c.b16 %v2963_v18, %v2962_v17  ;;  %v8452_v29 = vpop.f32.mrf.mxu1  ;;  %v2723_v52 = vrot.slane %v2721_v46, 5  ;;  %v2729_v54 = vrot.slane %v2727_v48, 5  ;;  %v2737_v57 = vshll.u32 %v6898_v44, 16 }
  0xe3   : > { %v2533_v59 = vrot.slane %v2532_v49, 4  ;;  %v2542_v30 = vor.u32 %v2541_v53, %v2537_v42  ;;  %v2547_v60 = vrot.slane %v2545_v20, 5  ;;  %v2733_v63 = vrot.slane %v2731_v50, 4  ;;  %v7578_v53 = vld [vmem:[%s7868_s23 + $0xc] sm:$0xff] }
  0xe4   : > { %6617 = vmatmul.msk.bf16.gmra.mxu2 %vm426_vm0, %v7566_v36  ;;  %v3045_v34 = vsel %vm426_vm0, %v2984_v25, 0  ;;  %v2724_v62 = vor.u32 %v2723_v52, %v2720_v51  ;;  %v2739_v3 = vrot.slane %v2737_v57, 5  ;;  %v2502_v25 = vshrl.u32 %v6869_v8, 16  ;;  %v7586_v50 = vld [vmem:[%s7868_s23 + $0x6c] sm:$0xff] }
  0xe5   : > { %v8454_v31 = vpop.f32.mrf.mxu2  ;;  %3116 = vmatpush.bf16.xpose.msra.mxu1 %v3045_v34  ;;  %v2538_v0 = vsel %vm7926_vm3, %v2533_v59, %v2537_v42  ;;  %v2734_v2 = vor.u32 %v2733_v63, %v2729_v54  ;;  %v2505_v26 = vshll.u32 %v6869_v8, 16  ;;  %v2511_v32 = vshll.u32 %v6870_v11, 16 }
  0xe6   : > { %v2944_v5 = vunpack.c.l.b16 %v2538_v0  ;;  %v2725_v7 = vrot.slane %v2724_v62, 4  ;;  %v2515_v24 = vshrl.u32 %v6870_v11, 16  ;;  %v2504_v35 = vrot.slane %v2502_v25, 4 }
  0xe7   : > { %v8469_v15 = vpop.f32.mrf.mxu0  ;;  %v2735_v23 = vrot.slane %v2734_v2, 4  ;;  %v2507_v37 = vrot.slane %v2505_v26, 5  ;;  %v2513_v40 = vrot.slane %v2511_v32, 5  ;;  %v2521_v42 = vshll.u32 %v6871_v21, 16 }
  0xe8   : > { %6697 = vmatmul.msk.bf16.gmra.mxu0 %vm426_vm0, %v7574_v1  ;;  %v8467_v22 = vpop.f32.mrf.mxu3  ;;  %v2730_v28 = vsel %vm7926_vm3, %v2725_v7, %v2729_v54  ;;  %v2517_v20 = vrot.slane %v2515_v24, 4  ;;  %v2694_v44 = vshrl.u32 %v6893_v58, 16  ;;  %v2697_v45 = vshll.u32 %v6893_v58, 16 }
  0xe9   : > { %6625 = vmatmul.msk.bf16.gmra.mxu3 %vm426_vm0, %v7566_v36  ;;  %v7567_v36 = vld [vmem:[%s10842_s1 + $0x68] sm:$0xff]  ;;  %v2740_v33 = vsel %vm7926_vm3, %v2735_v23, %v2739_v3  ;;  %v2960_v34 = vunpack.c.l.b16 %v2730_v28  ;;  %v2508_v41 = vor.u32 %v2507_v37, %v2504_v35  ;;  %v2703_v52 = vshll.u32 %v6894_v38, 16  ;;  %v7568_v28 = vld [vmem:[%s10842_s1 + $0x70] sm:$0xff] }
  0xea   : > { %6705 = vmatmul.msk.bf16.gmra.mxu1 %vm426_vm0, %v7574_v1  ;;  %v2543_v1 = vrot.slane %v2542_v30, 4  ;;  %v8479_v12 = vpop.f32.mrf.mxu1  ;;  %v2961_v9 = vunpack.c.l.b16 %v2740_v33  ;;  %v2518_v51 = vor.u32 %v2517_v20, %v2513_v40  ;;  %v2523_v57 = vrot.slane %v2521_v42, 5  ;;  %v7576_v37 = vld [vmem:[%s10842_s1 + $0xb0] sm:$0xff] }
  0xeb   : > { %v2509_v54 = vrot.slane %v2508_v41, 4  ;;  %v2696_v59 = vrot.slane %v2694_v44, 4  ;;  %v2699_v30 = vrot.slane %v2697_v45, 5  ;;  %v2212_v63 = vsel %vm426_vm0, %v7578_v53, 0  ;;  %v7002_v45 = vld [vmem:[%s7868_s23 + $0x60] sm:$0xe] }
  0xec   : > { %v2548_v18 = vsel %vm7926_vm3, %v2543_v1, %v2547_v60  ;;  %v2983_v49 = vpack.c.b16 %v2961_v9, %v2960_v34  ;;  %v2236_v62 = vsel %vm426_vm0, %v7586_v50, 0  ;;  %v2519_v0 = vrot.slane %v2518_v51, 4  ;;  %2266 = vmatpush.bf16.xpose.msra.mxu2 %v2212_v63  ;;  %v7026_v51 = vld [vmem:[%s7868_s23 + $0xc0] sm:$0xe] }
  0xed   : > { %v8481_v17 = vpop.f32.mrf.mxu2  ;;  %v2945_v27 = vunpack.c.l.b16 %v2548_v18  ;;  %v2514_v2 = vsel %vm7926_vm3, %v2509_v54, %v2513_v40  ;;  %v2700_v3 = vor.u32 %v2699_v30, %v2696_v59  ;;  %2315 = vmatpush.bf16.xpose.msra.mxu3 %v2236_v62  ;;  %v7036_v53 = vrot.slane %v7002_v45, 9  ;;  %v7027_v54 = vld [vmem:[%s7868_s23 + $0xc4] sm:$0xf]  ;;  %v7001_v45 = vld [vmem:[%s7868_s23 + $0x5c] sm:$0x1] }
  0xee   : > { %v3042_v60 = vsel %vm426_vm0, %v2983_v49, 0  ;;  %v2524_v7 = vsel %vm7926_vm3, %v2519_v0, %v2523_v57  ;;  %v2942_v8 = vunpack.c.l.b16 %v2514_v2  ;;  %v7004_v49 = vld [vmem:[%s7868_s23 + $0x68] sm:$0x1] }
  0xef   : > { %v2975_v39 = vpack.c.b16 %v2945_v27, %v2944_v5  ;;  %v8504_v1 = vpop.f32.mrf.mxu0  ;;  %3117 = vmatpush.bf16.xpose.msra.mxu1 %v3042_v60  ;;  %v2707_v5 = vshrl.u32 %v6894_v38, 16  ;;  %v2943_v25 = vunpack.c.l.b16 %v2524_v7  ;;  %v2701_v26 = vrot.slane %v2700_v3, 4  ;;  %v7028_v57 = vld [vmem:[%s7868_s23 + $0xc8] sm:$0x1]  ;;  %v7633_v7 = vld [vmem:[%s7868_s23 + $0xcc] sm:$0xff] }
  0xf0   : > { %v8495_v46 = vpop.f32.mrf.mxu3  ;;  %v3459_v60 = vrot.slane %v7027_v54, 5  ;;  %v3462_v63 = vrot.slane %v7028_v57, 5  ;;  %v7025_v54 = vld [vmem:[%s7868_s23 + $0xbc] sm:$0x1] }
  0xf1   : > { %v3018_v48 = vsel %vm426_vm0, %v2975_v39, 0  ;;  %v2709_v27 = vrot.slane %v2707_v5, 4  ;;  %v2974_v32 = vpack.c.b16 %v2943_v25, %v2942_v8  ;;  %v7625_v5 = vld [vmem:[%s7868_s23 + $0x6c] sm:$0xff]  ;;  %v7569_v8 = vld [vmem:[%s10842_s1 + $0x78] sm:$0xff] }
  0xf2   : > { %3068 = vmatpush.bf16.xpose.msra.mxu0 %v3018_v48  ;;  %v8510_v18 = vpop.f32.mrf.mxu1  ;;  %v7003_v48 = vld [vmem:[%s7868_s23 + $0x64] sm:$0xf] }
  0xf3   : > { %v3015_v34 = vsel %vm426_vm0, %v2974_v32, 0  ;;  %v3403_v50 = vrot.slane %v7003_v48, 5  ;;  %v4075_v32 = vsel %vm426_vm0, %v7633_v7, 0  ;;  %v7624_v7 = vld [vmem:[%s7868_s23 + $0x60] sm:$0xff] }
  0xf4   : > { %6618 = vmatmul.msk.bf16.gmra.mxu2 %vm426_vm0, %v7567_v36 }
  0xf5   : > { %v8512_v23 = vpop.f32.mrf.mxu2  ;;  %v3404_v59 = vsel %vm7936_vm6, %v7036_v53, %v3403_v50  ;;  %v3405_v30 = vrot.slane %v3403_v50, 4  ;;  %v3399_v50 = vrot.slane %v7001_v45, 5 }
  0xf6   : > { %v3535_v0 = vunpack.c.l.b16 %v3404_v59 }
  0xf7   : > { %v8528_v40 = vpop.f32.mrf.mxu0 }
  0xf8   : > { %6698 = vmatmul.msk.bf16.gmra.mxu0 %vm426_vm0, %v7575_v4  ;;  %v8524_v38 = vpop.f32.mrf.mxu3 }
  0xf9   : > { %6626 = vmatmul.msk.bf16.gmra.mxu3 %vm426_vm0, %v7567_v36  ;;  %v6895_v36 = vld [vmem:[%s7868_s23 + $0x74] sm:$0x1] }
  0xfa   : > { %6706 = vmatmul.msk.bf16.gmra.mxu1 %vm426_vm0, %v7575_v4  ;;  %v2705_v4 = vrot.slane %v2703_v52, 5  ;;  %v2713_v11 = vshll.u32 %v6895_v36, 16  ;;  %3069 = vmatpush.bf16.xpose.msra.mxu0 %v3015_v34  ;;  %v8532_v41 = vpop.f32.mrf.mxu1  ;;  %v3406_v52 = vrot.slane %v7004_v49, 5  ;;  %v7044_v36 = vrot.slane %v7026_v51, 9  ;;  %v7023_v51 = vld [vmem:[%s7868_s23 + $0xb4] sm:$0xe] }
  0xfb   : > { %v7043_v57 = vrot.slane %v7023_v51, 9  ;;  %v6996_v51 = vld [vmem:[%s7868_s23 + $0x48] sm:$0xe] }
  0xfc   : > { %v2706_v24 = vsel %vm7926_vm3, %v2701_v26, %v2705_v4  ;;  %v2710_v58 = vor.u32 %v2709_v27, %v2705_v4  ;;  %v2715_v33 = vrot.slane %v2713_v11, 5  ;;  %v3407_v2 = vsel %vm7936_vm6, %v3405_v30, %v3406_v52  ;;  %v7024_v52 = vld [vmem:[%s7868_s23 + $0xb8] sm:$0xf] }
  0xfd   : > { %v2958_v39 = vunpack.c.l.b16 %v2706_v24  ;;  %v8534_v42 = vpop.f32.mrf.mxu2  ;;  %v3460_v3 = vsel %vm7936_vm6, %v7044_v36, %v3459_v60  ;;  %v3461_v4 = vrot.slane %v3459_v60, 4  ;;  %v3536_v11 = vunpack.c.l.b16 %v3407_v2 }
  0xfe   : > { %v2711_v35 = vrot.slane %v2710_v58, 4  ;;  %v3551_v25 = vunpack.c.l.b16 %v3460_v3 }
  0xff   : > { %v8557_v26 = vpop.f32.mrf.mxu0  ;;  %v3463_v27 = vsel %vm7936_vm6, %v3461_v4, %v3462_v63  ;;  %v3560_v24 = vpack.c.b16 %v3536_v11, %v3535_v0  ;;  %v3452_v63 = vrot.slane %v7024_v52, 5  ;;  %v3455_v0 = vrot.slane %v7025_v54, 5  ;;  %v7594_v11 = vld [vmem:[%s10842_s1 + $0xc0] sm:$0xff]  ;;  %v6997_v52 = vld [vmem:[%s7868_s23 + $0x4c] sm:$0xf] }
 0x100   : > { %v2716_v9 = vsel %vm7926_vm3, %v2711_v35, %v2715_v33  ;;  %v8546_v62 = vpop.f32.mrf.mxu3  ;;  %v3552_v58 = vunpack.c.l.b16 %v3463_v27  ;;  %v7577_v35 = vld [vmem:[%s10842_s1 + $0xb8] sm:$0xff]  ;;  %v6998_v54 = vld [vmem:[%s7868_s23 + $0x50] sm:$0x1] }
 0x101   : > { %v2959_v21 = vunpack.c.l.b16 %v2716_v9  ;;  %v3453_v4 = vsel %vm7936_vm6, %v7043_v57, %v3452_v63 }
 0x102   : > { %v8563_v33 = vpop.f32.mrf.mxu1  ;;  %v3549_v27 = vunpack.c.l.b16 %v3453_v4  ;;  %v7022_v4 = vld [vmem:[%s7868_s23 + $0xb0] sm:$0x1] }
 0x103   : > { %v2982_v20 = vpack.c.b16 %v2959_v21, %v2958_v39  ;;  %v3568_v39 = vpack.c.b16 %v3552_v58, %v3551_v25 }
 0x104   : > { %6619 = vmatmul.msk.bf16.gmra.mxu2 %vm426_vm0, %v7568_v28 }
 0x105   : > { %v3039_v44 = vsel %vm426_vm0, %v2982_v20, 0  ;;  %v8565_v34 = vpop.f32.mrf.mxu2  ;;  %v3639_v9 = vsel %vm426_vm0, %v3568_v39, 0  ;;  %v6999_v20 = vld [vmem:[%s7868_s23 + $0x54] sm:$0xe]  ;;  %v7602_v39 = vld [vmem:[%s10842_s1 + $0x100] sm:$0xff] }
 0x106   : > { %3118 = vmatpush.bf16.xpose.msra.mxu1 %v3039_v44  ;;  %3690 = vmatpush.bf16.xpose.msrb.mxu3 %v3639_v9  ;;  %v7000_v44 = vld [vmem:[%s7868_s23 + $0x58] sm:$0xf]  ;;  %v7035_v49 = vrot.slane %v6999_v20, 9 }
 0x107   : > { %v8581_v48 = vpop.f32.mrf.mxu0  ;;  %v3396_v53 = vrot.slane %v7000_v44, 5 }
 0x108   : > { %6699 = vmatmul.msk.bf16.gmra.mxu0 %vm426_vm0, %v7576_v37  ;;  %v8574_v21 = vpop.f32.mrf.mxu3 }
 0x109   : > { %6627 = vmatmul.msk.bf16.gmra.mxu3 %vm426_vm0, %v7568_v28  ;;  %v4051_v28 = vsel %vm426_vm0, %v7625_v5, 0  ;;  %v3397_v30 = vsel %vm7936_vm6, %v7035_v49, %v3396_v53  ;;  %v3398_v60 = vrot.slane %v3396_v53, 4  ;;  %v3454_v5 = vrot.slane %v3452_v63, 4 }
 0x10a   : > { %6707 = vmatmul.msk.bf16.gmra.mxu1 %vm426_vm0, %v7576_v37  ;;  %4077 = vmatpush.bf16.xpose.msrb.mxu0 %v4051_v28  ;;  %v3615_v37 = vsel %vm426_vm0, %v3560_v24, 0  ;;  %v8586_v36 = vpop.f32.mrf.mxu1  ;;  %v3533_v2 = vunpack.c.l.b16 %v3397_v30  ;;  %v7034_v30 = vrot.slane %v6996_v51, 9  ;;  %v3392_v63 = vrot.slane %v6998_v54, 5 }
 0x10b   : > { %3641 = vmatpush.bf16.xpose.msrb.mxu2 %v3615_v37  ;;  %v3400_v3 = vsel %vm7936_vm6, %v3398_v60, %v3399_v50  ;;  %v3456_v28 = vsel %vm7936_vm6, %v3454_v5, %v3455_v0  ;;  %v3389_v60 = vrot.slane %v6997_v52, 5  ;;  %v7020_v0 = vld [vmem:[%s7868_s23 + $0xa8] sm:$0xe] }
 0x10c   : > { %v3534_v25 = vunpack.c.l.b16 %v3400_v3  ;;  %v3550_v37 = vunpack.c.l.b16 %v3456_v28  ;;  %v7021_v3 = vld [vmem:[%s7868_s23 + $0xac] sm:$0xf]  ;;  %v7042_v5 = vrot.slane %v7020_v0, 9  ;;  %v3448_v28 = vrot.slane %v7022_v4, 5 }
 0x10d   : > { %v8588_v59 = vpop.f32.mrf.mxu2 }
 0x10e   : > { %4126 = vmatpush.bf16.xpose.msrb.mxu1 %v4075_v32  ;;  %v4048_v32 = vsel %vm426_vm0, %v7624_v7, 0  ;;  %v3567_v20 = vpack.c.b16 %v3550_v37, %v3549_v27 }
 0x110   : > { %v8605_v58 = vpop.f32.mrf.mxu3  ;;  %v3636_v45 = vsel %vm426_vm0, %v3567_v20, 0  ;;  %v7631_v20 = vld [vmem:[%s7868_s23 + $0xb4] sm:$0xff] }
 0x111   : > { %3691 = vmatpush.bf16.xpose.msrb.mxu3 %v3636_v45  ;;  %v7595_v45 = vld [vmem:[%s10842_s1 + $0xc8] sm:$0xff]  ;;  %v4069_v54 = vsel %vm426_vm0, %v7631_v20, 0  ;;  %v7019_v20 = vld [vmem:[%s7868_s23 + $0xa4] sm:$0x1] }
 0x112   : > { %4078 = vmatpush.bf16.xpose.msrb.mxu0 %v4048_v32 }
 0x114   : > { %6620 = vmatmul.msk.bf16.gmra.mxu2 %vm426_vm0, %v7569_v8 }
 0x118   : > { %6700 = vmatmul.msk.bf16.gmra.mxu0 %vm426_vm0, %v7577_v35 }
 0x119   : > { %6628 = vmatmul.msk.bf16.gmra.mxu3 %vm426_vm0, %v7569_v8  ;;  %v7632_v8 = vld [vmem:[%s7868_s23 + $0xc0] sm:$0xff] }
 0x11a   : > { %6708 = vmatmul.msk.bf16.gmra.mxu1 %vm426_vm0, %v7577_v35  ;;  %v4072_v24 = vsel %vm426_vm0, %v7632_v8, 0  ;;  %v3559_v35 = vpack.c.b16 %v3534_v25, %v3533_v2  ;;  %v3390_v8 = vsel %vm7936_vm6, %v7034_v30, %v3389_v60  ;;  %v3445_v25 = vrot.slane %v7021_v3, 5 }
 0x11b   : > { %4127 = vmatpush.bf16.xpose.msrb.mxu1 %v4072_v24  ;;  %v3531_v27 = vunpack.c.l.b16 %v3390_v8 }
 0x11c   : > { %v3612_v9 = vsel %vm426_vm0, %v3559_v35, 0  ;;  %v3446_v37 = vsel %vm7936_vm6, %v7042_v5, %v3445_v25 }
 0x11d   : > { %3642 = vmatpush.bf16.xpose.msrb.mxu2 %v3612_v9  ;;  %v7623_v9 = vld [vmem:[%s7868_s23 + $0x54] sm:$0xff] }
 0x11e   : > { %v4045_v52 = vsel %vm426_vm0, %v7623_v9, 0 }
 0x11f   : > { %4079 = vmatpush.bf16.xpose.msrb.mxu0 %v4045_v52 }
 0x123   : > { %4128 = vmatpush.bf16.xpose.msrb.mxu1 %v4069_v54  ;;  %v3441_v54 = vrot.slane %v7019_v20, 5 }
 0x124   : > { %6853 = vmatmul.msk.bf16.vlgmr.msra.gmra.mxu2 %vm426_vm0, %v7594_v11 }
 0x125   : > { %v1832_v44 = vpop.f32.mrf.mxu0 }
 0x127   : > { %v1881_v49 = vpop.f32.mrf.mxu1  ;;  %v1250_v53 = vpop.f32.mrf.mxu2 }
 0x128   : > { %6965 = vmatmul.msk.bf16.vlgmr.msra.gmra.mxu0 %vm426_vm0, %v7602_v39  ;;  %v1371_v50 = vadd.f32 %v1250_v53, %v8391_v6 }
 0x129   : > { %6861 = vmatmul.msk.bf16.vlgmr.msra.gmra.mxu3 %vm426_vm0, %v7594_v11  ;;  %v3391_v11 = vrot.slane %v3389_v60, 4 }
 0x12a   : > { %6973 = vmatmul.msk.bf16.vlgmr.msra.gmra.mxu1 %vm426_vm0, %v7602_v39  ;;  %v8620_v57 = vadd.f32 %v1832_v44, %v1371_v50  ;;  %v3447_v39 = vrot.slane %v3445_v25, 4  ;;  %v3547_v50 = vunpack.c.l.b16 %v3446_v37  ;;  %v6994_v25 = vld [vmem:[%s7868_s23 + $0x40] sm:$0xf] }
 0x12b   : > { %v3393_v35 = vsel %vm7936_vm6, %v3391_v11, %v3392_v63  ;;  %v7603_v63 = vld [vmem:[%s10842_s1 + $0x108] sm:$0xff] }
 0x12c   : > { %v1299_v2 = vpop.f32.mrf.mxu3  ;;  %v3532_v53 = vunpack.c.l.b16 %v3393_v35  ;;  %v3449_v51 = vsel %vm7936_vm6, %v3447_v39, %v3448_v28  ;;  %v3382_v35 = vrot.slane %v6994_v25, 5  ;;  %v7017_v39 = vld [vmem:[%s7868_s23 + $0x9c] sm:$0xe] }
 0x12d   : > { %v1372_v6 = vadd.f32 %v1299_v2, %v8397_v13  ;;  %v1834_v7 = vpop.f32.mrf.mxu0  ;;  %v3548_v60 = vunpack.c.l.b16 %v3449_v51 }
 0x12e   : > { %v3558_v30 = vpack.c.b16 %v3532_v53, %v3531_v27  ;;  %v6995_v27 = vld [vmem:[%s7868_s23 + $0x44] sm:$0x1] }
 0x12f   : > { %v1883_v32 = vpop.f32.mrf.mxu1  ;;  %v1252_v24 = vpop.f32.mrf.mxu2  ;;  %v8634_v13 = vadd.f32 %v1881_v49, %v1372_v6  ;;  %v3566_v2 = vpack.c.b16 %v3548_v60, %v3547_v50  ;;  %v3385_v37 = vrot.slane %v6995_v27, 5  ;;  %v3384_v50 = vrot.slane %v3382_v35, 4 }
 0x130   : > { %v1373_v44 = vadd.f32 %v1252_v24, %v8420_v47  ;;  %v3609_v0 = vsel %vm426_vm0, %v3558_v30, 0 }
 0x131   : > { %3643 = vmatpush.bf16.xpose.msrb.mxu2 %v3609_v0  ;;  %v3633_v5 = vsel %vm426_vm0, %v3566_v2, 0  ;;  %v7622_v2 = vld [vmem:[%s7868_s23 + $0x48] sm:$0xff] }
 0x132   : > { %v8644_v49 = vadd.f32 %v1834_v7, %v1373_v44  ;;  %3692 = vmatpush.bf16.xpose.msrb.mxu3 %v3633_v5  ;;  %v7041_v44 = vrot.slane %v7017_v39, 9  ;;  %v7596_v5 = vld [vmem:[%s10842_s1 + $0xd0] sm:$0xff]  ;;  %v4042_v25 = vsel %vm426_vm0, %v7622_v2, 0 }
 0x133   : > { %4080 = vmatpush.bf16.xpose.msrb.mxu0 %v4042_v25 }
 0x134   : > { %v1301_v47 = vpop.f32.mrf.mxu3  ;;  %6854 = vmatmul.msk.bf16.gmra.mxu2 %vm426_vm0, %v7595_v45 }
 0x135   : > { %v1374_v3 = vadd.f32 %v1301_v47, %v8425_v55  ;;  %v1837_v4 = vpop.f32.mrf.mxu0  ;;  %v6993_v55 = vld [vmem:[%s7868_s23 + $0x3c] sm:$0xe]  ;;  %v3386_v47 = vsel %vm7936_vm6, %v3384_v50, %v3385_v37  ;;  %v7604_v37 = vld [vmem:[%s10842_s1 + $0x110] sm:$0xff] }
 0x136   : > { %v7033_v24 = vrot.slane %v6993_v55, 9 }
 0x137   : > { %v1886_v6 = vpop.f32.mrf.mxu1  ;;  %v1255_v7 = vpop.f32.mrf.mxu2  ;;  %v8653_v8 = vadd.f32 %v1883_v32, %v1374_v3  ;;  %v7018_v32 = vld [vmem:[%s7868_s23 + $0xa0] sm:$0xf]  ;;  %v7630_v3 = vld [vmem:[%s7868_s23 + $0xa8] sm:$0xff] }
 0x138   : > { %6966 = vmatmul.msk.bf16.gmra.mxu0 %vm426_vm0, %v7603_v63  ;;  %v1375_v11 = vadd.f32 %v1255_v7, %v8445_v19  ;;  %v3383_v53 = vsel %vm7936_vm6, %v7033_v24, %v3382_v35  ;;  %v3438_v51 = vrot.slane %v7018_v32, 5  ;;  %v3530_v7 = vunpack.c.l.b16 %v3386_v47 }
 0x139   : > { %6862 = vmatmul.msk.bf16.gmra.mxu3 %vm426_vm0, %v7595_v45  ;;  %v3529_v52 = vunpack.c.l.b16 %v3383_v53  ;;  %v4066_v27 = vsel %vm426_vm0, %v7630_v3, 0  ;;  %v7016_v3 = vld [vmem:[%s7868_s23 + $0x98] sm:$0x1] }
 0x13a   : > { %6974 = vmatmul.msk.bf16.gmra.mxu1 %vm426_vm0, %v7603_v63  ;;  %v8662_v28 = vadd.f32 %v1837_v4, %v1375_v11  ;;  %v3439_v63 = vsel %vm7936_vm6, %v7041_v44, %v3438_v51  ;;  %v3440_v0 = vrot.slane %v3438_v51, 4  ;;  %v6991_v51 = vld [vmem:[%s7868_s23 + $0x34] sm:$0xf] }
 0x13b   : > { %v3545_v11 = vunpack.c.l.b16 %v3439_v63  ;;  %v3557_v24 = vpack.c.b16 %v3530_v7, %v3529_v52  ;;  %4129 = vmatpush.bf16.xpose.msrb.mxu1 %v4066_v27  ;;  %v6992_v52 = vld [vmem:[%s7868_s23 + $0x38] sm:$0x1]  ;;  %v3375_v47 = vrot.slane %v6991_v51, 5  ;;  %v3434_v27 = vrot.slane %v7016_v3, 5 }
 0x13c   : > { %v1304_v9 = vpop.f32.mrf.mxu3  ;;  %v3442_v55 = vsel %vm7936_vm6, %v3440_v0, %v3441_v54  ;;  %v3378_v63 = vrot.slane %v6992_v52, 5  ;;  %v7014_v0 = vld [vmem:[%s7868_s23 + $0x90] sm:$0xe] }
 0x13d   : > { %v1376_v19 = vadd.f32 %v1304_v9, %v8452_v29  ;;  %v1839_v45 = vpop.f32.mrf.mxu0  ;;  %v3546_v35 = vunpack.c.l.b16 %v3442_v55  ;;  %v3606_v39 = vsel %vm426_vm0, %v3557_v24, 0 }
 0x13e   : > { %3644 = vmatpush.bf16.xpose.msrb.mxu2 %v3606_v39 }
 0x13f   : > { %v1888_v30 = vpop.f32.mrf.mxu1  ;;  %v1257_v60 = vpop.f32.mrf.mxu2  ;;  %v8676_v29 = vadd.f32 %v1886_v6, %v1376_v19  ;;  %v3565_v9 = vpack.c.b16 %v3546_v35, %v3545_v11  ;;  %v3377_v11 = vrot.slane %v3375_v47, 4 }
 0x140   : > { %v1377_v4 = vadd.f32 %v1257_v60, %v8469_v15 }
 0x141   : > { %v3630_v44 = vsel %vm426_vm0, %v3565_v9, 0  ;;  %v7621_v9 = vld [vmem:[%s7868_s23 + $0x3c] sm:$0xff] }
 0x142   : > { %v8686_v6 = vadd.f32 %v1839_v45, %v1377_v4  ;;  %3693 = vmatpush.bf16.xpose.msrb.mxu3 %v3630_v44  ;;  %v7040_v4 = vrot.slane %v7014_v0, 9  ;;  %v7597_v44 = vld [vmem:[%s10842_s1 + $0xd8] sm:$0xff]  ;;  %v4039_v51 = vsel %vm426_vm0, %v7621_v9, 0 }
 0x143   : > { %4081 = vmatpush.bf16.xpose.msrb.mxu0 %v4039_v51 }
 0x144   : > { %v1306_v15 = vpop.f32.mrf.mxu3  ;;  %6855 = vmatmul.msk.bf16.gmra.mxu2 %vm426_vm0, %v7596_v5 }
 0x145   : > { %v1378_v32 = vadd.f32 %v1306_v15, %v8479_v12  ;;  %v1842_v20 = vpop.f32.mrf.mxu0  ;;  %v6990_v12 = vld [vmem:[%s7868_s23 + $0x30] sm:$0xe]  ;;  %v3379_v15 = vsel %vm7936_vm6, %v3377_v11, %v3378_v63  ;;  %v7605_v63 = vld [vmem:[%s10842_s1 + $0x118] sm:$0xff] }
 0x146   : > { %v7032_v60 = vrot.slane %v6990_v12, 9 }
 0x147   : > { %v1891_v19 = vpop.f32.mrf.mxu1  ;;  %v1260_v45 = vpop.f32.mrf.mxu2  ;;  %v8695_v53 = vadd.f32 %v1888_v30, %v1378_v32  ;;  %v7015_v30 = vld [vmem:[%s7868_s23 + $0x94] sm:$0xf]  ;;  %v7629_v32 = vld [vmem:[%s7868_s23 + $0x9c] sm:$0xff] }
 0x148   : > { %6967 = vmatmul.msk.bf16.gmra.mxu0 %vm426_vm0, %v7604_v37  ;;  %v1379_v50 = vadd.f32 %v1260_v45, %v8504_v1  ;;  %v3376_v7 = vsel %vm7936_vm6, %v7032_v60, %v3375_v47  ;;  %v3431_v55 = vrot.slane %v7015_v30, 5  ;;  %v3528_v45 = vunpack.c.l.b16 %v3379_v15 }
 0x149   : > { %6863 = vmatmul.msk.bf16.gmra.mxu3 %vm426_vm0, %v7596_v5  ;;  %v3527_v25 = vunpack.c.l.b16 %v3376_v7  ;;  %v4063_v52 = vsel %vm426_vm0, %v7629_v32, 0  ;;  %v7013_v32 = vld [vmem:[%s7868_s23 + $0x8c] sm:$0x1] }
 0x14a   : > { %6975 = vmatmul.msk.bf16.gmra.mxu1 %vm426_vm0, %v7604_v37  ;;  %v8704_v54 = vadd.f32 %v1842_v20, %v1379_v50  ;;  %v3432_v37 = vsel %vm7936_vm6, %v7040_v4, %v3431_v55  ;;  %v3433_v39 = vrot.slane %v3431_v55, 4  ;;  %v6988_v55 = vld [vmem:[%s7868_s23 + $0x28] sm:$0xf] }
 0x14b   : > { %v3543_v50 = vunpack.c.l.b16 %v3432_v37  ;;  %v3556_v60 = vpack.c.b16 %v3528_v45, %v3527_v25  ;;  %4130 = vmatpush.bf16.xpose.msrb.mxu1 %v4063_v52  ;;  %v6989_v25 = vld [vmem:[%s7868_s23 + $0x2c] sm:$0x1]  ;;  %v3368_v15 = vrot.slane %v6988_v55, 5  ;;  %v3427_v52 = vrot.slane %v7013_v32, 5 }
 0x14c   : > { %v1309_v2 = vpop.f32.mrf.mxu3  ;;  %v3435_v12 = vsel %vm7936_vm6, %v3433_v39, %v3434_v27  ;;  %v3371_v37 = vrot.slane %v6989_v25, 5  ;;  %v7011_v39 = vld [vmem:[%s7868_s23 + $0x84] sm:$0xe] }
 0x14d   : > { %v1380_v1 = vadd.f32 %v1309_v2, %v8510_v18  ;;  %v1844_v5 = vpop.f32.mrf.mxu0  ;;  %v3544_v47 = vunpack.c.l.b16 %v3435_v12  ;;  %v3603_v0 = vsel %vm426_vm0, %v3556_v60, 0 }
 0x14e   : > { %3645 = vmatpush.bf16.xpose.msrb.mxu2 %v3603_v0 }
 0x14f   : > { %v1893_v24 = vpop.f32.mrf.mxu1  ;;  %v1262_v35 = vpop.f32.mrf.mxu2  ;;  %v8718_v18 = vadd.f32 %v1891_v19, %v1380_v1  ;;  %v3564_v2 = vpack.c.b16 %v3544_v47, %v3543_v50  ;;  %v3370_v50 = vrot.slane %v3368_v15, 4 }
 0x150   : > { %v1381_v20 = vadd.f32 %v1262_v35, %v8528_v40 }
 0x151   : > { %v3627_v4 = vsel %vm426_vm0, %v3564_v2, 0  ;;  %v7620_v2 = vld [vmem:[%s7868_s23 + $0x30] sm:$0xff] }
 0x152   : > { %v8728_v19 = vadd.f32 %v1844_v5, %v1381_v20  ;;  %3694 = vmatpush.bf16.xpose.msrb.mxu3 %v3627_v4  ;;  %v7039_v20 = vrot.slane %v7011_v39, 9  ;;  %v7598_v4 = vld [vmem:[%s10842_s1 + $0xe0] sm:$0xff]  ;;  %v4036_v55 = vsel %vm426_vm0, %v7620_v2, 0 }
 0x153   : > { %4082 = vmatpush.bf16.xpose.msrb.mxu0 %v4036_v55 }
 0x154   : > { %v1311_v40 = vpop.f32.mrf.mxu3  ;;  %6856 = vmatmul.msk.bf16.gmra.mxu2 %vm426_vm0, %v7597_v44 }
 0x155   : > { %v1382_v30 = vadd.f32 %v1311_v40, %v8532_v41  ;;  %v1847_v3 = vpop.f32.mrf.mxu0  ;;  %v6987_v41 = vld [vmem:[%s7868_s23 + $0x24] sm:$0xe]  ;;  %v3372_v40 = vsel %vm7936_vm6, %v3370_v50, %v3371_v37 }
 0x156   : > { %v7031_v35 = vrot.slane %v6987_v41, 9  ;;  %v7606_v37 = vld [vmem:[%s10842_s1 + $0x120] sm:$0xff] }
 0x157   : > { %v1896_v1 = vpop.f32.mrf.mxu1  ;;  %v1265_v5 = vpop.f32.mrf.mxu2  ;;  %v8737_v7 = vadd.f32 %v1893_v24, %v1382_v30  ;;  %v7012_v24 = vld [vmem:[%s7868_s23 + $0x88] sm:$0xf]  ;;  %v7628_v30 = vld [vmem:[%s7868_s23 + $0x90] sm:$0xff] }
 0x158   : > { %6968 = vmatmul.msk.bf16.gmra.mxu0 %vm426_vm0, %v7605_v63  ;;  %v1383_v11 = vadd.f32 %v1265_v5, %v8557_v26  ;;  %v3369_v45 = vsel %vm7936_vm6, %v7031_v35, %v3368_v15  ;;  %v3424_v12 = vrot.slane %v7012_v24, 5  ;;  %v3526_v5 = vunpack.c.l.b16 %v3372_v40 }
 0x159   : > { %6864 = vmatmul.msk.bf16.gmra.mxu3 %vm426_vm0, %v7597_v44  ;;  %v3525_v51 = vunpack.c.l.b16 %v3369_v45  ;;  %v4060_v25 = vsel %vm426_vm0, %v7628_v30, 0  ;;  %v7010_v30 = vld [vmem:[%s7868_s23 + $0x80] sm:$0x1] }
 0x15a   : > { %6976 = vmatmul.msk.bf16.gmra.mxu1 %vm426_vm0, %v7605_v63  ;;  %v8746_v27 = vadd.f32 %v1847_v3, %v1383_v11  ;;  %v3425_v63 = vsel %vm7936_vm6, %v7039_v20, %v3424_v12  ;;  %v3426_v0 = vrot.slane %v3424_v12, 4  ;;  %v6985_v12 = vld [vmem:[%s7868_s23 + $0x1c] sm:$0xf] }
 0x15b   : > { %v3541_v11 = vunpack.c.l.b16 %v3425_v63  ;;  %v3555_v35 = vpack.c.b16 %v3526_v5, %v3525_v51  ;;  %4131 = vmatpush.bf16.xpose.msrb.mxu1 %v4060_v25  ;;  %v6986_v51 = vld [vmem:[%s7868_s23 + $0x20] sm:$0x1]  ;;  %v3361_v40 = vrot.slane %v6985_v12, 5  ;;  %v3420_v25 = vrot.slane %v7010_v30, 5 }
 0x15c   : > { %v1314_v9 = vpop.f32.mrf.mxu3  ;;  %v3428_v41 = vsel %vm7936_vm6, %v3426_v0, %v3427_v52  ;;  %v3364_v63 = vrot.slane %v6986_v51, 5  ;;  %v7008_v0 = vld [vmem:[%s7868_s23 + $0x78] sm:$0xe] }
 0x15d   : > { %v1384_v26 = vadd.f32 %v1314_v9, %v8563_v33  ;;  %v1849_v44 = vpop.f32.mrf.mxu0  ;;  %v3542_v15 = vunpack.c.l.b16 %v3428_v41  ;;  %v3600_v39 = vsel %vm426_vm0, %v3555_v35, 0 }
 0x15e   : > { %3646 = vmatpush.bf16.xpose.msrb.mxu2 %v3600_v39 }
 0x15f   : > { %v1898_v60 = vpop.f32.mrf.mxu1  ;;  %v1267_v47 = vpop.f32.mrf.mxu2  ;;  %v8760_v33 = vadd.f32 %v1896_v1, %v1384_v26  ;;  %v3563_v9 = vpack.c.b16 %v3542_v15, %v3541_v11  ;;  %v3363_v11 = vrot.slane %v3361_v40, 4 }
 0x160   : > { %v1385_v3 = vadd.f32 %v1267_v47, %v8581_v48 }
 0x161   : > { %v3624_v20 = vsel %vm426_vm0, %v3563_v9, 0  ;;  %v7619_v9 = vld [vmem:[%s7868_s23 + $0x24] sm:$0xff] }
 0x162   : > { %v8770_v1 = vadd.f32 %v1849_v44, %v1385_v3  ;;  %3695 = vmatpush.bf16.xpose.msrb.mxu3 %v3624_v20  ;;  %v7038_v3 = vrot.slane %v7008_v0, 9  ;;  %v7599_v20 = vld [vmem:[%s10842_s1 + $0xe8] sm:$0xff]  ;;  %v4033_v12 = vsel %vm426_vm0, %v7619_v9, 0 }
 0x163   : > { %4083 = vmatpush.bf16.xpose.msrb.mxu0 %v4033_v12 }
 0x164   : > { %v1316_v48 = vpop.f32.mrf.mxu3  ;;  %6857 = vmatmul.msk.bf16.gmra.mxu2 %vm426_vm0, %v7598_v4 }
 0x165   : > { %v1386_v24 = vadd.f32 %v1316_v48, %v8586_v36  ;;  %v1852_v32 = vpop.f32.mrf.mxu0  ;;  %v6984_v36 = vld [vmem:[%s7868_s23 + $0x18] sm:$0xe]  ;;  %v3365_v48 = vsel %vm7936_vm6, %v3363_v11, %v3364_v63  ;;  %v7607_v63 = vld [vmem:[%s10842_s1 + $0x128] sm:$0xff] }
 0x166   : > { %v7030_v47 = vrot.slane %v6984_v36, 9 }
 0x167   : > { %v1901_v26 = vpop.f32.mrf.mxu1  ;;  %v1270_v44 = vpop.f32.mrf.mxu2  ;;  %v8779_v45 = vadd.f32 %v1898_v60, %v1386_v24  ;;  %v7009_v60 = vld [vmem:[%s7868_s23 + $0x7c] sm:$0xf]  ;;  %v7627_v24 = vld [vmem:[%s7868_s23 + $0x84] sm:$0xff] }
 0x168   : > { %6969 = vmatmul.msk.bf16.gmra.mxu0 %vm426_vm0, %v7606_v37  ;;  %v1387_v50 = vadd.f32 %v1270_v44, %v8399_v14  ;;  %v3362_v5 = vsel %vm7936_vm6, %v7030_v47, %v3361_v40  ;;  %v3417_v41 = vrot.slane %v7009_v60, 5  ;;  %v3524_v44 = vunpack.c.l.b16 %v3365_v48  ;;  %v6983_v48 = vld [vmem:[%s7868_s23 + $0x14] sm:$0x1] }
 0x169   : > { %6865 = vmatmul.msk.bf16.gmra.mxu3 %vm426_vm0, %v7598_v4  ;;  %v3523_v55 = vunpack.c.l.b16 %v3362_v5  ;;  %v4057_v51 = vsel %vm426_vm0, %v7627_v24, 0  ;;  %v3357_v24 = vrot.slane %v6983_v48, 5 }
 0x16a   : > { %6977 = vmatmul.msk.bf16.gmra.mxu1 %vm426_vm0, %v7606_v37  ;;  %v8788_v52 = vadd.f32 %v1852_v32, %v1387_v50  ;;  %v3418_v37 = vsel %vm7936_vm6, %v7038_v3, %v3417_v41  ;;  %v3419_v39 = vrot.slane %v3417_v41, 4  ;;  %v6982_v41 = vld [vmem:[%s7868_s23 + $0x10] sm:$0xf] }
 0x16b   : > { %v3539_v50 = vunpack.c.l.b16 %v3418_v37  ;;  %v3554_v47 = vpack.c.b16 %v3524_v44, %v3523_v55  ;;  %4132 = vmatpush.bf16.xpose.msrb.mxu1 %v4057_v51  ;;  %v7006_v55 = vld [vmem:[%s7868_s23 + $0x70] sm:$0xf]  ;;  %v7005_v37 = vld [vmem:[%s7868_s23 + $0x6c] sm:$0xe] }
 0x16c   : > { %v1319_v2 = vpop.f32.mrf.mxu3  ;;  %v3421_v36 = vsel %vm7936_vm6, %v3419_v39, %v3420_v25  ;;  %v3410_v25 = vrot.slane %v7006_v55, 5  ;;  %v7037_v44 = vrot.slane %v7005_v37, 9  ;;  %v7600_v55 = vld [vmem:[%s10842_s1 + $0xf0] sm:$0xff] }
 0x16d   : > { %v1388_v14 = vadd.f32 %v1319_v2, %v8412_v16  ;;  %v1854_v4 = vpop.f32.mrf.mxu0  ;;  %v3540_v40 = vunpack.c.l.b16 %v3421_v36  ;;  %v3597_v0 = vsel %vm426_vm0, %v3554_v47, 0 }
 0x16e   : > { %3647 = vmatpush.bf16.xpose.msrb.mxu2 %v3597_v0 }
 0x16f   : > { %v1903_v35 = vpop.f32.mrf.mxu1  ;;  %v1272_v15 = vpop.f32.mrf.mxu2  ;;  %v8802_v16 = vadd.f32 %v1901_v26, %v1388_v14  ;;  %v3562_v2 = vpack.c.b16 %v3540_v40, %v3539_v50  ;;  %v3412_v50 = vrot.slane %v3410_v25, 4  ;;  %v3411_v40 = vsel %vm7936_vm6, %v7037_v44, %v3410_v25 }
 0x170   : > { %v1389_v32 = vadd.f32 %v1272_v15, %v8427_v56  ;;  %v6981_v15 = vld [vmem:[%s7868_s23 + $0xc] sm:$0xe] }
 0x171   : > { %v3621_v3 = vsel %vm426_vm0, %v3562_v2, 0  ;;  %v3537_v2 = vunpack.c.l.b16 %v3411_v40 }
 0x172   : > { %v8812_v26 = vadd.f32 %v1854_v4, %v1389_v32  ;;  %3696 = vmatpush.bf16.xpose.msrb.mxu3 %v3621_v3  ;;  %v7007_v32 = vld [vmem:[%s7868_s23 + $0x74] sm:$0x1] }
 0x173   : > { %v3413_v36 = vrot.slane %v7007_v32, 5 }
 0x174   : > { %v1321_v56 = vpop.f32.mrf.mxu3  ;;  %6858 = vmatmul.msk.bf16.gmra.mxu2 %vm426_vm0, %v7599_v20 }
 0x175   : > { %v1390_v60 = vadd.f32 %v1321_v56, %v8437_v43  ;;  %v1857_v30 = vpop.f32.mrf.mxu0  ;;  %v3354_v43 = vrot.slane %v6982_v41, 5  ;;  %v3414_v0 = vsel %vm7936_vm6, %v3412_v50, %v3413_v36 }
 0x176   : > { %v3538_v3 = vunpack.c.l.b16 %v3414_v0  ;;  %v7314_v0 = vld [vmem:[%s7868_s23 + $0xcc] sm:$0xf] }
 0x177   : > { %v1906_v14 = vpop.f32.mrf.mxu1  ;;  %v1275_v4 = vpop.f32.mrf.mxu2  ;;  %v8821_v5 = vadd.f32 %v1903_v35, %v1390_v60  ;;  %v7029_v35 = vrot.slane %v6981_v15, 9  ;;  %v3356_v9 = vrot.slane %v3354_v43, 4 }
 0x178   : > { %6970 = vmatmul.msk.bf16.gmra.mxu0 %vm426_vm0, %v7607_v63  ;;  %v1391_v11 = vadd.f32 %v1275_v4, %v8454_v31  ;;  %v7626_v4 = vld [vmem:[%s7868_s23 + $0x78] sm:$0xff]  ;;  %v3561_v25 = vpack.c.b16 %v3538_v3, %v3537_v2  ;;  %v7316_v3 = vld [vmem:[%s7868_s23 + $0xd4] sm:$0x1] }
 0x179   : > { %6866 = vmatmul.msk.bf16.gmra.mxu3 %vm426_vm0, %v7599_v20  ;;  %v3355_v51 = vsel %vm7936_vm6, %v7029_v35, %v3354_v43  ;;  %v3358_v47 = vsel %vm7936_vm6, %v3356_v9, %v3357_v24  ;;  %v4054_v48 = vsel %vm426_vm0, %v7626_v4, 0  ;;  %v7608_v9 = vld [vmem:[%s10842_s1 + $0x130] sm:$0xff] }
 0x17a   : > { %6978 = vmatmul.msk.bf16.gmra.mxu1 %vm426_vm0, %v7607_v63  ;;  %v8832_v39 = vadd.f32 %v1857_v30, %v1391_v11  ;;  %v3521_v56 = vunpack.c.l.b16 %v3355_v51  ;;  %v3522_v63 = vunpack.c.l.b16 %v3358_v47 }
 0x17b   : > { %4133 = vmatpush.bf16.xpose.msrb.mxu1 %v4054_v48 }
 0x17c   : > { %v1324_v31 = vpop.f32.mrf.mxu3  ;;  %v3553_v43 = vpack.c.b16 %v3522_v63, %v3521_v56 }
 0x17d   : > { %v1392_v20 = vadd.f32 %v1324_v31, %v8467_v22  ;;  %v1859_v12 = vpop.f32.mrf.mxu0  ;;  %v7618_v22 = vld [vmem:[%s7868_s23 + $0x18] sm:$0xff] }
 0x17e   : > { %v4030_v15 = vsel %vm426_vm0, %v7618_v22, 0  ;;  %v3594_v37 = vsel %vm426_vm0, %v3553_v43, 0  ;;  %v4680_v22 = vshrl.u32 %v7314_v0, 16 }
 0x17f   : > { %v1908_v60 = vpop.f32.mrf.mxu1  ;;  %v1277_v30 = vpop.f32.mrf.mxu2  ;;  %v8846_v11 = vadd.f32 %v1906_v14, %v1392_v20  ;;  %4084 = vmatpush.bf16.xpose.msrb.mxu0 %v4030_v15  ;;  %3648 = vmatpush.bf16.xpose.msrb.mxu2 %v3594_v37  ;;  %v7290_v20 = vld [vmem:[%s7868_s23 + $0x6c] sm:$0xf]  ;;  %v4683_v37 = vshll.u32 %v7314_v0, 16 }
 0x180   : > { %v1393_v41 = vadd.f32 %v1277_v30, %v8481_v17  ;;  %v3618_v17 = vsel %vm426_vm0, %v3561_v25, 0  ;;  %v4488_v47 = vshrl.u32 %v7290_v20, 16  ;;  %v4491_v40 = vshll.u32 %v7290_v20, 16  ;;  %v7315_v30 = vld [vmem:[%s7868_s23 + $0xd0] sm:$0xf] }
 0x181   : > { %3697 = vmatpush.bf16.xpose.msrb.mxu3 %v3618_v17  ;;  %v4682_v48 = vrot.slane %v4680_v22, 4  ;;  %v7426_v22 = vld [vmem:[%s7868_s23 + $0xcc] sm:$0xe] }
 0x182   : > { %v8855_v35 = vadd.f32 %v1859_v12, %v1393_v41  ;;  %v7291_v12 = vld [vmem:[%s7868_s23 + $0x70] sm:$0xf]  ;;  %v4490_v41 = vrot.slane %v4488_v47, 4 }
 0x183   : > { %v4497_v56 = vshll.u32 %v7291_v12, 16  ;;  %v4501_v63 = vshrl.u32 %v7291_v12, 16  ;;  %v7403_v47 = vld [vmem:[%s7868_s23 + $0x70] sm:$0xf] }
 0x184   : > { %10873 = vst [vmem:[#allocation3_spill] sm:$0xff] %v8855_v35  ;;  %v1326_v14 = vpop.f32.mrf.mxu3  ;;  %6859 = vmatmul.msk.bf16.gmra.mxu2 %vm426_vm0, %v7600_v55 }
 0x185   : > { %v1394_v24 = vadd.f32 %v1326_v14, %v8495_v46  ;;  %v1862_v32 = vpop.f32.mrf.mxu0  ;;  %v7292_v46 = vld [vmem:[%s7868_s23 + $0x74] sm:$0x1]  ;;  %v4499_v43 = vrot.slane %v4497_v56, 5  ;;  %v4503_v25 = vrot.slane %v4501_v63, 4 }
 0x187   : > { %v8863_v44 = vpop.f32.mrf.mxu1  ;;  %v1280_v31 = vpop.f32.mrf.mxu2  ;;  %v8865_v50 = vadd.f32 %v1908_v60, %v1394_v24  ;;  %v4507_v60 = vshll.u32 %v7292_v46, 16  ;;  %v4689_v24 = vshll.u32 %v7315_v30, 16  ;;  %v4504_v12 = vor.u32 %v4503_v25, %v4499_v43 }
 0x188   : > { %6971 = vmatmul.msk.bf16.gmra.mxu0 %vm426_vm0, %v7608_v9  ;;  %v1395_v36 = vadd.f32 %v1280_v31, %v8512_v23  ;;  %v4699_v31 = vshll.u32 %v7316_v3, 16  ;;  %v4685_v46 = vrot.slane %v4683_v37, 5  ;;  %v7444_v25 = vrot.slane %v7426_v22, 9 }
 0x189   : > { %10874 = vst [vmem:[#allocation4_spill] sm:$0xff] %v8865_v50  ;;  %6867 = vmatmul.msk.bf16.gmra.mxu3 %vm426_vm0, %v7600_v55  ;;  %v4493_v55 = vrot.slane %v4491_v40, 5  ;;  %v4509_v15 = vrot.slane %v4507_v60, 5  ;;  %v7404_v40 = vld [vmem:[%s7868_s23 + $0x74] sm:$0x1]  ;;  %v4691_v0 = vrot.slane %v4689_v24, 5 }
 0x18a   : > { %6979 = vmatmul.msk.bf16.gmra.mxu1 %vm426_vm0, %v7608_v9  ;;  %v8874_v51 = vadd.f32 %v1862_v32, %v1395_v36  ;;  %v4693_v32 = vshrl.u32 %v7315_v30, 16  ;;  %v7402_v36 = vld [vmem:[%s7868_s23 + $0x6c] sm:$0xe]  ;;  %v4701_v60 = vrot.slane %v4699_v31, 5  ;;  %v4686_v50 = vor.u32 %v4685_v46, %v4682_v48  ;;  %v7427_v30 = vld [vmem:[%s7868_s23 + $0xd0] sm:$0xf] }
 0x18b   : > { %v4494_v9 = vor.u32 %v4493_v55, %v4490_v41  ;;  %v7436_v56 = vrot.slane %v7402_v36, 9  ;;  %v5221_v41 = vrot.slane %v7403_v47, 5  ;;  %v5224_v55 = vrot.slane %v7404_v40, 5  ;;  %v7428_v40 = vld [vmem:[%s7868_s23 + $0xd4] sm:$0x1] }
 0x18c   : > { %10875 = vst [vmem:[#allocation5_spill] sm:$0xff] %v8874_v51  ;;  %v1329_v2 = vpop.f32.mrf.mxu3  ;;  %v4505_v51 = vrot.slane %v4504_v12, 4  ;;  %v5277_v37 = vrot.slane %v7427_v30, 5 }
 0x18d   : > { %v8880_v23 = vadd.f32 %v1329_v2, %v8524_v38  ;;  %v8882_v4 = vpop.f32.mrf.mxu0  ;;  %v7601_v38 = vld [vmem:[%s10842_s1 + $0xf8] sm:$0xff]  ;;  %v4495_v63 = vrot.slane %v4494_v9, 4  ;;  %v4695_v2 = vrot.slane %v4693_v32, 4  ;;  %v4687_v32 = vrot.slane %v4686_v50, 4 }
 0x18e   : > { %v7609_v9 = vld [vmem:[%s10842_s1 + $0x138] sm:$0xff]  ;;  %v4510_v48 = vsel %vm7926_vm3, %v4505_v51, %v4509_v15  ;;  %v5222_v31 = vsel %vm7936_vm6, %v7436_v56, %v5221_v41  ;;  %v5223_v47 = vrot.slane %v5221_v41, 4  ;;  %v5278_v51 = vsel %vm7936_vm6, %v7444_v25, %v5277_v37 }
 0x18f   : > { %v8884_v17 = vpop.f32.mrf.mxu1  ;;  %v1282_v14 = vpop.f32.mrf.mxu2  ;;  %v4500_v3 = vsel %vm7926_vm3, %v4495_v63, %v4499_v43  ;;  %v4775_v12 = vunpack.c.l.b16 %v4510_v48  ;;  %v4692_v63 = vsel %vm7926_vm3, %v4687_v32, %v4691_v0  ;;  %v5279_v50 = vrot.slane %v5277_v37, 4  ;;  %v7288_v32 = vld [vmem:[%s7868_s23 + $0x64] sm:$0xf] }
 0x190   : > { %v1397_v20 = vadd.f32 %v1282_v14, %v8534_v42  ;;  %v4696_v42 = vor.u32 %v4695_v2, %v4691_v0  ;;  %v4774_v24 = vunpack.c.l.b16 %v4500_v3  ;;  %v5353_v2 = vunpack.c.l.b16 %v5222_v31  ;;  %v7289_v31 = vld [vmem:[%s7868_s23 + $0x68] sm:$0x1] }
 0x191   : > { %v4790_v30 = vunpack.c.l.b16 %v4692_v63  ;;  %v5225_v41 = vsel %vm7936_vm6, %v5223_v47, %v5224_v55  ;;  %v5280_v25 = vrot.slane %v7428_v40, 5  ;;  %v8929_v55 = vadd.f32 %v8863_v44, %v8880_v23  ;;  %v7311_v23 = vld [vmem:[%s7868_s23 + $0xc0] sm:$0xf] }
 0x192   : > { %v4697_v46 = vrot.slane %v4696_v42, 4  ;;  %v4799_v22 = vpack.c.b16 %v4775_v12, %v4774_v24  ;;  %v5354_v42 = vunpack.c.l.b16 %v5225_v41  ;;  %v7287_v24 = vld [vmem:[%s7868_s23 + $0x60] sm:$0xf]  ;;  %v4473_v44 = vshll.u32 %v7288_v32, 16 }
 0x193   : > { %10876 = vst [vmem:[#allocation6_spill] sm:$0xff] %v8929_v55  ;;  %v4467_v47 = vshll.u32 %v7287_v24, 16  ;;  %v4483_v63 = vshll.u32 %v7289_v31, 16 }
 0x194   : > { %v1331_v14 = vpop.f32.mrf.mxu3  ;;  %6860 = vmatmul.msk.bf16.gmra.mxu2 %vm426_vm0, %v7601_v38  ;;  %v4854_v37 = vsel %vm426_vm0, %v4799_v22, 0  ;;  %v5378_v48 = vpack.c.b16 %v5354_v42, %v5353_v2  ;;  %v7312_v2 = vld [vmem:[%s7868_s23 + $0xc4] sm:$0xf]  ;;  %v7313_v42 = vld [vmem:[%s7868_s23 + $0xc8] sm:$0x1] }
 0x195   : > { %v8906_v43 = vadd.f32 %v1331_v14, %v8546_v62  ;;  %v8908_v36 = vpop.f32.mrf.mxu0  ;;  %v4702_v62 = vsel %vm7926_vm3, %v4697_v46, %v4701_v60  ;;  %v5369_v60 = vunpack.c.l.b16 %v5278_v51  ;;  %v8932_v14 = vadd.f32 %v8882_v4, %v1397_v20  ;;  %4880 = vmatpush.bf16.xpose.msra.mxu2 %v4854_v37 }
 0x196   : > { %v4791_v3 = vunpack.c.l.b16 %v4702_v62  ;;  %v4464_v46 = vshrl.u32 %v7287_v24, 16  ;;  %v5433_v20 = vsel %vm426_vm0, %v5378_v48, 0  ;;  %v4469_v62 = vrot.slane %v4467_v47, 5 }
 0x197   : > { %v8915_v15 = vpop.f32.mrf.mxu1  ;;  %v1285_v56 = vpop.f32.mrf.mxu2  ;;  %10877 = vst [vmem:[#allocation7_spill] sm:$0xff] %v8932_v14  ;;  %5459 = vmatpush.bf16.xpose.msra.mxu0 %v5433_v20  ;;  %v4665_v24 = vshll.u32 %v7312_v2, 16  ;;  %v4669_v47 = vshrl.u32 %v7312_v2, 16  ;;  %v7424_v2 = vld [vmem:[%s7868_s23 + $0xc4] sm:$0xf] }
 0x198   : > { %6972 = vmatmul.msk.bf16.gmra.mxu0 %vm426_vm0, %v7609_v9  ;;  %v8923_v0 = vadd.f32 %v1285_v56, %v8565_v34  ;;  %v4807_v34 = vpack.c.b16 %v4791_v3, %v4790_v30  ;;  %v4466_v22 = vrot.slane %v4464_v46, 4  ;;  %v4475_v30 = vrot.slane %v4473_v44, 5  ;;  %v7400_v44 = vld [vmem:[%s7868_s23 + $0x64] sm:$0xf] }
 0x199   : > { %6868 = vmatmul.msk.bf16.gmra.mxu3 %vm426_vm0, %v7601_v38  ;;  %v5281_v38 = vsel %vm7936_vm6, %v5279_v50, %v5280_v25  ;;  %v4485_v3 = vrot.slane %v4483_v63, 5  ;;  %v4656_v25 = vshrl.u32 %v7311_v23, 16  ;;  %v4675_v63 = vshll.u32 %v7313_v42, 16  ;;  %v7634_v42 = vld [vmem:[%s10842_s1 + $0x180] sm:$0xff] }
 0x19a   : > { %6980 = vmatmul.msk.bf16.gmra.mxu1 %vm426_vm0, %v7609_v9  ;;  %v5370_v12 = vunpack.c.l.b16 %v5281_v38  ;;  %v4878_v4 = vsel %vm426_vm0, %v4807_v34, 0  ;;  %v4477_v9 = vshrl.u32 %v7288_v32, 16  ;;  %v4470_v38 = vor.u32 %v4469_v62, %v4466_v22  ;;  %v7399_v32 = vld [vmem:[%s7868_s23 + $0x60] sm:$0xe] }
 0x19b   : > { %4929 = vmatpush.bf16.xpose.msra.mxu3 %v4878_v4  ;;  %v4658_v46 = vrot.slane %v4656_v25, 4  ;;  %v4671_v22 = vrot.slane %v4669_v47, 4  ;;  %v5214_v62 = vrot.slane %v7400_v44, 5  ;;  %v5270_v55 = vrot.slane %v7424_v2, 5 }
 0x19c   : > { %v1334_v40 = vpop.f32.mrf.mxu3  ;;  %v5386_v56 = vpack.c.b16 %v5370_v12, %v5369_v60  ;;  %v4479_v41 = vrot.slane %v4477_v9, 4  ;;  %v4659_v60 = vshll.u32 %v7311_v23, 16  ;;  %v4471_v4 = vrot.slane %v4470_v38, 4 }
 0x19d   : > { %v8945_v51 = vadd.f32 %v1334_v40, %v8574_v21  ;;  %v8947_v50 = vpop.f32.mrf.mxu0  ;;  %v7610_v21 = vld [vmem:[%s10842_s1 + $0x140] sm:$0xff]  ;;  %v7401_v40 = vld [vmem:[%s7868_s23 + $0x68] sm:$0x1]  ;;  %v4667_v9 = vrot.slane %v4665_v24, 5  ;;  %v7435_v23 = vrot.slane %v7399_v32, 9  ;;  %v5272_v2 = vrot.slane %v5270_v55, 4 }
 0x19e   : > { %v5457_v48 = vsel %vm426_vm0, %v5386_v56, 0  ;;  %v4480_v12 = vor.u32 %v4479_v41, %v4475_v30  ;;  %v4661_v20 = vrot.slane %v4659_v60, 5  ;;  %v4677_v41 = vrot.slane %v4675_v63, 5  ;;  %v7425_v32 = vld [vmem:[%s7868_s23 + $0xc8] sm:$0x1] }
 0x19f   : > { %v8950_v37 = vpop.f32.mrf.mxu1  ;;  %v1287_v34 = vpop.f32.mrf.mxu2  ;;  %5508 = vmatpush.bf16.xpose.msra.mxu1 %v5457_v48  ;;  %v5217_v25 = vrot.slane %v7401_v40, 5  ;;  %v7423_v48 = vld [vmem:[%s7868_s23 + $0xc0] sm:$0xe]  ;;  %v4672_v24 = vor.u32 %v4671_v22, %v4667_v9  ;;  %v5216_v40 = vrot.slane %v5214_v62, 4 }
 0x1a0   : > { %v8958_v31 = vadd.f32 %v1287_v34, %v8588_v59  ;;  %v4481_v56 = vrot.slane %v4480_v12, 4  ;;  %v4476_v59 = vsel %vm7926_vm3, %v4471_v4, %v4475_v30  ;;  %v4662_v34 = vor.u32 %v4661_v20, %v4658_v46 }
 0x1a1   : > { %v4772_v60 = vunpack.c.l.b16 %v4476_v59  ;;  %v5215_v30 = vsel %vm7936_vm6, %v7435_v23, %v5214_v62  ;;  %v4673_v4 = vrot.slane %v4672_v24, 4  ;;  %v7443_v63 = vrot.slane %v7423_v48, 9 }
 0x1a2   : > { %v4486_v38 = vsel %vm7926_vm3, %v4481_v56, %v4485_v3  ;;  %v4663_v44 = vrot.slane %v4662_v34, 4  ;;  %v5351_v20 = vunpack.c.l.b16 %v5215_v30  ;;  %v9001_v24 = vadd.f32 %v8884_v17, %v8906_v43  ;;  %v7309_v43 = vld [vmem:[%s7868_s23 + $0xb8] sm:$0xf] }
 0x1a3   : > { %v4773_v47 = vunpack.c.l.b16 %v4486_v38  ;;  %v4678_v62 = vsel %vm7926_vm3, %v4673_v4, %v4677_v41  ;;  %v7284_v41 = vld [vmem:[%s7868_s23 + $0x54] sm:$0xf] }
 0x1a4   : > { %v1336_v14 = vpop.f32.mrf.mxu3  ;;  %7093 = vmatmul.msk.bf16.vlgmr.msrb.gmra.mxu2 %vm426_vm0, %v7610_v21  ;;  %v4668_v22 = vsel %vm7926_vm3, %v4663_v44, %v4667_v9  ;;  %v4789_v48 = vunpack.c.l.b16 %v4678_v62  ;;  %v7308_v44 = vld [vmem:[%s7868_s23 + $0xb4] sm:$0xf] }
 0x1a5   : > { %v8976_v12 = vadd.f32 %v1336_v14, %v8605_v58  ;;  %v8978_v46 = vpop.f32.mrf.mxu0  ;;  %v4798_v56 = vpack.c.b16 %v4773_v47, %v4772_v60  ;;  %v5218_v58 = vsel %vm7936_vm6, %v5216_v40, %v5217_v25  ;;  %v5273_v14 = vrot.slane %v7425_v32, 5  ;;  %v7285_v60 = vld [vmem:[%s7868_s23 + $0x58] sm:$0xf]  ;;  %v7286_v32 = vld [vmem:[%s7868_s23 + $0x5c] sm:$0x1] }
 0x1a6   : > { %v4788_v59 = vunpack.c.l.b16 %v4668_v22  ;;  %v5352_v34 = vunpack.c.l.b16 %v5218_v58  ;;  %v5271_v25 = vsel %vm7936_vm6, %v7443_v63, %v5270_v55  ;;  %v4443_v47 = vshll.u32 %v7284_v41, 16 }
 0x1a7   : > { %v8980_v35 = vpop.f32.mrf.mxu1  ;;  %v2268_v3 = vpop.f32.mrf.mxu2  ;;  %v4851_v9 = vsel %vm426_vm0, %v4798_v56, 0  ;;  %v5367_v38 = vunpack.c.l.b16 %v5271_v25  ;;  %v5274_v55 = vsel %vm7936_vm6, %v5272_v2, %v5273_v14  ;;  %v4449_v63 = vshll.u32 %v7285_v60, 16 }
 0x1a8   : > { %7253 = vmatmul.msk.bf16.vlgmr.msrb.gmra.mxu0 %vm426_vm0, %v7634_v42  ;;  %v8988_v23 = vadd.f32 %v2268_v3, %v8620_v57  ;;  %4881 = vmatpush.bf16.xpose.msra.mxu2 %v4851_v9  ;;  %v5377_v57 = vpack.c.b16 %v5352_v34, %v5351_v20  ;;  %v4806_v30 = vpack.c.b16 %v4789_v48, %v4788_v59  ;;  %v5368_v20 = vunpack.c.l.b16 %v5274_v55  ;;  %v7310_v34 = vld [vmem:[%s7868_s23 + $0xbc] sm:$0x1]  ;;  %v7611_v48 = vld [vmem:[%s10842_s1 + $0x148] sm:$0xff] }
 0x1a9   : > { %7101 = vmatmul.msk.bf16.vlgmr.msrb.gmra.mxu3 %vm426_vm0, %v7610_v21  ;;  %v9005_v21 = vadd.f32 %v8908_v36, %v8923_v0  ;;  %v4453_v17 = vshrl.u32 %v7285_v60, 16  ;;  %v4445_v22 = vrot.slane %v4443_v47, 5  ;;  %v4451_v14 = vrot.slane %v4449_v63, 5  ;;  %v7396_v60 = vld [vmem:[%s7868_s23 + $0x54] sm:$0xe] }
 0x1aa   : > { %7261 = vmatmul.msk.bf16.vlgmr.msrb.gmra.mxu1 %vm426_vm0, %v7634_v42  ;;  %v4440_v42 = vshrl.u32 %v7284_v41, 16  ;;  %v5430_v4 = vsel %vm426_vm0, %v5377_v57, 0  ;;  %v4875_v0 = vsel %vm426_vm0, %v4806_v30, 0  ;;  %v5385_v58 = vpack.c.b16 %v5368_v20, %v5367_v38  ;;  %v7398_v47 = vld [vmem:[%s7868_s23 + $0x5c] sm:$0x1] }
 0x1ab   : > { %5460 = vmatpush.bf16.xpose.msra.mxu0 %v5430_v4  ;;  %4930 = vmatpush.bf16.xpose.msra.mxu3 %v4875_v0  ;;  %v4455_v62 = vrot.slane %v4453_v17, 4  ;;  %v4459_v59 = vshll.u32 %v7286_v32, 16  ;;  %v4632_v2 = vshrl.u32 %v7308_v44, 16  ;;  %v4635_v57 = vshll.u32 %v7308_v44, 16 }
 0x1ac   : > { %v2317_v40 = vpop.f32.mrf.mxu3  ;;  %v4442_v56 = vrot.slane %v4440_v42, 4  ;;  %v4641_v41 = vshll.u32 %v7309_v43, 16  ;;  %v5454_v30 = vsel %vm426_vm0, %v5385_v58, 0  ;;  %v7397_v42 = vld [vmem:[%s7868_s23 + $0x58] sm:$0xf]  ;;  %v4645_v44 = vshrl.u32 %v7309_v43, 16 }
 0x1ad   : > { %v9014_v3 = vadd.f32 %v2317_v40, %v8634_v13  ;;  %v9016_v36 = vpop.f32.mrf.mxu0  ;;  %v4456_v55 = vor.u32 %v4455_v62, %v4451_v14  ;;  %v4461_v32 = vrot.slane %v4459_v59, 5  ;;  %5509 = vmatpush.bf16.xpose.msra.mxu1 %v5454_v30  ;;  %v4634_v4 = vrot.slane %v4632_v2, 4 }
 0x1ae   : > { %v4446_v25 = vor.u32 %v4445_v22, %v4442_v56  ;;  %v4637_v20 = vrot.slane %v4635_v57, 5  ;;  %v4643_v63 = vrot.slane %v4641_v41, 5  ;;  %v4651_v0 = vshll.u32 %v7310_v34, 16  ;;  %v7421_v41 = vld [vmem:[%s7868_s23 + $0xb8] sm:$0xf] }
 0x1af   : > { %v9020_v9 = vpop.f32.mrf.mxu1  ;;  %v2270_v13 = vpop.f32.mrf.mxu2  ;;  %v4457_v17 = vrot.slane %v4456_v55, 4  ;;  %v7434_v56 = vrot.slane %v7396_v60, 9  ;;  %v5207_v62 = vrot.slane %v7397_v42, 5  ;;  %v5210_v59 = vrot.slane %v7398_v47, 5  ;;  %v7422_v60 = vld [vmem:[%s7868_s23 + $0xbc] sm:$0x1] }
 0x1b0   : > { %10878 = vst [vmem:[#allocation8_spill] sm:$0xff] %v9020_v9  ;;  %v9027_v38 = vadd.f32 %v2270_v13, %v8644_v49  ;;  %v4447_v40 = vrot.slane %v4446_v25, 4  ;;  %v7635_v49 = vld [vmem:[%s10842_s1 + $0x188] sm:$0xff]  ;;  %v4638_v58 = vor.u32 %v4637_v20, %v4634_v4  ;;  %v7420_v13 = vld [vmem:[%s7868_s23 + $0xb4] sm:$0xe]  ;;  %v4647_v34 = vrot.slane %v4645_v44, 4 }
 0x1b1   : > { %v4462_v43 = vsel %vm7926_vm3, %v4457_v17, %v4461_v32  ;;  %v4653_v57 = vrot.slane %v4651_v0, 5  ;;  %v5208_v47 = vsel %vm7936_vm6, %v7434_v56, %v5207_v62  ;;  %v5209_v4 = vrot.slane %v5207_v62, 4 }
 0x1b2   : > { %v4452_v22 = vsel %vm7926_vm3, %v4447_v40, %v4451_v14  ;;  %v4771_v14 = vunpack.c.l.b16 %v4462_v43  ;;  %v4639_v42 = vrot.slane %v4638_v58, 4  ;;  %v4648_v40 = vor.u32 %v4647_v34, %v4643_v63 }
 0x1b3   : > { %v4770_v2 = vunpack.c.l.b16 %v4452_v22  ;;  %v5349_v20 = vunpack.c.l.b16 %v5208_v47  ;;  %v7442_v9 = vrot.slane %v7420_v13, 9  ;;  %v5266_v22 = vrot.slane %v7422_v60, 5 }
 0x1b4   : > { %v2319_v25 = vpop.f32.mrf.mxu3  ;;  %7094 = vmatmul.msk.bf16.gmra.mxu2 %vm426_vm0, %v7611_v48  ;;  %v4644_v0 = vsel %vm7926_vm3, %v4639_v42, %v4643_v63  ;;  %v4649_v56 = vrot.slane %v4648_v40, 4  ;;  %v5211_v13 = vsel %vm7936_vm6, %v5209_v4, %v5210_v59  ;;  %v7282_v59 = vld [vmem:[%s7868_s23 + $0x4c] sm:$0xf]  ;;  %v9075_v60 = vadd.f32 %v8947_v50, %v8958_v31  ;;  %v7283_v42 = vld [vmem:[%s7868_s23 + $0x50] sm:$0x1] }
 0x1b5   : > { %v9044_v30 = vadd.f32 %v2319_v25, %v8653_v8  ;;  %v9046_v55 = vpop.f32.mrf.mxu0  ;;  %v4797_v44 = vpack.c.b16 %v4771_v14, %v4770_v2  ;;  %v5263_v8 = vrot.slane %v7421_v41, 5  ;;  %v4786_v62 = vunpack.c.l.b16 %v4644_v0  ;;  %v7281_v41 = vld [vmem:[%s7868_s23 + $0x48] sm:$0xf] }
 0x1b6   : > { %10879 = vst [vmem:[#allocation9_spill] sm:$0xff] %v9046_v55  ;;  %v5350_v63 = vunpack.c.l.b16 %v5211_v13  ;;  %v4416_v47 = vshrl.u32 %v7281_v41, 16  ;;  %v4419_v4 = vshll.u32 %v7281_v41, 16  ;;  %v7305_v0 = vld [vmem:[%s7868_s23 + $0xa8] sm:$0xf] }
 0x1b7   : > { %v9050_v32 = vpop.f32.mrf.mxu1  ;;  %v2273_v17 = vpop.f32.mrf.mxu2  ;;  %v4848_v25 = vsel %vm426_vm0, %v4797_v44, 0  ;;  %v5264_v43 = vsel %vm7936_vm6, %v7442_v9, %v5263_v8  ;;  %v5265_v2 = vrot.slane %v5263_v8, 4  ;;  %v4429_v44 = vshrl.u32 %v7282_v59, 16 }
 0x1b8   : > { %10880 = vst [vmem:[#allocation10_spill] sm:$0xff] %v9050_v32  ;;  %7254 = vmatmul.msk.bf16.gmra.mxu0 %vm426_vm0, %v7635_v49  ;;  %v9056_v58 = vadd.f32 %v2273_v17, %v8662_v28  ;;  %4882 = vmatpush.bf16.xpose.msra.mxu2 %v4848_v25  ;;  %v4654_v28 = vsel %vm7926_vm3, %v4649_v56, %v4653_v57  ;;  %v5365_v34 = vunpack.c.l.b16 %v5264_v43  ;;  %v4425_v17 = vshll.u32 %v7282_v59, 16  ;;  %v7306_v25 = vld [vmem:[%s7868_s23 + $0xac] sm:$0xf] }
 0x1b9   : > { %7102 = vmatmul.msk.bf16.gmra.mxu3 %vm426_vm0, %v7611_v48  ;;  %v9071_v48 = vadd.f32 %v8915_v15, %v8945_v51  ;;  %v4787_v9 = vunpack.c.l.b16 %v4654_v28  ;;  %v5376_v14 = vpack.c.b16 %v5350_v63, %v5349_v20  ;;  %v4418_v20 = vrot.slane %v4416_v47, 4  ;;  %v7307_v28 = vld [vmem:[%s7868_s23 + $0xb0] sm:$0x1]  ;;  %v7393_v47 = vld [vmem:[%s7868_s23 + $0x48] sm:$0xe] }
 0x1ba   : > { %10881 = vst [vmem:[#allocation11_spill] sm:$0xff] %v9056_v58  ;;  %7262 = vmatmul.msk.bf16.gmra.mxu1 %vm426_vm0, %v7635_v49  ;;  %v5267_v49 = vsel %vm7936_vm6, %v5265_v2, %v5266_v22  ;;  %v4421_v22 = vrot.slane %v4419_v4, 5  ;;  %v4427_v56 = vrot.slane %v4425_v17, 5  ;;  %v4431_v13 = vrot.slane %v4429_v44, 4 }
 0x1bb   : > { %v5366_v40 = vunpack.c.l.b16 %v5267_v49  ;;  %v4805_v50 = vpack.c.b16 %v4787_v9, %v4786_v62  ;;  %v5427_v31 = vsel %vm426_vm0, %v5376_v14, 0  ;;  %v4435_v2 = vshll.u32 %v7283_v42, 16 }
 0x1bc   : > { %v2322_v57 = vpop.f32.mrf.mxu3  ;;  %5461 = vmatpush.bf16.xpose.msra.mxu0 %v5427_v31  ;;  %v4608_v41 = vshrl.u32 %v7305_v0, 16  ;;  %v4611_v62 = vshll.u32 %v7305_v0, 16  ;;  %v4422_v14 = vor.u32 %v4421_v22, %v4418_v20  ;;  %v4432_v49 = vor.u32 %v4431_v13, %v4427_v56  ;;  %v7636_v20 = vld [vmem:[%s10842_s1 + $0x190] sm:$0xff] }
 0x1bd   : > { %v9082_v15 = vadd.f32 %v2322_v57, %v8676_v29  ;;  %v9084_v51 = vpop.f32.mrf.mxu0  ;;  %v5384_v8 = vpack.c.b16 %v5366_v40, %v5365_v34  ;;  %v4872_v29 = vsel %vm426_vm0, %v4805_v50, 0  ;;  %v7612_v34 = vld [vmem:[%s10842_s1 + $0x150] sm:$0xff]  ;;  %v7394_v57 = vld [vmem:[%s7868_s23 + $0x4c] sm:$0xf]  ;;  %v4437_v42 = vrot.slane %v4435_v2, 5 }
 0x1be   : > { %10883 = vst [vmem:[#allocation13_spill] sm:$0xff] %v9084_v51  ;;  %4931 = vmatpush.bf16.xpose.msra.mxu3 %v4872_v29  ;;  %v4610_v40 = vrot.slane %v4608_v41, 4  ;;  %v4613_v4 = vrot.slane %v4611_v62, 5  ;;  %v4617_v17 = vshll.u32 %v7306_v25, 16  ;;  %v4423_v44 = vrot.slane %v4422_v14, 4 }
 0x1bf   : > { %10882 = vst [vmem:[#allocation12_spill] sm:$0xff] %v9082_v15  ;;  %v9088_v63 = vpop.f32.mrf.mxu1  ;;  %v2275_v43 = vpop.f32.mrf.mxu2  ;;  %v5451_v9 = vsel %vm426_vm0, %v5384_v8, 0  ;;  %v4621_v0 = vshrl.u32 %v7306_v25, 16  ;;  %v4627_v50 = vshll.u32 %v7307_v28, 16  ;;  %v7395_v29 = vld [vmem:[%s7868_s23 + $0x50] sm:$0x1] }
 0x1c0   : > { %10884 = vst [vmem:[#allocation14_spill] sm:$0xff] %v9088_v63  ;;  %v9093_v59 = vadd.f32 %v2275_v43, %v8686_v6  ;;  %5510 = vmatpush.bf16.xpose.msra.mxu1 %v5451_v9  ;;  %v4433_v6 = vrot.slane %v4432_v49, 4  ;;  %v4614_v31 = vor.u32 %v4613_v4, %v4610_v40  ;;  %v4619_v43 = vrot.slane %v4617_v17, 5  ;;  %v7417_v28 = vld [vmem:[%s7868_s23 + $0xa8] sm:$0xe] }
 0x1c1   : > { %v7433_v63 = vrot.slane %v7393_v47, 9  ;;  %v5200_v8 = vrot.slane %v7394_v57, 5  ;;  %v4428_v22 = vsel %vm7926_vm3, %v4423_v44, %v4427_v56  ;;  %v4623_v25 = vrot.slane %v4621_v0, 4  ;;  %v7418_v4 = vld [vmem:[%s7868_s23 + $0xac] sm:$0xf] }
 0x1c2   : > { %10885 = vst [vmem:[#allocation15_spill] sm:$0xff] %v9093_v59  ;;  %v4438_v13 = vsel %vm7926_vm3, %v4433_v6, %v4437_v42  ;;  %v4629_v2 = vrot.slane %v4627_v50, 5  ;;  %v4768_v9 = vunpack.c.l.b16 %v4428_v22  ;;  %v4615_v49 = vrot.slane %v4614_v31, 4  ;;  %v7419_v17 = vld [vmem:[%s7868_s23 + $0xb0] sm:$0x1] }
 0x1c3   : > { %v4769_v14 = vunpack.c.l.b16 %v4438_v13  ;;  %v4624_v47 = vor.u32 %v4623_v25, %v4619_v43  ;;  %v5201_v57 = vsel %vm7936_vm6, %v7433_v63, %v5200_v8  ;;  %v5202_v40 = vrot.slane %v5200_v8, 4  ;;  %v7278_v25 = vld [vmem:[%s7868_s23 + $0x3c] sm:$0xf] }
 0x1c4   : > { %v2324_v51 = vpop.f32.mrf.mxu3  ;;  %7095 = vmatmul.msk.bf16.gmra.mxu2 %vm426_vm0, %v7612_v34  ;;  %v5203_v56 = vrot.slane %v7395_v29, 5  ;;  %v7441_v0 = vrot.slane %v7417_v28, 9  ;;  %v5256_v22 = vrot.slane %v7418_v4, 5  ;;  %v5259_v13 = vrot.slane %v7419_v17, 5  ;;  %v7279_v28 = vld [vmem:[%s7868_s23 + $0x40] sm:$0xf] }
 0x1c5   : > { %v9112_v41 = vadd.f32 %v2324_v51, %v8695_v53  ;;  %v9114_v62 = vpop.f32.mrf.mxu0  ;;  %v4796_v6 = vpack.c.b16 %v4769_v14, %v4768_v9  ;;  %v4620_v53 = vsel %vm7926_vm3, %v4615_v49, %v4619_v43  ;;  %v5347_v51 = vunpack.c.l.b16 %v5201_v57  ;;  %v7280_v57 = vld [vmem:[%s7868_s23 + $0x44] sm:$0x1] }
 0x1c6   : > { %10887 = vst [vmem:[#allocation17_spill] sm:$0xff] %v9114_v62  ;;  %v4625_v63 = vrot.slane %v4624_v47, 4  ;;  %v4784_v31 = vunpack.c.l.b16 %v4620_v53  ;;  %v5204_v29 = vsel %vm7936_vm6, %v5202_v40, %v5203_v56  ;;  %v9139_v9 = vadd.f32 %v8950_v37, %v8976_v12 }
 0x1c7   : > { %10886 = vst [vmem:[#allocation16_spill] sm:$0xff] %v9112_v41  ;;  %v9120_v42 = vpop.f32.mrf.mxu1  ;;  %v2278_v44 = vpop.f32.mrf.mxu2  ;;  %v4845_v8 = vsel %vm426_vm0, %v4796_v6, 0  ;;  %v5348_v43 = vunpack.c.l.b16 %v5204_v29  ;;  %v5258_v47 = vrot.slane %v5256_v22, 4  ;;  %v4392_v56 = vshrl.u32 %v7278_v25, 16  ;;  %v7303_v29 = vld [vmem:[%s7868_s23 + $0xa0] sm:$0xf] }
 0x1c8   : > { %7255 = vmatmul.msk.bf16.gmra.mxu0 %vm426_vm0, %v7636_v20  ;;  %v9126_v50 = vadd.f32 %v2278_v44, %v8704_v54  ;;  %4883 = vmatpush.bf16.xpose.msra.mxu2 %v4845_v8  ;;  %v4630_v54 = vsel %vm7926_vm3, %v4625_v63, %v4629_v2  ;;  %v4395_v4 = vshll.u32 %v7278_v25, 16  ;;  %v4401_v17 = vshll.u32 %v7279_v28, 16  ;;  %v7302_v44 = vld [vmem:[%s7868_s23 + $0x9c] sm:$0xf] }
 0x1c9   : > { %7103 = vmatmul.msk.bf16.gmra.mxu3 %vm426_vm0, %v7612_v34  ;;  %v9143_v34 = vadd.f32 %v8978_v46, %v8988_v23  ;;  %v4785_v14 = vunpack.c.l.b16 %v4630_v54  ;;  %v5375_v49 = vpack.c.b16 %v5348_v43, %v5347_v51  ;;  %v5260_v6 = vsel %vm7936_vm6, %v5258_v47, %v5259_v13  ;;  %v7613_v13 = vld [vmem:[%s10842_s1 + $0x158] sm:$0xff] }
 0x1ca   : > { %10888 = vst [vmem:[#allocation18_spill] sm:$0xff] %v9126_v50  ;;  %7263 = vmatmul.msk.bf16.gmra.mxu1 %vm426_vm0, %v7636_v20  ;;  %v5257_v20 = vsel %vm7936_vm6, %v7441_v0, %v5256_v22  ;;  %v5364_v53 = vunpack.c.l.b16 %v5260_v6  ;;  %v4394_v51 = vrot.slane %v4392_v56, 4  ;;  %v4397_v0 = vrot.slane %v4395_v4, 5 }
 0x1cb   : > { %v5363_v2 = vunpack.c.l.b16 %v5257_v20  ;;  %v4804_v46 = vpack.c.b16 %v4785_v14, %v4784_v31  ;;  %v5424_v23 = vsel %vm426_vm0, %v5375_v49, 0  ;;  %v4403_v63 = vrot.slane %v4401_v17, 5  ;;  %v7304_v20 = vld [vmem:[%s7868_s23 + $0xa4] sm:$0x1] }
 0x1cc   : > { %v2327_v40 = vpop.f32.mrf.mxu3  ;;  %5462 = vmatpush.bf16.xpose.msra.mxu0 %v5424_v23  ;;  %v4405_v31 = vshrl.u32 %v7279_v28, 16  ;;  %v4411_v22 = vshll.u32 %v7280_v57, 16  ;;  %v4584_v54 = vshrl.u32 %v7302_v44, 16  ;;  %v4398_v49 = vor.u32 %v4397_v0, %v4394_v51  ;;  %v7391_v28 = vld [vmem:[%s7868_s23 + $0x40] sm:$0xf] }
 0x1cd   : > { %v9150_v37 = vadd.f32 %v2327_v40, %v8718_v18  ;;  %v9152_v12 = vpop.f32.mrf.mxu0  ;;  %v4869_v43 = vsel %vm426_vm0, %v4804_v46, 0  ;;  %v5383_v14 = vpack.c.b16 %v5364_v53, %v5363_v2  ;;  %v4587_v47 = vshll.u32 %v7302_v44, 16  ;;  %v7390_v40 = vld [vmem:[%s7868_s23 + $0x3c] sm:$0xe] }
 0x1ce   : > { %4932 = vmatpush.bf16.xpose.msra.mxu3 %v4869_v43  ;;  %v4407_v56 = vrot.slane %v4405_v31, 4  ;;  %v4413_v4 = vrot.slane %v4411_v22, 5  ;;  %v4586_v17 = vrot.slane %v4584_v54, 4  ;;  %v4593_v46 = vshll.u32 %v7303_v29, 16  ;;  %v7637_v2 = vld [vmem:[%s10842_s1 + $0x198] sm:$0xff] }
 0x1cf   : > { %v9158_v8 = vpop.f32.mrf.mxu1  ;;  %v2280_v18 = vpop.f32.mrf.mxu2  ;;  %v5448_v57 = vsel %vm426_vm0, %v5383_v14, 0  ;;  %v4589_v23 = vrot.slane %v4587_v47, 5  ;;  %v4597_v6 = vshrl.u32 %v7303_v29, 16  ;;  %v4603_v51 = vshll.u32 %v7304_v20, 16  ;;  %v7392_v29 = vld [vmem:[%s7868_s23 + $0x44] sm:$0x1] }
 0x1d0   : > { %v9162_v25 = vadd.f32 %v2280_v18, %v8728_v19  ;;  %v4399_v19 = vrot.slane %v4398_v49, 4  ;;  %5511 = vmatpush.bf16.xpose.msra.mxu1 %v5448_v57  ;;  %v4408_v53 = vor.u32 %v4407_v56, %v4403_v63  ;;  %v4595_v44 = vrot.slane %v4593_v46, 5  ;;  %v7414_v14 = vld [vmem:[%s7868_s23 + $0x9c] sm:$0xe] }
 0x1d1   : > { %v7432_v0 = vrot.slane %v7390_v40, 9  ;;  %v4590_v31 = vor.u32 %v4589_v23, %v4586_v17  ;;  %v4599_v22 = vrot.slane %v4597_v6, 4  ;;  %v5193_v54 = vrot.slane %v7391_v28, 5  ;;  %v7416_v17 = vld [vmem:[%s7868_s23 + $0xa4] sm:$0x1] }
 0x1d2   : > { %v4404_v43 = vsel %vm7926_vm3, %v4399_v19, %v4403_v63  ;;  %v4409_v20 = vrot.slane %v4408_v53, 4  ;;  %v4605_v56 = vrot.slane %v4603_v51, 5  ;;  %v7415_v19 = vld [vmem:[%s7868_s23 + $0xa0] sm:$0xf]  ;;  %v5196_v6 = vrot.slane %v7392_v29, 5 }
 0x1d3   : > { %v4766_v40 = vunpack.c.l.b16 %v4404_v43  ;;  %v4591_v46 = vrot.slane %v4590_v31, 4  ;;  %v4600_v57 = vor.u32 %v4599_v22, %v4595_v44  ;;  %v5194_v62 = vsel %vm7936_vm6, %v7432_v0, %v5193_v54 }
 0x1d4   : > { %v2329_v18 = vpop.f32.mrf.mxu3  ;;  %7096 = vmatmul.msk.bf16.gmra.mxu2 %vm426_vm0, %v7613_v13  ;;  %v5195_v63 = vrot.slane %v5193_v54, 4  ;;  %v7440_v53 = vrot.slane %v7414_v14, 9  ;;  %v5252_v29 = vrot.slane %v7416_v17, 5 }
 0x1d5   : > { %v9180_v49 = vadd.f32 %v2329_v18, %v8737_v7  ;;  %v9182_v47 = vpop.f32.mrf.mxu0  ;;  %v4414_v7 = vsel %vm7926_vm3, %v4409_v20, %v4413_v4  ;;  %v5345_v18 = vunpack.c.l.b16 %v5194_v62  ;;  %v4596_v0 = vsel %vm7926_vm3, %v4591_v46, %v4595_v44  ;;  %v7275_v44 = vld [vmem:[%s7868_s23 + $0x30] sm:$0xf] }
 0x1d6   : > { %v4767_v43 = vunpack.c.l.b16 %v4414_v7  ;;  %v4601_v31 = vrot.slane %v4600_v57, 4  ;;  %v4782_v22 = vunpack.c.l.b16 %v4596_v0  ;;  %v5197_v4 = vsel %vm7936_vm6, %v5195_v63, %v5196_v6  ;;  %v7276_v63 = vld [vmem:[%s7868_s23 + $0x34] sm:$0xf]  ;;  %v7277_v7 = vld [vmem:[%s7868_s23 + $0x38] sm:$0x1] }
 0x1d7   : > { %v9188_v23 = vpop.f32.mrf.mxu1  ;;  %v2283_v28 = vpop.f32.mrf.mxu2  ;;  %v5249_v62 = vrot.slane %v7415_v19, 5  ;;  %v5346_v14 = vunpack.c.l.b16 %v5197_v4  ;;  %v9207_v20 = vadd.f32 %v8980_v35, %v9014_v3  ;;  %v4368_v19 = vshrl.u32 %v7275_v44, 16  ;;  %v7299_v6 = vld [vmem:[%s7868_s23 + $0x90] sm:$0xf] }
 0x1d8   : > { %7256 = vmatmul.msk.bf16.gmra.mxu0 %vm426_vm0, %v7637_v2  ;;  %v9194_v51 = vadd.f32 %v2283_v28, %v8746_v27  ;;  %v4795_v54 = vpack.c.b16 %v4767_v43, %v4766_v40  ;;  %v4606_v27 = vsel %vm7926_vm3, %v4601_v31, %v4605_v56  ;;  %v4371_v56 = vshll.u32 %v7275_v44, 16  ;;  %v7300_v44 = vld [vmem:[%s7868_s23 + $0x94] sm:$0xf] }
 0x1d9   : > { %7104 = vmatmul.msk.bf16.gmra.mxu3 %vm426_vm0, %v7613_v13  ;;  %v4783_v13 = vunpack.c.l.b16 %v4606_v27  ;;  %v5250_v46 = vsel %vm7936_vm6, %v7440_v53, %v5249_v62  ;;  %v5251_v57 = vrot.slane %v5249_v62, 4  ;;  %v5374_v40 = vpack.c.b16 %v5346_v14, %v5345_v18 }
 0x1da   : > { %7264 = vmatmul.msk.bf16.gmra.mxu1 %vm426_vm0, %v7637_v2  ;;  %v4842_v2 = vsel %vm426_vm0, %v4795_v54, 0  ;;  %v5361_v28 = vunpack.c.l.b16 %v5250_v46  ;;  %v4370_v0 = vrot.slane %v4368_v19, 4  ;;  %v4373_v18 = vrot.slane %v4371_v56, 5  ;;  %v7614_v46 = vld [vmem:[%s10842_s1 + $0x160] sm:$0xff] }
 0x1db   : > { %4884 = vmatpush.bf16.xpose.msra.mxu2 %v4842_v2  ;;  %v4803_v3 = vpack.c.b16 %v4783_v13, %v4782_v22  ;;  %v5253_v53 = vsel %vm7936_vm6, %v5251_v57, %v5252_v29  ;;  %v5421_v31 = vsel %vm426_vm0, %v5374_v40, 0  ;;  %v4377_v62 = vshll.u32 %v7276_v63, 16  ;;  %v7301_v2 = vld [vmem:[%s7868_s23 + $0x98] sm:$0x1]  ;;  %v7387_v40 = vld [vmem:[%s7868_s23 + $0x30] sm:$0xe] }
 0x1dc   : > { %v2332_v17 = vpop.f32.mrf.mxu3  ;;  %v5362_v4 = vunpack.c.l.b16 %v5253_v53  ;;  %5463 = vmatpush.bf16.xpose.msra.mxu0 %v5421_v31  ;;  %v4381_v14 = vshrl.u32 %v7276_v63, 16  ;;  %v4387_v22 = vshll.u32 %v7277_v7, 16  ;;  %v4560_v13 = vshrl.u32 %v7299_v6, 16  ;;  %v7388_v7 = vld [vmem:[%s7868_s23 + $0x34] sm:$0xf] }
 0x1dd   : > { %v9216_v43 = vadd.f32 %v2332_v17, %v8760_v33  ;;  %v9218_v35 = vpop.f32.mrf.mxu0  ;;  %v4866_v27 = vsel %vm426_vm0, %v4803_v3, 0  ;;  %v4374_v19 = vor.u32 %v4373_v18, %v4370_v0  ;;  %v4379_v17 = vrot.slane %v4377_v62, 5 }
 0x1de   : > { %4933 = vmatpush.bf16.xpose.msra.mxu3 %v4866_v27  ;;  %v5382_v57 = vpack.c.b16 %v5362_v4, %v5361_v28  ;;  %v4383_v56 = vrot.slane %v4381_v14, 4  ;;  %v4389_v3 = vrot.slane %v4387_v22, 5  ;;  %v4562_v63 = vrot.slane %v4560_v13, 4  ;;  %v7389_v14 = vld [vmem:[%s7868_s23 + $0x38] sm:$0x1] }
 0x1df   : > { %v9223_v54 = vpop.f32.mrf.mxu1  ;;  %v2285_v33 = vpop.f32.mrf.mxu2  ;;  %v4563_v53 = vshll.u32 %v7299_v6, 16  ;;  %v4573_v50 = vshrl.u32 %v7300_v44, 16  ;;  %v4579_v28 = vshll.u32 %v7301_v2, 16  ;;  %v7431_v0 = vrot.slane %v7387_v40, 9  ;;  %v7638_v6 = vld [vmem:[%s10842_s1 + $0x1a0] sm:$0xff] }
 0x1e0   : > { %v9228_v29 = vadd.f32 %v2285_v33, %v8770_v1  ;;  %v5445_v31 = vsel %vm426_vm0, %v5382_v57, 0  ;;  %v4375_v1 = vrot.slane %v4374_v19, 4  ;;  %v4569_v33 = vshll.u32 %v7300_v44, 16  ;;  %v7411_v40 = vld [vmem:[%s7868_s23 + $0x90] sm:$0xe] }
 0x1e1   : > { %5512 = vmatpush.bf16.xpose.msra.mxu1 %v5445_v31  ;;  %v4384_v41 = vor.u32 %v4383_v56, %v4379_v17  ;;  %v4565_v59 = vrot.slane %v4563_v53, 5  ;;  %v4575_v27 = vrot.slane %v4573_v50, 4  ;;  %v5186_v22 = vrot.slane %v7388_v7, 5 }
 0x1e2   : > { %v4380_v18 = vsel %vm7926_vm3, %v4375_v1, %v4379_v17  ;;  %v4571_v62 = vrot.slane %v4569_v33, 5  ;;  %v4581_v53 = vrot.slane %v4579_v28, 5  ;;  %v7412_v1 = vld [vmem:[%s7868_s23 + $0x94] sm:$0xf]  ;;  %v7413_v33 = vld [vmem:[%s7868_s23 + $0x98] sm:$0x1] }
 0x1e3   : > { %v4385_v57 = vrot.slane %v4384_v41, 4  ;;  %v4764_v19 = vunpack.c.l.b16 %v4380_v18  ;;  %v4566_v2 = vor.u32 %v4565_v59, %v4562_v63  ;;  %v5187_v31 = vsel %vm7936_vm6, %v7431_v0, %v5186_v22 }
 0x1e4   : > { %v2334_v4 = vpop.f32.mrf.mxu3  ;;  %7097 = vmatmul.msk.bf16.gmra.mxu2 %vm426_vm0, %v7614_v46  ;;  %v4576_v56 = vor.u32 %v4575_v27, %v4571_v62  ;;  %v5188_v17 = vrot.slane %v5186_v22, 4  ;;  %v5189_v32 = vrot.slane %v7389_v14, 5  ;;  %v5343_v41 = vunpack.c.l.b16 %v5187_v31  ;;  %v7273_v31 = vld [vmem:[%s7868_s23 + $0x28] sm:$0xf] }
 0x1e5   : > { %v9245_v44 = vadd.f32 %v2334_v4, %v8779_v45  ;;  %v9247_v13 = vpop.f32.mrf.mxu0  ;;  %v4390_v45 = vsel %vm7926_vm3, %v4385_v57, %v4389_v3  ;;  %v4567_v4 = vrot.slane %v4566_v2, 4  ;;  %v7439_v0 = vrot.slane %v7411_v40, 9  ;;  %v7272_v40 = vld [vmem:[%s7868_s23 + $0x24] sm:$0xf] }
 0x1e6   : > { %v4765_v63 = vunpack.c.l.b16 %v4390_v45  ;;  %v4577_v28 = vrot.slane %v4576_v56, 4  ;;  %v5190_v3 = vsel %vm7936_vm6, %v5188_v17, %v5189_v32  ;;  %v5242_v27 = vrot.slane %v7412_v1, 5  ;;  %v7296_v45 = vld [vmem:[%s7868_s23 + $0x84] sm:$0xf] }
 0x1e7   : > { %v9254_v50 = vpop.f32.mrf.mxu1  ;;  %v2288_v7 = vpop.f32.mrf.mxu2  ;;  %v4572_v18 = vsel %vm7926_vm3, %v4567_v4, %v4571_v62  ;;  %v5245_v14 = vrot.slane %v7413_v33, 5  ;;  %v5344_v2 = vunpack.c.l.b16 %v5190_v3  ;;  %v4344_v32 = vshrl.u32 %v7272_v40, 16 }
 0x1e8   : > { %7257 = vmatmul.msk.bf16.gmra.mxu0 %vm426_vm0, %v7638_v6  ;;  %v9260_v59 = vadd.f32 %v2288_v7, %v8788_v52  ;;  %v4794_v22 = vpack.c.b16 %v4765_v63, %v4764_v19  ;;  %v4582_v52 = vsel %vm7926_vm3, %v4577_v28, %v4581_v53  ;;  %v4780_v57 = vunpack.c.l.b16 %v4572_v18  ;;  %v7274_v19 = vld [vmem:[%s7868_s23 + $0x2c] sm:$0x1] }
 0x1e9   : > { %7105 = vmatmul.msk.bf16.gmra.mxu3 %vm426_vm0, %v7614_v46  ;;  %v4781_v46 = vunpack.c.l.b16 %v4582_v52  ;;  %v5243_v62 = vsel %vm7936_vm6, %v7439_v0, %v5242_v27  ;;  %v5244_v56 = vrot.slane %v5242_v27, 4  ;;  %v5373_v33 = vpack.c.b16 %v5344_v2, %v5343_v41 }
 0x1ea   : > { %7265 = vmatmul.msk.bf16.gmra.mxu1 %vm426_vm0, %v7638_v6  ;;  %v4839_v1 = vsel %vm426_vm0, %v4794_v22, 0  ;;  %v5359_v6 = vunpack.c.l.b16 %v5243_v62  ;;  %v4347_v7 = vshll.u32 %v7272_v40, 16  ;;  %v4346_v0 = vrot.slane %v4344_v32, 4  ;;  %v7297_v40 = vld [vmem:[%s7868_s23 + $0x88] sm:$0xf] }
 0x1eb   : > { %4885 = vmatpush.bf16.xpose.msra.mxu2 %v4839_v1  ;;  %v4802_v63 = vpack.c.b16 %v4781_v46, %v4780_v57  ;;  %v5246_v28 = vsel %vm7936_vm6, %v5244_v56, %v5245_v14  ;;  %v5418_v18 = vsel %vm426_vm0, %v5373_v33, 0  ;;  %v4353_v27 = vshll.u32 %v7273_v31, 16  ;;  %v7615_v62 = vld [vmem:[%s10842_s1 + $0x168] sm:$0xff]  ;;  %v7384_v33 = vld [vmem:[%s7868_s23 + $0x24] sm:$0xe] }
 0x1ec   : > { %v2337_v17 = vpop.f32.mrf.mxu3  ;;  %v5360_v3 = vunpack.c.l.b16 %v5246_v28  ;;  %v4349_v41 = vrot.slane %v4347_v7, 5  ;;  %5464 = vmatpush.bf16.xpose.msra.mxu0 %v5418_v18  ;;  %v4357_v2 = vshrl.u32 %v7273_v31, 16  ;;  %v4363_v57 = vshll.u32 %v7274_v19, 16  ;;  %v7298_v1 = vld [vmem:[%s7868_s23 + $0x8c] sm:$0x1] }
 0x1ed   : > { %v9278_v53 = vadd.f32 %v2337_v17, %v8802_v16  ;;  %v9280_v4 = vpop.f32.mrf.mxu0  ;;  %v4863_v52 = vsel %vm426_vm0, %v4802_v63, 0  ;;  %v4536_v46 = vshrl.u32 %v7296_v45, 16  ;;  %v4355_v17 = vrot.slane %v4353_v27, 5  ;;  %v7385_v19 = vld [vmem:[%s7868_s23 + $0x28] sm:$0xf] }
 0x1ee   : > { %4934 = vmatpush.bf16.xpose.msra.mxu3 %v4863_v52  ;;  %v5381_v56 = vpack.c.b16 %v5360_v3, %v5359_v6  ;;  %v4350_v32 = vor.u32 %v4349_v41, %v4346_v0  ;;  %v4359_v7 = vrot.slane %v4357_v2, 4  ;;  %v4365_v63 = vrot.slane %v4363_v57, 5  ;;  %v7386_v2 = vld [vmem:[%s7868_s23 + $0x2c] sm:$0x1] }
 0x1ef   : > { %v9285_v22 = vpop.f32.mrf.mxu1  ;;  %v2290_v16 = vpop.f32.mrf.mxu2  ;;  %v4538_v31 = vrot.slane %v4536_v46, 4  ;;  %v4539_v28 = vshll.u32 %v7296_v45, 16  ;;  %v4549_v15 = vshrl.u32 %v7297_v40, 16  ;;  %v4555_v6 = vshll.u32 %v7298_v1, 16  ;;  %v7639_v45 = vld [vmem:[%s10842_s1 + $0x1a8] sm:$0xff] }
 0x1f0   : > { %v9290_v14 = vadd.f32 %v2290_v16, %v8812_v26  ;;  %v5442_v18 = vsel %vm426_vm0, %v5381_v56, 0  ;;  %v4351_v26 = vrot.slane %v4350_v32, 4  ;;  %v4545_v16 = vshll.u32 %v7297_v40, 16 }
 0x1f1   : > { %5513 = vmatpush.bf16.xpose.msra.mxu1 %v5442_v18  ;;  %v4360_v55 = vor.u32 %v4359_v7, %v4355_v17  ;;  %v4541_v58 = vrot.slane %v4539_v28, 5  ;;  %v7430_v0 = vrot.slane %v7384_v33, 9  ;;  %v4551_v52 = vrot.slane %v4549_v15, 4  ;;  %v7408_v33 = vld [vmem:[%s7868_s23 + $0x84] sm:$0xe] }
 0x1f2   : > { %v4356_v41 = vsel %vm7926_vm3, %v4351_v26, %v4355_v17  ;;  %v4547_v27 = vrot.slane %v4545_v16, 5  ;;  %v5179_v57 = vrot.slane %v7385_v19, 5  ;;  %v4557_v28 = vrot.slane %v4555_v6, 5  ;;  %v7409_v26 = vld [vmem:[%s7868_s23 + $0x88] sm:$0xf] }
 0x1f3   : > { %v4361_v56 = vrot.slane %v4360_v55, 4  ;;  %v4762_v32 = vunpack.c.l.b16 %v4356_v41  ;;  %v4542_v1 = vor.u32 %v4541_v58, %v4538_v31  ;;  %v7410_v16 = vld [vmem:[%s7868_s23 + $0x8c] sm:$0x1] }
 0x1f4   : > { %v2339_v3 = vpop.f32.mrf.mxu3  ;;  %7098 = vmatmul.msk.bf16.gmra.mxu2 %vm426_vm0, %v7615_v62  ;;  %v4552_v7 = vor.u32 %v4551_v52, %v4547_v27  ;;  %v5180_v18 = vsel %vm7936_vm6, %v7430_v0, %v5179_v57  ;;  %v5181_v17 = vrot.slane %v5179_v57, 4  ;;  %v7438_v0 = vrot.slane %v7408_v33, 9  ;;  %v7269_v33 = vld [vmem:[%s7868_s23 + $0x18] sm:$0xf] }
 0x1f5   : > { %v9307_v40 = vadd.f32 %v2339_v3, %v8821_v5  ;;  %v9309_v46 = vpop.f32.mrf.mxu0  ;;  %v4366_v5 = vsel %vm7926_vm3, %v4361_v56, %v4365_v63  ;;  %v4543_v3 = vrot.slane %v4542_v1, 4  ;;  %v5341_v55 = vunpack.c.l.b16 %v5180_v18  ;;  %v7270_v18 = vld [vmem:[%s7868_s23 + $0x1c] sm:$0xf] }
 0x1f6   : > { %10889 = vst [vmem:[#allocation19_spill] sm:$0xff] %v9309_v46  ;;  %v5182_v46 = vrot.slane %v7386_v2, 5  ;;  %v4763_v31 = vunpack.c.l.b16 %v4366_v5  ;;  %v4553_v6 = vrot.slane %v4552_v7, 4  ;;  %v5235_v52 = vrot.slane %v7409_v26, 5  ;;  %v7293_v5 = vld [vmem:[%s7868_s23 + $0x78] sm:$0xf] }
 0x1f7   : > { %v9316_v15 = vpop.f32.mrf.mxu1  ;;  %v2293_v19 = vpop.f32.mrf.mxu2  ;;  %v4548_v41 = vsel %vm7926_vm3, %v4543_v3, %v4547_v27  ;;  %v5238_v2 = vrot.slane %v7410_v16, 5 }
 0x1f8   : > { %10890 = vst [vmem:[#allocation20_spill] sm:$0xff] %v9316_v15  ;;  %7258 = vmatmul.msk.bf16.gmra.mxu0 %vm426_vm0, %v7639_v45  ;;  %v9322_v58 = vadd.f32 %v2293_v19, %v8832_v39  ;;  %v5183_v63 = vsel %vm7936_vm6, %v5181_v17, %v5182_v46  ;;  %v4793_v57 = vpack.c.b16 %v4763_v31, %v4762_v32  ;;  %v4778_v56 = vunpack.c.l.b16 %v4548_v41  ;;  %v7271_v32 = vld [vmem:[%s7868_s23 + $0x20] sm:$0x1] }
 0x1f9   : > { %7106 = vmatmul.msk.bf16.gmra.mxu3 %vm426_vm0, %v7615_v62  ;;  %v4558_v39 = vsel %vm7926_vm3, %v4553_v6, %v4557_v28  ;;  %v5342_v1 = vunpack.c.l.b16 %v5183_v63  ;;  %v5236_v27 = vsel %vm7936_vm6, %v7438_v0, %v5235_v52  ;;  %v5237_v7 = vrot.slane %v5235_v52, 4 }
 0x1fa   : > { %7266 = vmatmul.msk.bf16.gmra.mxu1 %vm426_vm0, %v7639_v45  ;;  %v4779_v62 = vunpack.c.l.b16 %v4558_v39  ;;  %v4320_v46 = vshrl.u32 %v7269_v33, 16  ;;  %v4836_v26 = vsel %vm426_vm0, %v4793_v57, 0  ;;  %v5357_v45 = vunpack.c.l.b16 %v5236_v27 }
 0x1fb   : > { %v5372_v16 = vpack.c.b16 %v5342_v1, %v5341_v55  ;;  %v4323_v19 = vshll.u32 %v7269_v33, 16  ;;  %4886 = vmatpush.bf16.xpose.msra.mxu2 %v4836_v26  ;;  %v5239_v6 = vsel %vm7936_vm6, %v5237_v7, %v5238_v2  ;;  %v4329_v52 = vshll.u32 %v7270_v18, 16  ;;  %v7294_v33 = vld [vmem:[%s7868_s23 + $0x7c] sm:$0xf]  ;;  %v10894_v2 = vld [vmem:[#allocation3_spill] sm:$0xff]  ;;  %v7616_v7 = vld [vmem:[%s10842_s1 + $0x170] sm:$0xff] }
 0x1fc   : > { %v2342_v17 = vpop.f32.mrf.mxu3  ;;  %v4801_v31 = vpack.c.b16 %v4779_v62, %v4778_v56  ;;  %v4322_v0 = vrot.slane %v4320_v46, 4  ;;  %v5358_v63 = vunpack.c.l.b16 %v5239_v6  ;;  %v4333_v1 = vshrl.u32 %v7270_v18, 16 }
 0x1fd   : > { %v9340_v28 = vadd.f32 %v2342_v17, %v8846_v11  ;;  %v9342_v3 = vpop.f32.mrf.mxu0  ;;  %v5415_v41 = vsel %vm426_vm0, %v5372_v16, 0  ;;  %v4325_v55 = vrot.slane %v4323_v19, 5  ;;  %v4339_v56 = vshll.u32 %v7271_v32, 16  ;;  %v7295_v16 = vld [vmem:[%s7868_s23 + $0x80] sm:$0x1] }
 0x1fe   : > { %10892 = vst [vmem:[#allocation22_spill] sm:$0xff] %v9342_v3  ;;  %v4860_v39 = vsel %vm426_vm0, %v4801_v31, 0  ;;  %5465 = vmatpush.bf16.xpose.msra.mxu0 %v5415_v41  ;;  %v4512_v62 = vshrl.u32 %v7293_v5, 16  ;;  %v5380_v46 = vpack.c.b16 %v5358_v63, %v5357_v45  ;;  %v4331_v26 = vrot.slane %v4329_v52, 5  ;;  %v7381_v19 = vld [vmem:[%s7868_s23 + $0x18] sm:$0xe] }
 0x1ff   : > { %10891 = vst [vmem:[#allocation21_spill] sm:$0xff] %v9340_v28  ;;  %v9347_v57 = vpop.f32.mrf.mxu1  ;;  %v2295_v11 = vpop.f32.mrf.mxu2  ;;  %4935 = vmatpush.bf16.xpose.msra.mxu3 %v4860_v39  ;;  %v4326_v17 = vor.u32 %v4325_v55, %v4322_v0  ;;  %v4335_v31 = vrot.slane %v4333_v1, 4  ;;  %v4341_v6 = vrot.slane %v4339_v56, 5  ;;  %v4515_v41 = vshll.u32 %v7293_v5, 16  ;;  %v7382_v32 = vld [vmem:[%s7868_s23 + $0x1c] sm:$0xf] }
 0x200   : > { %10893 = vst [vmem:[#allocation23_spill] sm:$0xff] %v9347_v57  ;;  %v9352_v27 = vadd.f32 %v2295_v11, %v10894_v2  ;;  %v4514_v18 = vrot.slane %v4512_v62, 4  ;;  %v5439_v57 = vsel %vm426_vm0, %v5380_v46, 0  ;;  %v4521_v2 = vshll.u32 %v7294_v33, 16  ;;  %v7640_v5 = vld [vmem:[%s10842_s1 + $0x1b0] sm:$0xff]  ;;  %v10896_v56 = vld [vmem:[#allocation4_spill] sm:$0xff] }
 0x201   : > { %v4327_v11 = vrot.slane %v4326_v17, 4  ;;  %v4525_v3 = vshrl.u32 %v7294_v33, 16  ;;  %5514 = vmatpush.bf16.xpose.msra.mxu1 %v5439_v57  ;;  %v4517_v15 = vrot.slane %v4515_v41, 5  ;;  %v4531_v45 = vshll.u32 %v7295_v16, 16  ;;  %v7383_v57 = vld [vmem:[%s7868_s23 + $0x20] sm:$0x1] }
 0x202   : > { %10895 = vst [vmem:[#allocation3_spill] sm:$0xff] %v9352_v27  ;;  %v4336_v27 = vor.u32 %v4335_v31, %v4331_v26  ;;  %v7429_v0 = vrot.slane %v7381_v19, 9  ;;  %v4523_v52 = vrot.slane %v4521_v2, 5  ;;  %v5172_v1 = vrot.slane %v7382_v32, 5  ;;  %v7405_v19 = vld [vmem:[%s7868_s23 + $0x78] sm:$0xe] }
 0x203   : > { %v4332_v55 = vsel %vm7926_vm3, %v4327_v11, %v4331_v26  ;;  %v4527_v39 = vrot.slane %v4525_v3, 4  ;;  %v4518_v16 = vor.u32 %v4517_v15, %v4514_v18  ;;  %v4533_v41 = vrot.slane %v4531_v45, 5  ;;  %v7406_v11 = vld [vmem:[%s7868_s23 + $0x7c] sm:$0xf]  ;;  %v7407_v2 = vld [vmem:[%s7868_s23 + $0x80] sm:$0x1] }
 0x204   : > { %v2344_v63 = vpop.f32.mrf.mxu3  ;;  %7099 = vmatmul.msk.bf16.gmra.mxu2 %vm426_vm0, %v7616_v7  ;;  %v4337_v46 = vrot.slane %v4336_v27, 4  ;;  %v4760_v17 = vunpack.c.l.b16 %v4332_v55  ;;  %v5173_v28 = vsel %vm7936_vm6, %v7429_v0, %v5172_v1  ;;  %v5174_v26 = vrot.slane %v5172_v1, 4  ;;  %v10898_v15 = vld [vmem:[#allocation5_spill] sm:$0xff] }
 0x205   : > { %v9369_v33 = vadd.f32 %v2344_v63, %v10896_v56  ;;  %v9371_v62 = vpop.f32.mrf.mxu0  ;;  %v4528_v31 = vor.u32 %v4527_v39, %v4523_v52  ;;  %v4519_v56 = vrot.slane %v4518_v16, 4  ;;  %v5339_v27 = vunpack.c.l.b16 %v5173_v28 }
 0x206   : > { %10897 = vst [vmem:[#allocation4_spill] sm:$0xff] %v9371_v62  ;;  %v4342_v63 = vsel %vm7926_vm3, %v4337_v46, %v4341_v6  ;;  %v5175_v62 = vrot.slane %v7383_v57, 5  ;;  %v7437_v0 = vrot.slane %v7405_v19, 9  ;;  %v5228_v6 = vrot.slane %v7406_v11, 5 }
 0x207   : > { %v9378_v3 = vpop.f32.mrf.mxu1  ;;  %v2298_v32 = vpop.f32.mrf.mxu2  ;;  %v4761_v45 = vunpack.c.l.b16 %v4342_v63  ;;  %v4529_v55 = vrot.slane %v4528_v31, 4  ;;  %v4524_v39 = vsel %vm7926_vm3, %v4519_v56, %v4523_v52  ;;  %v5231_v46 = vrot.slane %v7407_v2, 5 }
 0x208   : > { %7259 = vmatmul.msk.bf16.gmra.mxu0 %vm426_vm0, %v7640_v5  ;;  %v9384_v18 = vadd.f32 %v2298_v32, %v10898_v15  ;;  %v5176_v1 = vsel %vm7936_vm6, %v5174_v26, %v5175_v62  ;;  %v4776_v16 = vunpack.c.l.b16 %v4524_v39  ;;  %v5230_v19 = vrot.slane %v5228_v6, 4  ;;  %v10899_v26 = vld [vmem:[#allocation6_spill] sm:$0xff] }
 0x209   : > { %7107 = vmatmul.msk.bf16.gmra.mxu3 %vm426_vm0, %v7616_v7  ;;  %v4792_v28 = vpack.c.b16 %v4761_v45, %v4760_v17  ;;  %v4534_v57 = vsel %vm7926_vm3, %v4529_v55, %v4533_v41  ;;  %v5340_v32 = vunpack.c.l.b16 %v5176_v1  ;;  %v5229_v7 = vsel %vm7936_vm6, %v7437_v0, %v5228_v6  ;;  %v10900_v0 = vld [vmem:[#allocation7_spill] sm:$0xff] }
 0x20a   : > { %7267 = vmatmul.msk.bf16.gmra.mxu1 %vm426_vm0, %v7640_v5  ;;  %v4777_v31 = vunpack.c.l.b16 %v4534_v57  ;;  %v5355_v62 = vunpack.c.l.b16 %v5229_v7  ;;  %v5232_v17 = vsel %vm7936_vm6, %v5230_v19, %v5231_v46  ;;  %v9420_v6 = vadd.f32 %v9152_v12, %v9162_v25 }
 0x20b   : > { %v4833_v52 = vsel %vm426_vm0, %v4792_v28, 0  ;;  %v5371_v56 = vpack.c.b16 %v5340_v32, %v5339_v27  ;;  %v5356_v2 = vunpack.c.l.b16 %v5232_v17  ;;  %v9410_v27 = vadd.f32 %v9120_v42, %v9150_v37  ;;  %v7641_v28 = vld [vmem:[%s10842_s1 + $0x1b8] sm:$0xff] }
 0x20c   : > { %v2347_v63 = vpop.f32.mrf.mxu3  ;;  %4887 = vmatpush.bf16.xpose.msra.mxu2 %v4833_v52  ;;  %v4800_v61 = vpack.c.b16 %v4777_v31, %v4776_v16  ;;  %v9424_v46 = vadd.f32 %v9158_v8, %v9180_v49  ;;  %v9433_v57 = vadd.f32 %v9182_v47, %v9194_v51  ;;  %v9437_v12 = vadd.f32 %v9188_v23, %v9216_v43 }
 0x20d   : > { %v9398_v11 = vadd.f32 %v2347_v63, %v10899_v26  ;;  %v9400_v5 = vpop.f32.mrf.mxu0  ;;  %v5412_v41 = vsel %vm426_vm0, %v5371_v56, 0  ;;  %v5379_v1 = vpack.c.b16 %v5356_v2, %v5355_v62  ;;  %v9454_v23 = vadd.f32 %v9218_v35, %v9228_v29  ;;  %v5662_v56 = vld [vmem:[%s10843_s2 + $0x8] sm:$0xff] }
 0x20e   : > { %v4857_v55 = vsel %vm426_vm0, %v4800_v61, 0  ;;  %5466 = vmatpush.bf16.xpose.msra.mxu0 %v5412_v41  ;;  %v7823_v31 = vmov 0   ;;  %v9482_v19 = vadd.f32 %v9247_v13, %v9260_v59  ;;  %v9486_v63 = vadd.f32 %v9254_v50, %v9278_v53 }
 0x20f   : > { %v9405_v15 = vpop.f32.mrf.mxu1  ;;  %v2300_v45 = vpop.f32.mrf.mxu2  ;;  %4936 = vmatpush.bf16.xpose.msra.mxu3 %v4857_v55  ;;  %v5436_v42 = vsel %vm426_vm0, %v5379_v1, 0  ;;  %7684 = vset.pattern.permute.xlu0 %v7823_v31  ;;  %v9506_v50 = vadd.f32 %v9280_v4, %v9290_v14  ;;  %v9510_v59 = vadd.f32 %v9285_v22, %v9307_v40  ;;  %v3194_v17 = vadd.f32 %v9016_v36, %v9027_v38  ;;  %v10901_v22 = vld [vmem:[#allocation8_spill] sm:$0xff]  ;;  %v10902_v38 = vld [vmem:[#allocation19_spill] sm:$0xff]  ;;  %v10903_v55 = vld [vmem:[#allocation21_spill] sm:$0xff] }
 0x210   : > { %v9413_v39 = vadd.f32 %v2300_v45, %v10900_v0  ;;  %5515 = vmatpush.bf16.xpose.msra.mxu1 %v5436_v42  ;;  %7685 = vset.pattern.permute.xlu1 %v7823_v31  ;;  %v3195_v40 = vadd.f32 %v10901_v22, %v9044_v30  ;;  %v7651_v36 = vld [vmem:[%s10842_s1 + $0x208] sm:$0xff]  ;;  %v9537_v45 = vadd.f32 %v10902_v38, %v9322_v58  ;;  %v5664_v30 = vld [vmem:[%s10843_s2 + $0x18] sm:$0xff]  ;;  %v10912_v22 = vld [vmem:[#allocation15_spill] sm:$0xff] }
 0x211   : > { %7686 = vset.pattern.permute.xlu2 %v7823_v31  ;;  %v10904_v0 = vld [vmem:[#allocation20_spill] sm:$0xff] }
 0x212   : > { %v10907_v31 = vld [vmem:[#allocation12_spill] sm:$0xff] }
 0x214   : > { %v2349_v37 = vpop.f32.mrf.mxu3  ;;  %7100 = vmatmul.msk.bf16.gmra.mxu2 %vm426_vm0, %v7617_v10 }
 0x215   : > { %v9440_v8 = vadd.f32 %v2349_v37, %v9001_v24  ;;  %v9442_v25 = vpop.f32.mrf.mxu0  ;;  %v9458_v24 = vadd.f32 %v9223_v54, %v9245_v44  ;;  %v7650_v44 = vld [vmem:[%s10842_s1 + $0x200] sm:$0xff] }
 0x216   : > { %v10905_v37 = vld [vmem:[#allocation11_spill] sm:$0xff] }
 0x217   : > { %v9444_v49 = vpop.f32.mrf.mxu1  ;;  %v2303_v16 = vpop.f32.mrf.mxu2 }
 0x218   : > { %7260 = vmatmul.msk.bf16.gmra.mxu0 %vm426_vm0, %v7641_v28  ;;  %v9448_v32 = vadd.f32 %v2303_v16, %v9005_v21  ;;  %v5661_v21 = vld [vmem:[%s10843_s2] sm:$0xff] }
 0x219   : > { %7108 = vmatmul.msk.bf16.gmra.mxu3 %vm426_vm0, %v7617_v10  ;;  %5667 = vperm.xlu0 %7684, %v5661_v21   ;;  %v9541_v10 = vadd.f32 %v10904_v0, %v10903_v55  ;;  %v7644_v55 = vld [vmem:[%s10842_s1 + $0x1d0] sm:$0xff]  ;;  %v10914_v0 = vld [vmem:[#allocation16_spill] sm:$0xff] }
 0x21a   : > { %7268 = vmatmul.msk.bf16.gmra.mxu1 %vm426_vm0, %v7641_v28  ;;  %v10906_v28 = vld [vmem:[#allocation9_spill] sm:$0xff] }
 0x21b   : > { %v3196_v16 = vadd.f32 %v10906_v28, %v10905_v37  ;;  %v7652_v28 = vld [vmem:[%s10842_s1 + $0x210] sm:$0xff] }
 0x21c   : > { %v2352_v47 = vpop.f32.mrf.mxu3 }
 0x21d   : > { %v9461_v51 = vadd.f32 %v2352_v47, %v9071_v48  ;;  %v9463_v43 = vpop.f32.mrf.mxu0  ;;  %v7642_v48 = vld [vmem:[%s10842_s1 + $0x1c0] sm:$0xff] }
 0x21f   : > { %v9468_v7 = vpop.f32.mrf.mxu1  ;;  %v2305_v35 = vpop.f32.mrf.mxu2 }
 0x220   : > { %v9471_v54 = vadd.f32 %v2305_v35, %v9075_v60  ;;  %v10908_v35 = vld [vmem:[#allocation10_spill] sm:$0xff] }
 0x221   : > { %5672 = vperm.xlu0 %7684, %v5662_v56   ;;  %v10910_v56 = vld [vmem:[#allocation22_spill] sm:$0xff] }
 0x224   : > { %v2354_v29 = vpop.f32.mrf.mxu3  ;;  %7365 = vmatmul.msk.bf16.vlgmr.msra.gmra.mxu2 %vm426_vm0, %v7642_v48 }
 0x225   : > { %v9489_v60 = vadd.f32 %v2354_v29, %v9139_v9  ;;  %v9491_v52 = vpop.f32.mrf.mxu0 }
 0x227   : > { %v9496_v62 = vpop.f32.mrf.mxu1  ;;  %v3650_v26 = vpop.f32.mrf.mxu2 }
 0x228   : > { %7493 = vmatmul.msk.bf16.vlgmr.msra.gmra.mxu0 %vm426_vm0, %v7650_v44  ;;  %v9500_v13 = vadd.f32 %v3650_v26, %v9143_v34  ;;  %v5663_v34 = vld [vmem:[%s10843_s2 + $0x10] sm:$0xff] }
 0x229   : > { %7373 = vmatmul.msk.bf16.vlgmr.msra.gmra.mxu3 %vm426_vm0, %v7642_v48  ;;  %5677 = vperm.xlu1 %7685, %v5663_v34   ;;  %v3197_v48 = vadd.f32 %v10908_v35, %v10907_v31  ;;  %v9594_v31 = vadd.f32 %v9378_v3, %v9398_v11  ;;  %v9615_v11 = vadd.f32 %v9405_v15, %v9440_v8  ;;  %v7645_v15 = vld [vmem:[%s10842_s1 + $0x1d8] sm:$0xff] }
 0x22a   : > { %7501 = vmatmul.msk.bf16.vlgmr.msra.gmra.mxu1 %vm426_vm0, %v7650_v44  ;;  %v10909_v44 = vld [vmem:[#allocation3_spill] sm:$0xff]  ;;  %v9639_v8 = vadd.f32 %v9442_v25, %v9448_v32 }
 0x22b   : > { %v9563_v26 = vadd.f32 %v10910_v56, %v10909_v44  ;;  %v10918_v44 = vld [vmem:[#allocation17_spill] sm:$0xff] }
 0x22c   : > { %v3699_v9 = vpop.f32.mrf.mxu3 }
 0x22d   : > { %v9513_v53 = vadd.f32 %v3699_v9, %v9207_v20  ;;  %v9515_v61 = vpop.f32.mrf.mxu0  ;;  %v7643_v20 = vld [vmem:[%s10842_s1 + $0x1c8] sm:$0xff]  ;;  %v10911_v9 = vld [vmem:[#allocation23_spill] sm:$0xff] }
 0x22e   : > { %v9567_v34 = vadd.f32 %v10911_v9, %v9369_v33 }
 0x22f   : > { %v9522_v41 = vpop.f32.mrf.mxu1  ;;  %v3652_v4 = vpop.f32.mrf.mxu2 }
 0x230   : > { %v9524_v14 = vadd.f32 %v3652_v4, %v3194_v17 }
 0x231   : > { %5682 = vperm.xlu1 %7685, %v5664_v30   ;;  %v10915_v30 = vld [vmem:[#allocation14_spill] sm:$0xff] }
 0x232   : > { %v3199_v33 = vadd.f32 %v10915_v30, %v10914_v0 }
 0x234   : > { %v3701_v2 = vpop.f32.mrf.mxu3  ;;  %7366 = vmatmul.msk.bf16.gmra.mxu2 %vm426_vm0, %v7643_v20 }
 0x235   : > { %v9543_v1 = vadd.f32 %v3701_v2, %v3195_v40  ;;  %v9545_v42 = vpop.f32.mrf.mxu0 }
 0x237   : > { %v9552_v47 = vpop.f32.mrf.mxu1  ;;  %v3655_v58 = vpop.f32.mrf.mxu2 }
 0x238   : > { %7494 = vmatmul.msk.bf16.gmra.mxu0 %vm426_vm0, %v7651_v36  ;;  %v9555_v21 = vadd.f32 %v3655_v58, %v3196_v16  ;;  %v10916_v16 = vld [vmem:[#allocation4_spill] sm:$0xff] }
 0x239   : > { %7374 = vmatmul.msk.bf16.gmra.mxu3 %vm426_vm0, %v7643_v20  ;;  %v10913_v20 = vld [vmem:[#allocation13_spill] sm:$0xff]  ;;  %v9590_v58 = vadd.f32 %v10916_v16, %v9384_v18  ;;  %v9611_v18 = vadd.f32 %v9400_v5, %v9413_v39  ;;  %v5704_v16 = vld [vmem:[%s10843_s2 + $0x38] sm:$0xff] }
 0x23a   : > { %7502 = vmatmul.msk.bf16.gmra.mxu1 %vm426_vm0, %v7651_v36  ;;  %v3198_v40 = vadd.f32 %v10913_v20, %v10912_v22  ;;  %5722 = vperm.xlu1 %7685, %v5704_v16  }
 0x23c   : > { %v3704_v29 = vpop.f32.mrf.mxu3 }
 0x23d   : > { %v9569_v17 = vadd.f32 %v3704_v29, %v3197_v48  ;;  %v9571_v4 = vpop.f32.mrf.mxu0  ;;  %v10917_v29 = vld [vmem:[#allocation18_spill] sm:$0xff] }
 0x23e   : > { %v3200_v56 = vadd.f32 %v10918_v44, %v10917_v29  ;;  %v9670_v29 = vadd.f32 %v9468_v7, %v9489_v60 }
 0x23f   : > { %v9575_v2 = vpop.f32.mrf.mxu1  ;;  %v3657_v36 = vpop.f32.mrf.mxu2 }
 0x240   : > { %v9577_v38 = vadd.f32 %v3657_v36, %v3198_v40 }
 0x244   : > { %v3706_v37 = vpop.f32.mrf.mxu3  ;;  %7367 = vmatmul.msk.bf16.gmra.mxu2 %vm426_vm0, %v7644_v55 }
 0x245   : > { %v9596_v35 = vadd.f32 %v3706_v37, %v3199_v33  ;;  %v9598_v48 = vpop.f32.mrf.mxu0  ;;  %v9643_v33 = vadd.f32 %v9444_v49, %v9461_v51  ;;  %v9666_v51 = vadd.f32 %v9463_v43, %v9471_v54 }
 0x247   : > { %v9602_v9 = vpop.f32.mrf.mxu1  ;;  %v3660_v22 = vpop.f32.mrf.mxu2 }
 0x248   : > { %7495 = vmatmul.msk.bf16.gmra.mxu0 %vm426_vm0, %v7652_v28  ;;  %v9605_v20 = vadd.f32 %v3660_v22, %v3200_v56  ;;  %v6126_v22 = vld [vmem:[%s10843_s2 + $0x48] sm:$0xff] }
 0x249   : > { %7375 = vmatmul.msk.bf16.gmra.mxu3 %vm426_vm0, %v7644_v55  ;;  %v5703_v55 = vld [vmem:[%s10843_s2 + $0x30] sm:$0xff] }
 0x24a   : > { %7503 = vmatmul.msk.bf16.gmra.mxu1 %vm426_vm0, %v7652_v28  ;;  %5717 = vperm.xlu0 %7684, %v5703_v55   ;;  %v5701_v28 = vld [vmem:[%s10843_s2 + $0x20] sm:$0xff]  ;;  %v9697_v55 = vadd.f32 %v9491_v52, %v9500_v13  ;;  %v6127_v52 = vld [vmem:[%s10843_s2 + $0x50] sm:$0xff]  ;;  %v9724_v13 = vadd.f32 %v9515_v61, %v9524_v14  ;;  %v5742_v61 = vld [vmem:[%s10843_s2 + $0x68] sm:$0xff] }
 0x24b   : > { %5707 = vperm.xlu2 %7686, %v5701_v28   ;;  %6141 = vperm.xlu1 %7685, %v6127_v52  }
 0x24c   : > { %v3709_v3 = vpop.f32.mrf.mxu3 }
 0x24d   : > { %v9618_v40 = vadd.f32 %v3709_v3, %v9410_v27  ;;  %v9620_v36 = vpop.f32.mrf.mxu0  ;;  %v7653_v27 = vld [vmem:[%s10842_s1 + $0x218] sm:$0xff]  ;;  %v7654_v3 = vld [vmem:[%s10842_s1 + $0x220] sm:$0xff] }
 0x24f   : > { %v9625_v0 = vpop.f32.mrf.mxu1  ;;  %v3662_v30 = vpop.f32.mrf.mxu2 }
 0x250   : > { %v9628_v5 = vadd.f32 %v3662_v30, %v9420_v6  ;;  %v9701_v30 = vadd.f32 %v9496_v62, %v9513_v53  ;;  %v9728_v53 = vadd.f32 %v9522_v41, %v9543_v1  ;;  %v7655_v1 = vld [vmem:[%s10842_s1 + $0x228] sm:$0xff] }
 0x252   : > { %6136 = vperm.xlu0 %7684, %v6126_v22   ;;  %v9755_v22 = vadd.f32 %v9545_v42, %v9555_v21  ;;  %v9783_v21 = vadd.f32 %v9575_v2, %v9596_v35 }
 0x253   : > { %5752 = vperm.xlu1 %7685, %v5742_v61  }
 0x254   : > { %v3711_v39 = vpop.f32.mrf.mxu3  ;;  %7368 = vmatmul.msk.bf16.gmra.mxu2 %vm426_vm0, %v7645_v15 }
 0x255   : > { %v9646_v6 = vadd.f32 %v3711_v39, %v9424_v46  ;;  %v9648_v37 = vpop.f32.mrf.mxu0  ;;  %v5741_v39 = vld [vmem:[%s10843_s2 + $0x60] sm:$0xff] }
 0x257   : > { %v9656_v25 = vpop.f32.mrf.mxu1  ;;  %v3665_v32 = vpop.f32.mrf.mxu2 }
 0x258   : > { %7496 = vmatmul.msk.bf16.gmra.mxu0 %vm426_vm0, %v7653_v27  ;;  %v9660_v46 = vadd.f32 %v3665_v32, %v9433_v57  ;;  %v5702_v57 = vld [vmem:[%s10843_s2 + $0x28] sm:$0xff] }
 0x259   : > { %7376 = vmatmul.msk.bf16.gmra.mxu3 %vm426_vm0, %v7645_v15  ;;  %5712 = vperm.xlu2 %7686, %v5702_v57  }
 0x25a   : > { %7504 = vmatmul.msk.bf16.gmra.mxu1 %vm426_vm0, %v7653_v27  ;;  %5747 = vperm.xlu0 %7684, %v5741_v39  }
 0x25c   : > { %v3714_v49 = vpop.f32.mrf.mxu3 }
 0x25d   : > { %v9673_v44 = vadd.f32 %v3714_v49, %v9437_v12  ;;  %v9675_v56 = vpop.f32.mrf.mxu0  ;;  %v7646_v12 = vld [vmem:[%s10842_s1 + $0x1e0] sm:$0xff] }
 0x25f   : > { %v9683_v43 = vpop.f32.mrf.mxu1  ;;  %v3667_v54 = vpop.f32.mrf.mxu2 }
 0x260   : > { %v9686_v7 = vadd.f32 %v3667_v54, %v9454_v23 }
 0x264   : > { %v3716_v60 = vpop.f32.mrf.mxu3  ;;  %7369 = vmatmul.msk.bf16.gmra.mxu2 %vm426_vm0, %v7646_v12 }
 0x265   : > { %v9704_v23 = vadd.f32 %v3716_v60, %v9458_v24  ;;  %v9706_v15 = vpop.f32.mrf.mxu0  ;;  %v6125_v60 = vld [vmem:[%s10843_s2 + $0x40] sm:$0xff] }
 0x266   : > { %6131 = vperm.xlu2 %7686, %v6125_v60  }
 0x267   : > { %v9711_v27 = vpop.f32.mrf.mxu1  ;;  %v3670_v28 = vpop.f32.mrf.mxu2 }
 0x268   : > { %7497 = vmatmul.msk.bf16.gmra.mxu0 %vm426_vm0, %v7654_v3  ;;  %v9718_v62 = vadd.f32 %v3670_v28, %v9482_v19  ;;  %v5744_v19 = vld [vmem:[%s10843_s2 + $0x78] sm:$0xff] }
 0x269   : > { %7377 = vmatmul.msk.bf16.gmra.mxu3 %vm426_vm0, %v7646_v12  ;;  %5762 = vperm.xlu0 %7684, %v5744_v19  }
 0x26a   : > { %7505 = vmatmul.msk.bf16.gmra.mxu1 %vm426_vm0, %v7654_v3 }
 0x26c   : > { %v3719_v24 = vpop.f32.mrf.mxu3 }
 0x26d   : > { %v9731_v16 = vadd.f32 %v3719_v24, %v9486_v63  ;;  %v9733_v32 = vpop.f32.mrf.mxu0  ;;  %v7647_v63 = vld [vmem:[%s10842_s1 + $0x1e8] sm:$0xff]  ;;  %v6128_v24 = vld [vmem:[%s10843_s2 + $0x58] sm:$0xff] }
 0x26e   : > { %6146 = vperm.xlu2 %7686, %v6128_v24  }
 0x26f   : > { %v9738_v49 = vpop.f32.mrf.mxu1  ;;  %v3672_v57 = vpop.f32.mrf.mxu2 }
 0x270   : > { %v9744_v41 = vadd.f32 %v3672_v57, %v9506_v50  ;;  %v9759_v50 = vadd.f32 %v9552_v47, %v9569_v17  ;;  %v9779_v47 = vadd.f32 %v9571_v4, %v9577_v38  ;;  %v7648_v4 = vld [vmem:[%s10842_s1 + $0x1f0] sm:$0xff]  ;;  %v9807_v38 = vadd.f32 %v9598_v48, %v9605_v20 }
 0x271   : > { %v9835_v20 = vadd.f32 %v9625_v0, %v9646_v6  ;;  %v9856_v0 = vadd.f32 %v9648_v37, %v9660_v46  ;;  %v9860_v6 = vadd.f32 %v9656_v25, %v9673_v44  ;;  %v9877_v25 = vadd.f32 %v9675_v56, %v9686_v7 }
 0x272   : > { %v9895_v56 = vadd.f32 %v9706_v15, %v9718_v62 }
 0x274   : > { %v3721_v14 = vpop.f32.mrf.mxu3  ;;  %7370 = vmatmul.msk.bf16.gmra.mxu2 %vm426_vm0, %v7647_v63 }
 0x275   : > { %v9762_v54 = vadd.f32 %v3721_v14, %v9510_v59  ;;  %v9764_v12 = vpop.f32.mrf.mxu0  ;;  %v5743_v14 = vld [vmem:[%s10843_s2 + $0x70] sm:$0xff] }
 0x276   : > { %5757 = vperm.xlu2 %7686, %v5743_v14  }
 0x277   : > { %v9769_v3 = vpop.f32.mrf.mxu1  ;;  %v3675_v39 = vpop.f32.mrf.mxu2  ;;  %v9911_v15 = vadd.f32 %v9738_v49, %v9762_v54 }
 0x278   : > { %7498 = vmatmul.msk.bf16.gmra.mxu0 %vm426_vm0, %v7655_v1  ;;  %v9773_v42 = vadd.f32 %v3675_v39, %v9537_v45 }
 0x279   : > { %7378 = vmatmul.msk.bf16.gmra.mxu3 %vm426_vm0, %v7647_v63 }
 0x27a   : > { %7506 = vmatmul.msk.bf16.gmra.mxu1 %vm426_vm0, %v7655_v1 }
 0x27c   : > { %v3724_v59 = vpop.f32.mrf.mxu3 }
 0x27d   : > { %v9786_v17 = vadd.f32 %v3724_v59, %v9541_v10  ;;  %v9788_v28 = vpop.f32.mrf.mxu0  ;;  %v7656_v10 = vld [vmem:[%s10842_s1 + $0x230] sm:$0xff] }
 0x27f   : > { %v9790_v45 = vpop.f32.mrf.mxu1  ;;  %v3677_v52 = vpop.f32.mrf.mxu2 }
 0x280   : > { %v9796_v19 = vadd.f32 %v3677_v52, %v9563_v26  ;;  %v9811_v26 = vadd.f32 %v9602_v9, %v9618_v40  ;;  %v9831_v9 = vadd.f32 %v9620_v36, %v9628_v5  ;;  %v7649_v36 = vld [vmem:[%s10842_s1 + $0x1f8] sm:$0xff] }
 0x284   : > { %v3726_v2 = vpop.f32.mrf.mxu3  ;;  %7371 = vmatmul.msk.bf16.gmra.mxu2 %vm426_vm0, %v7648_v4 }
 0x285   : > { %v9814_v35 = vadd.f32 %v3726_v2, %v9567_v34  ;;  %v9816_v57 = vpop.f32.mrf.mxu0 }
 0x287   : > { %v9818_v61 = vpop.f32.mrf.mxu1  ;;  %v3680_v63 = vpop.f32.mrf.mxu2 }
 0x288   : > { %7499 = vmatmul.msk.bf16.gmra.mxu0 %vm426_vm0, %v7656_v10  ;;  %v9825_v48 = vadd.f32 %v3680_v63, %v9590_v58 }
 0x289   : > { %7379 = vmatmul.msk.bf16.gmra.mxu3 %vm426_vm0, %v7648_v4 }
 0x28a   : > { %7507 = vmatmul.msk.bf16.gmra.mxu1 %vm426_vm0, %v7656_v10 }
 0x28c   : > { %v3729_v34 = vpop.f32.mrf.mxu3 }
 0x28d   : > { %v9838_v40 = vadd.f32 %v3729_v34, %v9594_v31  ;;  %v9840_v1 = vpop.f32.mrf.mxu0  ;;  %v7657_v31 = vld [vmem:[%s10842_s1 + $0x238] sm:$0xff] }
 0x28f   : > { %v9842_v58 = vpop.f32.mrf.mxu1  ;;  %v3682_v60 = vpop.f32.mrf.mxu2 }
 0x290   : > { %v9845_v39 = vadd.f32 %v3682_v60, %v9611_v18 }
 0x294   : > { %v3731_v5 = vpop.f32.mrf.mxu3  ;;  %7372 = vmatmul.msk.bf16.gmra.mxu2 %vm426_vm0, %v7649_v36 }
 0x295   : > { %v9863_v18 = vadd.f32 %v3731_v5, %v9615_v11  ;;  %v9865_v59 = vpop.f32.mrf.mxu0  ;;  %v9881_v11 = vadd.f32 %v9683_v43, %v9704_v23  ;;  %v9899_v43 = vadd.f32 %v9711_v27, %v9731_v16 }
 0x297   : > { %v9867_v52 = vpop.f32.mrf.mxu1  ;;  %v3685_v24 = vpop.f32.mrf.mxu2 }
 0x298   : > { %7500 = vmatmul.msk.bf16.gmra.mxu0 %vm426_vm0, %v7657_v31  ;;  %v9871_v4 = vadd.f32 %v3685_v24, %v9639_v8 }
 0x299   : > { %7380 = vmatmul.msk.bf16.gmra.mxu3 %vm426_vm0, %v7649_v36  ;;  %v9907_v36 = vadd.f32 %v9733_v32, %v9744_v41  ;;  %v9921_v32 = vadd.f32 %v9769_v3, %v9786_v17 }
 0x29a   : > { %7508 = vmatmul.msk.bf16.gmra.mxu1 %vm426_vm0, %v7657_v31 }
 0x29c   : > { %v3734_v37 = vpop.f32.mrf.mxu3 }
 0x29d   : > { %v9884_v46 = vadd.f32 %v3734_v37, %v9643_v33  ;;  %v9886_v44 = vpop.f32.mrf.mxu0  ;;  %v9917_v37 = vadd.f32 %v9764_v12, %v9773_v42  ;;  %v9931_v12 = vadd.f32 %v9790_v45, %v9814_v35  ;;  %v9942_v45 = vadd.f32 %v9818_v61, %v9838_v40 }
 0x29f   : > { %v9888_v8 = vpop.f32.mrf.mxu1  ;;  %v3687_v2 = vpop.f32.mrf.mxu2 }
 0x2a0   : > { %10919 = vst [vmem:[#allocation5_spill] sm:$0xff] %v9888_v8  ;;  %v9891_v10 = vadd.f32 %v3687_v2, %v9666_v51 }
 0x2a4   : > { %v3736_v63 = vpop.f32.mrf.mxu3 }
 0x2a5   : > { %v9902_v33 = vadd.f32 %v3736_v63, %v9670_v29  ;;  %v5468_v7 = vpop.f32.mrf.mxu0 }
 0x2a7   : > { %10920 = vst [vmem:[#allocation6_spill] sm:$0xff] %v9902_v33  ;;  %v5517_v23 = vpop.f32.mrf.mxu1  ;;  %v4889_v14 = vpop.f32.mrf.mxu2 }
 0x2a8   : > { %v5010_v34 = vadd.f32 %v4889_v14, %v9697_v55 }
 0x2aa   : > { %v5589_v60 = vadd.f32 %v5468_v7, %v5010_v34 }
 0x2ac   : > { %v4938_v51 = vpop.f32.mrf.mxu3 }
 0x2ad   : > { %v5011_v27 = vadd.f32 %v4938_v51, %v9701_v30  ;;  %v5470_v62 = vpop.f32.mrf.mxu0  ;;  %v5668_v51 = vpop.permute.xlu0 %5667 }
 0x2af   : > { %v5590_v29 = vadd.f32 %v5517_v23, %v5011_v27  ;;  %v5519_v16 = vpop.f32.mrf.mxu1  ;;  %v4891_v5 = vpop.f32.mrf.mxu2  ;;  %v9927_v23 = vadd.f32 %v9788_v28, %v9796_v19 }
 0x2b0   : > { %v5012_v31 = vadd.f32 %v4891_v5, %v9724_v13  ;;  %v5685_v5 = vadd.f32 %v5668_v51, %v5589_v60 }
 0x2b1   : > { %v5686_v61 = vadd.f32 %v5668_v51, %v5590_v29 }
 0x2b2   : > { %v5591_v24 = vadd.f32 %v5470_v62, %v5012_v31  ;;  %v9937_v62 = vadd.f32 %v9816_v57, %v9825_v48  ;;  %v5678_v31 = vpop.permute.xlu1 %5677  ;;  %v9946_v57 = vadd.f32 %v9840_v1, %v9845_v39 }
 0x2b4   : > { %v4940_v55 = vpop.f32.mrf.mxu3 }
 0x2b5   : > { %v5013_v49 = vadd.f32 %v4940_v55, %v9728_v53  ;;  %v5473_v41 = vpop.f32.mrf.mxu0  ;;  %v5673_v55 = vpop.permute.xlu0 %5672 }
 0x2b6   : > { %v5687_v40 = vadd.f32 %v5673_v55, %v5591_v24 }
 0x2b7   : > { %v5592_v30 = vadd.f32 %v5519_v16, %v5013_v49  ;;  %v5522_v54 = vpop.f32.mrf.mxu1  ;;  %v4894_v2 = vpop.f32.mrf.mxu2 }
 0x2b8   : > { %v5014_v63 = vadd.f32 %v4894_v2, %v9755_v22  ;;  %v7511_v39 = vmul.f32 -1.442695, %v5687_v40 }
 0x2ba   : > { %v5593_v7 = vadd.f32 %v5473_v41, %v5014_v63  ;;  %v5688_v63 = vadd.f32 %v5673_v55, %v5592_v30  ;;  %v5683_v1 = vpop.permute.xlu1 %5682 }
 0x2bc   : > { %v4943_v13 = vpop.f32.mrf.mxu3 }
 0x2bd   : > { %v5015_v3 = vadd.f32 %v4943_v13, %v9759_v50  ;;  %v5475_v42 = vpop.f32.mrf.mxu0 }
 0x2bf   : > { %v5594_v53 = vadd.f32 %v5522_v54, %v5015_v3  ;;  %v5524_v17 = vpop.f32.mrf.mxu1  ;;  %v4896_v14 = vpop.f32.mrf.mxu2  ;;  %v7510_v3 = vmul.f32 -1.442695, %v5686_v61 }
 0x2c0   : > { %v5016_v34 = vadd.f32 %v4896_v14, %v9779_v47  ;;  %v7509_v47 = vmul.f32 -1.442695, %v5685_v5  ;;  %v5708_v54 = vpop.permute.xlu2 %5707 }
 0x2c1   : > { %v5690_v14 = vadd.f32 %v5678_v31, %v5594_v53 }
 0x2c2   : > { %v5595_v22 = vadd.f32 %v5475_v42, %v5016_v34  ;;  %7687 = vpow2.f32 %v7509_v47  ;;  %v5689_v42 = vadd.f32 %v5678_v31, %v5593_v7 }
 0x2c3   : > { %7689 = vpow2.f32 %v7510_v3  ;;  %v7514_v7 = vmul.f32 -1.442695, %v5690_v14 }
 0x2c4   : > { %v4945_v27 = vpop.f32.mrf.mxu3  ;;  %v7513_v24 = vmul.f32 -1.442695, %v5689_v42  ;;  %7691 = vpow2.f32 %v7511_v39 }
 0x2c5   : > { %v5017_v28 = vadd.f32 %v4945_v27, %v9783_v21  ;;  %v5478_v19 = vpop.f32.mrf.mxu0  ;;  %v9950_v21 = vadd.f32 %v9842_v58, %v9863_v18  ;;  %v7512_v18 = vmul.f32 -1.442695, %v5688_v63  ;;  %v5691_v27 = vadd.f32 %v5683_v1, %v5595_v22 }
 0x2c7   : > { %v5596_v50 = vadd.f32 %v5524_v17, %v5017_v28  ;;  %v5527_v35 = vpop.f32.mrf.mxu1  ;;  %v4899_v16 = vpop.f32.mrf.mxu2  ;;  %7693 = vpow2.f32 %v7512_v18 }
 0x2c8   : > { %v5018_v60 = vadd.f32 %v4899_v16, %v9807_v38  ;;  %v7688_v51 = vpop.eup %7687  ;;  %v5713_v16 = vpop.permute.xlu2 %5712  ;;  %7695 = vpow2.f32 %v7513_v24 }
 0x2c9   : > { %v5692_v30 = vadd.f32 %v5683_v1, %v5596_v50  ;;  %v7690_v22 = vpop.eup %7689  ;;  %7697 = vpow2.f32 %v7514_v7 }
 0x2ca   : > { %v5597_v34 = vadd.f32 %v5478_v19, %v5018_v60  ;;  %v7515_v19 = vmul.f32 -1.442695, %v5691_v27  ;;  %v7692_v61 = vpop.eup %7691 }
 0x2cb   : > { %v7516_v55 = vmul.f32 -1.442695, %v5692_v30  ;;  %v9962_v42 = vadd.f32 1.0, %v7692_v61 }
 0x2cc   : > { %v4948_v49 = vpop.f32.mrf.mxu3  ;;  %v5725_v5 = vadd.f32 %v5708_v54, %v5597_v34 }
 0x2cd   : > { %v5480_v41 = vpop.f32.mrf.mxu0  ;;  %v5019_v13 = vadd.f32 %v4948_v49, %v9811_v26  ;;  %v7694_v60 = vpop.eup %7693  ;;  %vm5848_vm13 = vweird.f32 %v9962_v42 }
 0x2ce   : > { %v7517_v49 = vmul.f32 -1.442695, %v5725_v5  ;;  %v9965_v39 = vadd.f32 1.0, %v7694_v60 }
 0x2cf   : > { %v4901_v48 = vpop.f32.mrf.mxu2  ;;  %v5529_v2 = vpop.f32.mrf.mxu1  ;;  %v5598_v29 = vadd.f32 %v5527_v35, %v5019_v13 }
 0x2d0   : > { %v5020_v17 = vadd.f32 %v4901_v48, %v9831_v9  ;;  %v9955_v9 = vadd.f32 1.0, %v7688_v51  ;;  %v6132_v61 = vpop.permute.xlu2 %6131 }
 0x2d1   : > { %v5726_v53 = vadd.f32 %v5708_v54, %v5598_v29  ;;  %v9959_v54 = vadd.f32 1.0, %v7690_v22 }
 0x2d2   : > { %v5599_v38 = vadd.f32 %v5480_v41, %v5020_v17  ;;  %7699 = vrcp.f32 %v9955_v9  ;;  %vm5818_vm7 = vweird.f32 %v9955_v9 }
 0x2d3   : > { %v7518_v41 = vmul.f32 -1.442695, %v5726_v53  ;;  %7701 = vpow2.f32 %v7515_v19  ;;  %vm5833_vm9 = vweird.f32 %v9959_v54 }
 0x2d4   : > { %v4950_v58 = vpop.f32.mrf.mxu3  ;;  %v5727_v47 = vadd.f32 %v5713_v16, %v5599_v38  ;;  %7703 = vpow2.f32 %v7516_v55  ;;  %v5718_v38 = vpop.permute.xlu0 %5717 }
 0x2d5   : > { %v5483_v28 = vpop.f32.mrf.mxu0  ;;  %v5021_v35 = vadd.f32 %v4950_v58, %v9835_v20  ;;  %v7696_v20 = vpop.eup %7695  ;;  %7705 = vpow2.f32 %v7517_v49 }
 0x2d6   : > { %v7519_v40 = vmul.f32 -1.442695, %v5727_v47  ;;  %7707 = vpow2.f32 %v7518_v41  ;;  %v7698_v1 = vpop.eup %7697  ;;  %v9970_v34 = vadd.f32 1.0, %v7696_v20  ;;  %v5723_v47 = vpop.permute.xlu1 %5722 }
 0x2d7   : > { %v4904_v26 = vpop.f32.mrf.mxu2  ;;  %v5532_v31 = vpop.f32.mrf.mxu1  ;;  %v5600_v48 = vadd.f32 %v5529_v2, %v5021_v35 }
 0x2d8   : > { %v5022_v13 = vadd.f32 %v4904_v26, %v9856_v0  ;;  %7709 = vpow2.f32 %v7519_v40  ;;  %v9967_v14 = vpop.eup %7699  ;;  %10921 = vst [vmem:[#allocation7_spill] sm:$0xff] %v9970_v34 }
 0x2d9   : > { %v5728_v2 = vadd.f32 %v5713_v16, %v5600_v48  ;;  %7711 = vrcp.f32 %v9959_v54  ;;  %v7702_v0 = vpop.eup %7701  ;;  %vm5819_vm8 = vweird.f32 %v9967_v14 }
 0x2da   : > { %v5601_v18 = vadd.f32 %v5483_v28, %v5022_v13  ;;  %v7704_v24 = vpop.eup %7703  ;;  %7713 = vrcp.f32 %v9962_v42  ;;  %v5814_v13 = vmul.f32 %v9967_v14, %v9955_v9  ;;  %vm10221_vm12 = vmor %vm5818_vm7, %vm5819_vm8 }
 0x2db   : > { %v7706_v30 = vpop.eup %7705  ;;  %7715 = vrcp.f32 %v9965_v39  ;;  %v7520_v16 = vmul.f32 -1.442695, %v5728_v2  ;;  %v9981_v19 = vadd.f32 1.0, %v7704_v24 }
 0x2dc   : > { %v4953_v50 = vpop.f32.mrf.mxu3  ;;  %v7708_v7 = vpop.eup %7707  ;;  %7717 = vrcp.f32 %v9970_v34  ;;  %v5729_v35 = vadd.f32 %v5718_v38, %v5601_v18  ;;  %v9986_v55 = vadd.f32 1.0, %v7706_v30 }
 0x2dd   : > { %v5485_v3 = vpop.f32.mrf.mxu0  ;;  %v5023_v17 = vadd.f32 %v4953_v50, %v9860_v6  ;;  %v9974_v6 = vadd.f32 1.0, %v7698_v1  ;;  %10924 = vst [vmem:[#allocation21_spill] sm:$0xff] %v9981_v19  ;;  %v9989_v49 = vadd.f32 1.0, %v7708_v7 }
 0x2de   : > { %v7710_v53 = vpop.eup %7709  ;;  %vm5970_vm3 = vweird.f32 %v9986_v55 }
 0x2df   : > { %v4906_v63 = vpop.f32.mrf.mxu2  ;;  %v5534_v29 = vpop.f32.mrf.mxu1  ;;  %10922 = vst [vmem:[#allocation8_spill] sm:$0xff] %v9974_v6  ;;  %v5602_v27 = vadd.f32 %v5532_v31, %v5023_v17  ;;  %7719 = vrcp.f32 %v9974_v6  ;;  %v9994_v40 = vadd.f32 1.0, %v7710_v53  ;;  %vm5985_vm8 = vweird.f32 %v9989_v49 }
 0x2e0   : > { %v5024_v58 = vadd.f32 %v4906_v63, %v9877_v25  ;;  %v9979_v25 = vadd.f32 1.0, %v7702_v0  ;;  %v9983_v31 = vpop.eup %7711  ;;  %7721 = vpow2.f32 %v7520_v16 }
 0x2e1   : > { %v5730_v22 = vadd.f32 %v5718_v38, %v5602_v27  ;;  %v9991_v48 = vpop.eup %7713  ;;  %vm5834_vm10 = vweird.f32 %v9983_v31 }
 0x2e2   : > { %10923 = vst [vmem:[#allocation19_spill] sm:$0xff] %v9979_v25  ;;  %v5603_v28 = vadd.f32 %v5485_v3, %v5024_v58  ;;  %7723 = vrcp.f32 %v9979_v25  ;;  %v9996_v20 = vpop.eup %7715  ;;  %v7521_v3 = vmul.f32 -1.442695, %v5729_v35  ;;  %v5844_v18 = vmul.f32 %v9991_v48, %v9962_v42  ;;  %vm10262_vm5 = vmor %vm5833_vm9, %vm5834_vm10 }
 0x2e3   : > { %7725 = vrcp.f32 %v9981_v19  ;;  %v10003_v1 = vpop.eup %7717  ;;  %v7522_v2 = vmul.f32 -1.442695, %v5730_v22  ;;  %v5859_v16 = vmul.f32 %v9996_v20, %v9965_v39  ;;  %vm5849_vm10 = vweird.f32 %v9991_v48 }
 0x2e4   : > { %v4955_v51 = vpop.f32.mrf.mxu3  ;;  %v5731_v60 = vadd.f32 %v5723_v47, %v5603_v28  ;;  %10925 = vst [vmem:[#allocation20_spill] sm:$0xff] %v10003_v1  ;;  %7727 = vrcp.f32 %v9986_v55  ;;  %v5815_v28 = vsub.f32 1.0, %v5814_v13  ;;  %v5845_v22 = vsub.f32 1.0, %v5844_v18 }
 0x2e5   : > { %v5025_v26 = vadd.f32 %v4955_v51, %v9881_v11  ;;  %v5488_v41 = vpop.f32.mrf.mxu0  ;;  %7729 = vrcp.f32 %v9989_v49  ;;  %v10010_v24 = vpop.eup %7719 }
 0x2e6   : > { %10926 = vst [vmem:[#allocation11_spill] sm:$0xff] %v10010_v24  ;;  %7731 = vrcp.f32 %v9994_v40  ;;  %v7523_v27 = vmul.f32 -1.442695, %v5731_v60  ;;  %v7722_v30 = vpop.eup %7721  ;;  %v5889_v60 = vmul.f32 %v10010_v24, %v9974_v6  ;;  %v10037_v18 = vmul.f32 %v9967_v14, %v5815_v28 }
 0x2e7   : > { %v4909_v5 = vpop.f32.mrf.mxu2  ;;  %v5604_v50 = vadd.f32 %v5534_v29, %v5025_v26  ;;  %v5537_v29 = vpop.f32.mrf.mxu1  ;;  %7733 = vpow2.f32 %v7521_v3 }
 0x2e8   : > { %v5026_v11 = vadd.f32 %v4909_v5, %v9895_v56  ;;  %v5829_v56 = vmul.f32 %v9983_v31, %v9959_v54  ;;  %v10017_v7 = vpop.eup %7723  ;;  %7735 = vpow2.f32 %v7522_v2 }
 0x2e9   : > { %v5732_v51 = vadd.f32 %v5723_v47, %v5604_v50  ;;  %10927 = vst [vmem:[#allocation9_spill] sm:$0xff] %v10017_v7  ;;  %v10020_v35 = vpop.eup %7725  ;;  %7737 = vpow2.f32 %v7523_v27 }
 0x2ea   : > { %v5605_v63 = vadd.f32 %v5488_v41, %v5026_v11  ;;  %v5830_v53 = vsub.f32 1.0, %v5829_v56  ;;  %10928 = vst [vmem:[#allocation12_spill] sm:$0xff] %v10020_v35  ;;  %v10024_v41 = vpop.eup %7727 }
 0x2eb   : > { %v7524_v50 = vmul.f32 -1.442695, %v5732_v51  ;;  %v10030_v56 = vpop.eup %7729  ;;  %v5966_v28 = vmul.f32 %v10024_v41, %v9986_v55  ;;  %vm5971_vm15 = vweird.f32 %v10024_v41 }
 0x2ec   : > { %v4958_v17 = vpop.f32.mrf.mxu3  ;;  %v6149_v0 = vadd.f32 %v6132_v61, %v5605_v63  ;;  %v10028_v63 = vadd.f32 1.0, %v7722_v30  ;;  %vm5986_vm4 = vweird.f32 %v10030_v56 }
 0x2ed   : > { %v5027_v58 = vadd.f32 %v4958_v17, %v9899_v43  ;;  %v5874_v43 = vmul.f32 %v10003_v1, %v9970_v34  ;;  %v5860_v17 = vsub.f32 1.0, %v5859_v16  ;;  %v5967_v8 = vsub.f32 1.0, %v5966_v28 }
 0x2ee   : > { %v7525_v26 = vmul.f32 -1.442695, %v6149_v0  ;;  %v10034_v0 = vpop.eup %7731 }
 0x2ef   : > { %v5606_v38 = vadd.f32 %v5537_v29, %v5027_v58  ;;  %v4911_v3 = vpop.f32.mrf.mxu2  ;;  %v5875_v2 = vsub.f32 1.0, %v5874_v43  ;;  %v5904_v58 = vmul.f32 %v10017_v7, %v9979_v25  ;;  %v10040_v29 = vmul.f32 %v9983_v31, %v5830_v53  ;;  %v7734_v27 = vpop.eup %7733 }
 0x2f0   : > { %7739 = vpow2.f32 %v7525_v26  ;;  %v5028_v16 = vadd.f32 %v4911_v3, %v9907_v36  ;;  %v7736_v43 = vpop.eup %7735  ;;  %v5890_v26 = vsub.f32 1.0, %v5889_v60  ;;  %v10053_v51 = vmul.f32 %v9996_v20, %v5860_v17 }
 0x2f1   : > { %v6150_v13 = vadd.f32 %v6132_v61, %v5606_v38  ;;  %v10045_v38 = vmul.f32 %v9991_v48, %v5845_v22  ;;  %7741 = vpow2.f32 %v7524_v50  ;;  %v10056_v61 = vmul.f32 %v10003_v1, %v5875_v2  ;;  %v7738_v50 = vpop.eup %7737 }
 0x2f2   : > { %7743 = vrcp.f32 %v10028_v63  ;;  %v5905_v22 = vsub.f32 1.0, %v5904_v58  ;;  %v5919_v36 = vmul.f32 %v10020_v35, %v9981_v19  ;;  %v5976_v3 = vand.u32 2147483648, %v9986_v55 }
 0x2f3   : > { %v7526_v53 = vmul.f32 -1.442695, %v6150_v13  ;;  %10929 = vst [vmem:[#allocation10_spill] sm:$0xff] %v10056_v61  ;;  %v10063_v11 = vadd.f32 1.0, %v7734_v27  ;;  %v5490_v13 = vpop.f32.mrf.mxu0  ;;  %v5981_v17 = vmul.f32 %v10030_v56, %v9989_v49  ;;  %v5996_v2 = vmul.f32 %v10034_v0, %v9994_v40  ;;  %v6137_v27 = vpop.permute.xlu0 %6136 }
 0x2f4   : > { %v10069_v58 = vadd.f32 1.0, %v7736_v43  ;;  %v5607_v30 = vadd.f32 %v5490_v13, %v5028_v16  ;;  %v10072_v5 = vmul.f32 %v10010_v24, %v5890_v26  ;;  %v4960_v19 = vpop.f32.mrf.mxu3  ;;  %v10076_v25 = vmul.f32 %v10017_v7, %v5905_v22 }
 0x2f5   : > { %7745 = vpow2.f32 %v7526_v53  ;;  %v10078_v1 = vadd.f32 1.0, %v7738_v50  ;;  %v5029_v43 = vadd.f32 %v4960_v19, %v9911_v15  ;;  %v5920_v16 = vsub.f32 1.0, %v5919_v36  ;;  %v5539_v50 = vpop.f32.mrf.mxu1 }
 0x2f6   : > { %v7740_v47 = vpop.eup %7739  ;;  %10930 = vst [vmem:[#allocation3_spill] sm:$0xff] %v10069_v58  ;;  %v6151_v61 = vadd.f32 %v6137_v27, %v5607_v30  ;;  %v5991_v26 = vand.u32 2147483648, %v9989_v49  ;;  %7747 = vrcp.f32 %v10063_v11  ;;  %v10087_v53 = vor.u32 1.1754944e-38, %v5976_v3 }
 0x2f7   : > { %10931 = vst [vmem:[#allocation22_spill] sm:$0xff] %v10072_v5  ;;  %v7742_v33 = vpop.eup %7741  ;;  %v10085_v28 = vadd.f32 1.0, %v7740_v47  ;;  %v5982_v13 = vsub.f32 1.0, %v5981_v17  ;;  %v5997_v60 = vsub.f32 1.0, %v5996_v2  ;;  %7749 = vrcp.f32 %v10069_v58  ;;  %v4914_v5 = vpop.f32.mrf.mxu2 }
 0x2f8   : > { %10932 = vst [vmem:[#allocation23_spill] sm:$0xff] %v10076_v25  ;;  %v10081_v6 = vpop.eup %7743  ;;  %v5968_v22 = vmul.f32 %v10024_v41, %v5967_v8  ;;  %v6006_v30 = vand.u32 2147483648, %v9994_v40  ;;  %v6021_v15 = vand.u32 2147483648, %v10028_v63  ;;  %v10093_v19 = vadd.f32 1.0, %v7742_v33 }
 0x2f9   : > { %10933 = vst [vmem:[#allocation15_spill] sm:$0xff] %v10078_v1  ;;  %v6011_v36 = vmul.f32 %v10081_v6, %v10028_v63  ;;  %7751 = vrcp.f32 %v10078_v1  ;;  %v7527_v47 = vmul.f32 -1.442695, %v6151_v61  ;;  %v5608_v3 = vadd.f32 %v5539_v50, %v5029_v43 }
 0x2fa   : > { %10934 = vst [vmem:[#allocation13_spill] sm:$0xff] %v10093_v19  ;;  %v10099_v2 = vmul.f32 %v10020_v35, %v5920_v16  ;;  %v10102_v7 = vor.u32 1.1754944e-38, %v5991_v26  ;;  %7753 = vrcp.f32 %v10085_v28  ;;  %v5983_v33 = vmul.f32 %v10030_v56, %v5982_v13 }
 0x2fb   : > { %v7746_v17 = vpop.eup %7745  ;;  %v5998_v25 = vmul.f32 %v10034_v0, %v5997_v60  ;;  %7755 = vpow2.f32 %v7527_v47  ;;  %v6152_v24 = vadd.f32 %v6137_v27, %v5608_v3  ;;  %v10110_v61 = vadd.f32 %v10024_v41, %v5968_v22 }
 0x2fc   : > { %10935 = vst [vmem:[#allocation16_spill] sm:$0xff] %v10099_v2  ;;  %v10107_v34 = vpop.eup %7747  ;;  %v10113_v16 = vor.u32 1.1754944e-38, %v6006_v30  ;;  %7757 = vrcp.f32 %v10093_v19  ;;  %v6012_v50 = vsub.f32 1.0, %v6011_v36  ;;  %v10119_v60 = vor.u32 1.1754944e-38, %v6021_v15  ;;  %v6142_v2 = vpop.permute.xlu1 %6141 }
 0x2fd   : > { %v10116_v26 = vpop.eup %7749  ;;  %v10121_v27 = vadd.f32 1.0, %v7746_v17  ;;  %v7528_v47 = vmul.f32 -1.442695, %v6152_v24  ;;  %v5030_v3 = vadd.f32 %v4914_v5, %v9917_v37  ;;  %v10126_v22 = vadd.f32 %v9865_v59, %v9871_v4  ;;  %v5493_v17 = vpop.f32.mrf.mxu0 }
 0x2fe   : > { %10936 = vst [vmem:[#allocation14_spill] sm:$0xff] %v10113_v16  ;;  %v10130_v30 = vadd.f32 %v9867_v52, %v9884_v46  ;;  %v10135_v36 = vadd.f32 %v10030_v56, %v5983_v33  ;;  %v10138_v15 = vadd.f32 %v10034_v0, %v5998_v25  ;;  %v6036_v24 = vand.u32 2147483648, %v10063_v11  ;;  %v4963_v5 = vpop.f32.mrf.mxu3 }
 0x2ff   : > { %10937 = vst [vmem:[#allocation4_spill] sm:$0xff] %v10119_v60  ;;  %v10132_v43 = vpop.eup %7751  ;;  %v10143_v37 = vadd.f32 %v9886_v44, %v9891_v10  ;;  %v6026_v52 = vmul.f32 %v10107_v34, %v10063_v11  ;;  %v6041_v4 = vmul.f32 %v10116_v26, %v10069_v58  ;;  %7759 = vpow2.f32 %v7528_v47 }
 0x300   : > { %10938 = vst [vmem:[#allocation18_spill] sm:$0xff] %v10126_v22  ;;  %v10145_v59 = vpop.eup %7753  ;;  %v5609_v46 = vadd.f32 %v5493_v17, %v5030_v3  ;;  %v6013_v33 = vmul.f32 %v10081_v6, %v6012_v50  ;;  %v6051_v13 = vand.u32 2147483648, %v10069_v58  ;;  %7761 = vrcp.f32 %v10121_v27  ;;  %v5542_v17 = vpop.f32.mrf.mxu1 }
 0x301   : > { %10939 = vst [vmem:[#allocation17_spill] sm:$0xff] %v10130_v30  ;;  %v7756_v25 = vpop.eup %7755  ;;  %v5031_v44 = vadd.f32 %v4963_v5, %v9921_v32  ;;  %v6056_v35 = vmul.f32 %v10132_v43, %v10078_v1  ;;  %v6066_v47 = vand.u32 2147483648, %v10078_v1  ;;  %v6081_v3 = vand.u32 2147483648, %v10093_v19 }
 0x302   : > { %10940 = vst [vmem:[#allocation24_spill] sm:$0xff] %v10138_v15  ;;  %v10155_v10 = vpop.eup %7757  ;;  %v6153_v30 = vadd.f32 %v6142_v2, %v5609_v46  ;;  %v6027_v32 = vsub.f32 1.0, %v6026_v52  ;;  %v10166_v5 = vor.u32 1.1754944e-38, %v6036_v24  ;;  %v6042_v8 = vsub.f32 1.0, %v6041_v4 }
 0x303   : > { %10941 = vst [vmem:[#allocation25_spill] sm:$0xff] %v10143_v37  ;;  %v10163_v37 = vadd.f32 1.0, %v7756_v25  ;;  %v5610_v60 = vadd.f32 %v5542_v17, %v5031_v44  ;;  %v6190_v22 = vmul.f32 %v10145_v59, %v10085_v28  ;;  %v10171_v16 = vadd.f32 %v10081_v6, %v6013_v33  ;;  %v4916_v25 = vpop.f32.mrf.mxu2 }
 0x304   : > { %10942 = vst [vmem:[#allocation26_spill] sm:$0xff] %v10166_v5  ;;  %v10173_v15 = vor.u32 1.1754944e-38, %v6051_v13  ;;  %v6071_v46 = vmul.f32 %v10155_v10, %v10093_v19  ;;  %v6057_v17 = vsub.f32 1.0, %v6056_v35  ;;  %v10178_v52 = vor.u32 1.1754944e-38, %v6066_v47 }
 0x305   : > { %v7760_v44 = vpop.eup %7759  ;;  %v10181_v4 = vor.u32 1.1754944e-38, %v6081_v3  ;;  %7763 = vrcp.f32 %v10163_v37  ;;  %v7529_v13 = vmul.f32 -1.442695, %v6153_v30  ;;  %v6154_v33 = vadd.f32 %v6142_v2, %v5610_v60  ;;  %v5495_v30 = vpop.f32.mrf.mxu0 }
 0x306   : > { %10943 = vst [vmem:[#allocation27_spill] sm:$0xff] %v10173_v15  ;;  %v10183_v5 = vpop.eup %7761  ;;  %v6028_v50 = vmul.f32 %v10107_v34, %v6027_v32  ;;  %v6043_v15 = vmul.f32 %v10116_v26, %v6042_v8  ;;  %v6191_v1 = vsub.f32 1.0, %v6190_v22  ;;  %v4965_v35 = vpop.f32.mrf.mxu3  ;;  %v5822_v47 = vand.u32 2147483647, %v9955_v9 }
 0x307   : > { %10944 = vst [vmem:[#allocation28_spill] sm:$0xff] %v10178_v52  ;;  %v6072_v3 = vsub.f32 1.0, %v6071_v46  ;;  %v6198_v24 = vand.u32 2147483647, %v10085_v28  ;;  %v10193_v52 = vadd.f32 1.0, %v7760_v44  ;;  %v6058_v2 = vmul.f32 %v10132_v43, %v6057_v17 }
 0x308   : > { %10945 = vst [vmem:[#allocation29_spill] sm:$0xff] %v10181_v4  ;;  %v6200_v4 = vand.u32 2147483648, %v10085_v28  ;;  %v6205_v60 = vmul.f32 %v10183_v5, %v10121_v27  ;;  %v5032_v8 = vadd.f32 %v4916_v25, %v9927_v23  ;;  %v5817_v22 = vadd.f32 %v9967_v14, %v10037_v18  ;;  %v5544_v23 = vpop.f32.mrf.mxu1 }
 0x309   : > { %7765 = vpow2.f32 %v7529_v13  ;;  %v7530_v32 = vmul.f32 -1.442695, %v6154_v33  ;;  %v10946_v46 = vand.u32 2147483648, %v9955_v9  ;;  %v10205_v44 = vadd.f32 %v10107_v34, %v6028_v50 }
 0x30a   : > { %v10208_v17 = vadd.f32 %v10116_v26, %v6043_v15  ;;  %v6192_v58 = vmul.f32 %v10145_v59, %v6191_v1  ;;  %vm6194_vm11 = vweird.f32 %v10085_v28  ;;  %v6073_v18 = vmul.f32 %v10155_v10, %v6072_v3 }
 0x30b   : > { %v5825_v19 = vor.u32 1.1754944e-38, %v10946_v46  ;;  %10947 = vst [vmem:[#allocation30_spill] sm:$0xff] %v10205_v44  ;;  %v10212_v25 = vpop.eup %7763  ;;  %v6201_v13 = vor.u32 1.1754944e-38, %v6200_v4  ;;  %v6215_v33 = vand.u32 2147483648, %v10121_v27  ;;  %7767 = vrcp.f32 %v10193_v52 }
 0x30c   : > { %10948 = vst [vmem:[#allocation31_spill] sm:$0xff] %v10208_v17  ;;  %v10227_v1 = vadd.f32 %v10132_v43, %v6058_v2  ;;  %vm10229_vm14 = vcmp.eq.f32.partialorder %v6198_v24, 8.507059e+37  ;;  %v6206_v4 = vsub.f32 1.0, %v6205_v60  ;;  %v5611_v3 = vadd.f32 %v5495_v30, %v5032_v8  ;;  %v4919_v17 = vpop.f32.mrf.mxu2 }
 0x30d   : > { %v5821_v46 = vsel %vm10221_vm12, %v9967_v14, %v5817_v22  ;;  %v6213_v9 = vand.u32 2147483647, %v10121_v27  ;;  %7769 = vpow2.f32 %v7530_v32  ;;  %v5832_v44 = vadd.f32 %v9983_v31, %v10040_v29  ;;  %v6147_v22 = vpop.permute.xlu2 %6146 }
 0x30e   : > { %10951 = vst [vmem:[#allocation32_spill] sm:$0xff] %v10227_v1  ;;  %v5837_v2 = vand.u32 2147483647, %v9959_v54  ;;  %v6193_v24 = vadd.f32 %v10145_v59, %v6192_v58  ;;  %vm6195_vm0 = vweird.f32 %v10145_v59  ;;  %vm6209_vm1 = vweird.f32 %v10121_v27  ;;  %v4968_v60 = vpop.f32.mrf.mxu3 }
 0x30f   : > { %v6220_v14 = vmul.f32 %v10212_v25, %v10163_v37  ;;  %vm5823_vm2 = vcmp.eq.f32.partialorder %v5822_v47, 8.507059e+37  ;;  %v7766_v30 = vpop.eup %7765  ;;  %v10247_v8 = vadd.f32 %v10155_v10, %v6073_v18  ;;  %v10249_v29 = vor.u32 1.1754944e-38, %v6215_v33  ;;  %vm10274_vm6 = vmor %vm6194_vm11, %vm6195_vm0 }
 0x310   : > { %v5033_v32 = vadd.f32 %v4965_v35, %v9931_v12  ;;  %v10252_v15 = vsel %vm5823_vm2, %v5825_v19, %v5821_v46  ;;  %v6207_v58 = vmul.f32 %v10183_v5, %v6206_v4  ;;  %v6155_v1 = vadd.f32 %v6147_v22, %v5611_v3  ;;  %vm10328_vm2 = vmor %vm5848_vm13, %vm5849_vm10 }
 0x311   : > { %10954 = vst [vmem:[#allocation33_spill] sm:$0xff] %v10247_v8  ;;  %v5034_v47 = vadd.f32 %v4919_v17, %v9937_v62  ;;  %v10957_v12 = vand.u32 2147483648, %v9959_v54  ;;  %v10268_v35 = vpop.eup %7767  ;;  %v6230_v62 = vand.u32 2147483648, %v10163_v37  ;;  %v5836_v17 = vsel %vm10262_vm5, %v9983_v31, %v5832_v44  ;;  %v5498_v44 = vpop.f32.mrf.mxu0 }
 0x312   : > { %vm10282_vm7 = vcmp.eq.f32.partialorder %v5837_v2, 8.507059e+37  ;;  %v10288_v54 = vadd.f32 %v9991_v48, %v10045_v38  ;;  %v6197_v28 = vsel %vm10274_vm6, %v10145_v59, %v6193_v24  ;;  %vm10294_vm9 = vcmp.eq.f32.partialorder %v6213_v9, 8.507059e+37 }
 0x313   : > { %v5840_v19 = vor.u32 1.1754944e-38, %v10957_v12  ;;  %v6221_v46 = vsub.f32 1.0, %v6220_v14  ;;  %v10298_v31 = vadd.f32 1.0, %v7766_v30  ;;  %v7770_v2 = vpop.eup %7769  ;;  %vm6210_vm11 = vweird.f32 %v10183_v5  ;;  %v5547_v30 = vpop.f32.mrf.mxu1 }
 0x314   : > { %v6228_v38 = vand.u32 2147483647, %v10163_v37  ;;  %v5612_v18 = vadd.f32 %v5544_v23, %v5033_v32  ;;  %v5613_v12 = vadd.f32 %v5498_v44, %v5034_v47  ;;  %v10964_v33 = vand.u32 2147483647, %v9986_v55  ;;  %vm10351_vm5 = vmor %vm6209_vm1, %vm6210_vm11 }
 0x315   : > { %v6208_v9 = vadd.f32 %v10183_v5, %v6207_v58  ;;  %v6235_v24 = vmul.f32 %v10268_v35, %v10193_v52  ;;  %v7531_v14 = vmul.f32 -1.442695, %v6155_v1  ;;  %v5035_v8 = vadd.f32 %v4968_v60, %v9942_v45  ;;  %v5748_v60 = vpop.permute.xlu0 %5747  ;;  %vm10371_vm1 = vmor %vm5970_vm3, %vm5971_vm15 }
 0x316   : > { %vm10305_vm12 = vcmp.eq.f32.partialorder %v10964_v33, 8.507059e+37  ;;  %v10315_v23 = vsel %vm10229_vm14, %v6201_v13, %v6197_v28  ;;  %vm6224_vm0 = vweird.f32 %v10163_v37  ;;  %v10318_v32 = vor.u32 1.1754944e-38, %v6230_v62  ;;  %vm10397_vm15 = vmor %vm5985_vm8, %vm5986_vm4 }
 0x317   : > { %v10322_v47 = vsel %vm10282_vm7, %v5840_v19, %v5836_v17  ;;  %v10969_v45 = vand.u32 2147483647, %v9989_v49  ;;  %v6222_v50 = vmul.f32 %v10212_v25, %v6221_v46  ;;  %7771 = vrcp.f32 %v10298_v31  ;;  %v4921_v46 = vpop.f32.mrf.mxu2 }
 0x318   : > { %v10340_v58 = vadd.f32 1.0, %v7770_v2  ;;  %v5851_v19 = vsel %vm10328_vm2, %v9991_v48, %v10288_v54  ;;  %vm6001_vm13 = vweird.f32 %v10034_v0  ;;  %v6156_v17 = vadd.f32 %v6147_v22, %v5612_v18  ;;  %v4970_v22 = vpop.f32.mrf.mxu3 }
 0x319   : > { %vm10334_vm14 = vcmp.eq.f32.partialorder %v10969_v45, 8.507059e+37  ;;  %v5765_v4 = vadd.f32 %v5748_v60, %v5613_v12  ;;  %v5614_v28 = vadd.f32 %v5547_v30, %v5035_v8  ;;  %v5852_v44 = vand.u32 2147483647, %v9962_v42  ;;  %v5500_v30 = vpop.f32.mrf.mxu0 }
 0x31a   : > { %v6212_v48 = vsel %vm10351_vm5, %v10183_v5, %v6208_v9  ;;  %vm10362_vm6 = vcmp.eq.f32.partialorder %v6228_v38, 8.507059e+37  ;;  %v6236_v27 = vsub.f32 1.0, %v6235_v24  ;;  %v6245_v2 = vand.u32 2147483648, %v10193_v52 }
 0x31b   : > { %7773 = vpow2.f32 %v7531_v14  ;;  %vm6000_vm7 = vweird.f32 %v9994_v40  ;;  %vm6016_vm10 = vweird.f32 %v10081_v6  ;;  %vm6225_vm11 = vweird.f32 %v10212_v25 }
 0x31c   : > { %v6243_v5 = vand.u32 2147483647, %v10193_v52  ;;  %7775 = vtanh.f32 %v5765_v4  ;;  %v5766_v38 = vadd.f32 %v5748_v60, %v5614_v28  ;;  %v6223_v18 = vadd.f32 %v10212_v25, %v6222_v50  ;;  %vm10429_vm8 = vmor %vm6224_vm0, %vm6225_vm11  ;;  %v11011_v28 = vld [vmem:[#allocation20_spill] sm:$0xff] }
 0x31d   : > { %vm6239_vm2 = vweird.f32 %v10193_v52  ;;  %7777 = vrcp.f32 %v10340_v58  ;;  %v5973_v55 = vsel %vm10371_vm1, %v10024_v41, %v10110_v61  ;;  %v5036_v12 = vadd.f32 %v4921_v46, %v9946_v57  ;;  %v10408_v41 = vpop.eup %7771  ;;  %v5753_v46 = vpop.permute.xlu1 %5752 }
 0x31e   : > { %vm6015_vm3 = vweird.f32 %v10028_v63  ;;  %v10405_v9 = vsel %vm10294_vm9, %v10249_v29, %v6212_v48  ;;  %v7532_v24 = vmul.f32 -1.442695, %v6156_v17  ;;  %7779 = vtanh.f32 %v5766_v38 }
 0x31f   : > { %v5037_v57 = vadd.f32 %v4970_v22, %v9950_v21  ;;  %v6237_v49 = vmul.f32 %v10268_v35, %v6236_v27  ;;  %v10411_v61 = vor.u32 1.1754944e-38, %v6245_v2  ;;  %v5988_v14 = vsel %vm10397_vm15, %v10030_v56, %v10135_v36  ;;  %v5773_v36 = vld [vmem:[%s10386_s21] sm:$0xff]  ;;  %v4924_v33 = vpop.f32.mrf.mxu2 }
 0x320   : > { %v10980_v3 = vand.u32 2147483648, %v9962_v42  ;;  %v10981_v1 = vand.u32 2147483647, %v9994_v40  ;;  %v6260_v56 = vand.u32 2147483648, %v10298_v31  ;;  %v5978_v42 = vsel %vm10305_vm12, %v10087_v53, %v5973_v55  ;;  %v5549_v53 = vpop.f32.mrf.mxu1 }
 0x321   : > { %vm5853_vm9 = vcmp.eq.f32.partialorder %v5852_v44, 8.507059e+37  ;;  %v10440_v50 = vadd.f32 %v9996_v20, %v10053_v51  ;;  %v7774_v60 = vpop.eup %7773  ;;  %vm5863_vm5 = vweird.f32 %v9965_v39  ;;  %v6227_v37 = vsel %vm10429_vm8, %v10212_v25, %v6223_v18  ;;  %v5774_v44 = vld [vmem:[%s10386_s21 + $0x8] sm:$0xff] }
 0x322   : > { %v5855_v29 = vor.u32 1.1754944e-38, %v10980_v3  ;;  %vm10421_vm4 = vcmp.eq.f32.partialorder %v10981_v1, 8.507059e+37  ;;  %vm6240_vm0 = vweird.f32 %v10268_v35  ;;  %vm10447_vm1 = vcmp.eq.f32.partialorder %v6243_v5, 8.507059e+37  ;;  %v7776_v4 = vpop.eup %7775 }
 0x323   : > { %v5615_v59 = vadd.f32 %v5500_v30, %v5036_v12  ;;  %v10988_v51 = vand.u32 2147483647, %v10028_v63  ;;  %v6250_v25 = vmul.f32 %v10408_v41, %v10298_v31  ;;  %7781 = vpow2.f32 %v7532_v24  ;;  %v10465_v27 = vpop.eup %7777  ;;  %vm10498_vm15 = vmor %vm6239_vm2, %vm6240_vm0  ;;  %v10996_v30 = vld [vmem:[#allocation7_spill] sm:$0xff] }
 0x324   : > { %v10451_v17 = vsel %vm5853_vm9, %v5855_v29, %v5851_v19  ;;  %v5993_v48 = vsel %vm10334_vm14, %v10102_v7, %v5988_v14  ;;  %v5616_v19 = vadd.f32 %v5549_v53, %v5037_v57  ;;  %vm6031_vm11 = vweird.f32 %v10107_v34  ;;  %v7780_v38 = vpop.eup %7779  ;;  %vm10488_vm14 = vmor %vm6000_vm7, %vm6001_vm13  ;;  %v10995_v14 = vld [vmem:[#allocation24_spill] sm:$0xff]  ;;  %v5503_v53 = vpop.f32.mrf.mxu0 }
 0x325   : > { %vm10455_vm12 = vcmp.eq.f32.partialorder %v10988_v51, 8.507059e+37  ;;  %v6238_v2 = vadd.f32 %v10268_v35, %v6237_v49  ;;  %v6093_v22 = vmul.f32 %v5978_v42, %v5773_v36  ;;  %v6101_v8 = vmul.f32 %v7776_v4, %v10252_v15  ;;  %vm10517_vm7 = vmor %vm6015_vm3, %vm6016_vm10  ;;  %v5775_v42 = vld [vmem:[%s10386_s21 + $0x10] sm:$0xff] }
 0x326   : > { %v5767_v5 = vadd.f32 %v5753_v46, %v5615_v59  ;;  %v10473_v18 = vsel %vm10362_vm6, %v10318_v32, %v6227_v37  ;;  %v6258_v13 = vand.u32 2147483647, %v10298_v31  ;;  %v10476_v7 = vor.u32 1.1754944e-38, %v6260_v56  ;;  %v11003_v59 = vld [vmem:[#allocation18_spill] sm:$0xff] }
 0x327   : > { %v5768_v55 = vadd.f32 %v5753_v46, %v5616_v19  ;;  %vm6030_vm6 = vweird.f32 %v10063_v11  ;;  %v6109_v32 = vadd.f32 %v6101_v8, %v6093_v22  ;;  %v6094_v54 = vmul.f32 %v5993_v48, %v5774_v44  ;;  %v4973_v46 = vpop.f32.mrf.mxu3  ;;  %v11007_v19 = vld [vmem:[#allocation4_spill] sm:$0xff] }
 0x328   : > { %v6102_v12 = vmul.f32 %v7780_v38, %v10322_v47  ;;  %7783 = vtanh.f32 %v5767_v5  ;;  %v6251_v40 = vsub.f32 1.0, %v6250_v25  ;;  %v10504_v57 = vmul.f32 %v10465_v27, %v10340_v58  ;;  %v11008_v8 = vld [vmem:[#allocation8_spill] sm:$0xff]  ;;  %v5758_v5 = vpop.permute.xlu2 %5757 }
 0x329   : > { %v10506_v49 = vadd.f32 1.0, %v7774_v60  ;;  %v6003_v47 = vsel %vm10488_vm14, %v10034_v0, %v10995_v14  ;;  %vm5878_vm13 = vweird.f32 %v10996_v30  ;;  %v6242_v3 = vsel %vm10498_vm15, %v10268_v35, %v6238_v2  ;;  %6325 = vst [vmem:[%s10482_s25] sm:$0xff] %v6109_v32  ;;  %v7782_v0 = vpop.eup %7781  ;;  %v11002_v60 = vld [vmem:[#allocation14_spill] sm:$0xff]  ;;  %vm10593_vm14 = vmor %vm6030_vm6, %vm6031_vm11  ;;  %v11018_v14 = vld [vmem:[#allocation15_spill] sm:$0xff] }
 0x32a   : > { %7785 = vtanh.f32 %v6109_v32  ;;  %v6110_v29 = vadd.f32 %v6102_v12, %v6094_v54  ;;  %vm5864_vm2 = vweird.f32 %v9996_v20  ;;  %vm6046_vm8 = vweird.f32 %v10116_v26 }
 0x32b   : > { %v6273_v63 = vand.u32 2147483647, %v10340_v58  ;;  %v5867_v1 = vand.u32 2147483647, %v9965_v39  ;;  %v6018_v21 = vsel %vm10517_vm7, %v10081_v6, %v10171_v16  ;;  %7787 = vtanh.f32 %v5768_v55  ;;  %v11004_v16 = vld [vmem:[#allocation3_spill] sm:$0xff] }
 0x32c   : > { %v10999_v35 = vand.u32 2147483647, %v10063_v11  ;;  %v6275_v36 = vand.u32 2147483648, %v10340_v58  ;;  %7789 = vtanh.f32 %v6110_v29  ;;  %6326 = vst [vmem:[%s10482_s25 + $0x8] sm:$0xff] %v6110_v29  ;;  %v6008_v37 = vsel %vm10421_vm4, %v11002_v60, %v6003_v47  ;;  %vm10559_vm4 = vmor %vm5863_vm5, %vm5864_vm2  ;;  %v4926_v60 = vpop.f32.mrf.mxu2 }
 0x32d   : > { %v5038_v6 = vadd.f32 %v4924_v33, %v11003_v59  ;;  %vm6045_vm3 = vweird.f32 %v11004_v16  ;;  %v10550_v4 = vsel %vm10447_vm1, %v10411_v61, %v6242_v3  ;;  %v6252_v51 = vmul.f32 %v10408_v41, %v6251_v40  ;;  %v5776_v61 = vld [vmem:[%s10386_s21 + $0x18] sm:$0xff]  ;;  %v11012_v33 = vld [vmem:[#allocation17_spill] sm:$0xff] }
 0x32e   : > { %vm10535_vm10 = vcmp.eq.f32.partialorder %v10999_v35, 8.507059e+37  ;;  %v6266_v25 = vsub.f32 1.0, %v10504_v57  ;;  %7791 = vrcp.f32 %v10506_v49  ;;  %v7784_v44 = vpop.eup %7783  ;;  %v10563_v62 = vadd.f32 1.0, %v7782_v0  ;;  %v5552_v0 = vpop.f32.mrf.mxu1 }
 0x32f   : > { %v5866_v48 = vsel %vm10559_vm4, %v9996_v20, %v10440_v50  ;;  %v6023_v2 = vsel %vm10455_vm12, %v11007_v19, %v6018_v21  ;;  %v5617_v22 = vadd.f32 %v5503_v53, %v5038_v6  ;;  %vm5893_vm9 = vweird.f32 %v11008_v8  ;;  %v11010_v50 = vld [vmem:[#allocation10_spill] sm:$0xff]  ;;  %v11022_v6 = vld [vmem:[#allocation19_spill] sm:$0xff] }
 0x330   : > { %vm6061_vm5 = vweird.f32 %v10132_v43  ;;  %v6095_v38 = vmul.f32 %v6008_v37, %v5775_v42  ;;  %v6103_v55 = vmul.f32 %v7784_v44, %v10451_v17  ;;  %vm5868_vm0 = vcmp.eq.f32.partialorder %v5867_v1, 8.507059e+37  ;;  %v7786_v54 = vpop.eup %7785  ;;  %v11019_v21 = vld [vmem:[#allocation30_spill] sm:$0xff] }
 0x331   : > { %v11009_v15 = vand.u32 2147483648, %v9965_v39  ;;  %vm6255_vm1 = vweird.f32 %v10408_v41  ;;  %v5769_v20 = vadd.f32 %v5758_v5, %v5617_v22  ;;  %v5877_v12 = vadd.f32 %v11011_v28, %v11010_v50  ;;  %v7788_v24 = vpop.eup %7787  ;;  %v11028_v22 = vld [vmem:[#allocation11_spill] sm:$0xff]  ;;  %v5505_v50 = vpop.f32.mrf.mxu0 }
 0x332   : > { %vm5879_vm12 = vweird.f32 %v11011_v28  ;;  %v5039_v17 = vadd.f32 %v4973_v46, %v11012_v33  ;;  %v11015_v40 = vand.u32 2147483647, %v11004_v16  ;;  %vm6060_vm7 = vweird.f32 %v11018_v14  ;;  %v7790_v11 = vpop.eup %7789  ;;  %v11033_v16 = vld [vmem:[#allocation31_spill] sm:$0xff] }
 0x333   : > { %v5870_v32 = vor.u32 1.1754944e-38, %v11009_v15  ;;  %v6317_v47 = vmul.f32 %v7786_v54, %v10315_v23  ;;  %v6111_v52 = vadd.f32 %v6103_v55, %v6095_v38  ;;  %v6096_v29 = vmul.f32 %v6023_v2, %v5776_v61  ;;  %vm10621_vm6 = vmor %vm5878_vm13, %vm5879_vm12  ;;  %v5777_v61 = vld [vmem:[%s10386_s21 + $0x20] sm:$0xff]  ;;  %v11027_v2 = vld [vmem:[#allocation22_spill] sm:$0xff] }
 0x334   : > { %vm10599_vm15 = vcmp.eq.f32.partialorder %v11015_v40, 8.507059e+37  ;;  %vm6254_vm11 = vweird.f32 %v10298_v31  ;;  %v6033_v35 = vsel %vm10593_vm14, %v10107_v34, %v11019_v21  ;;  %7793 = vtanh.f32 %v5769_v20  ;;  %v10610_v23 = vpop.eup %7791  ;;  %v11029_v55 = vld [vmem:[#allocation25_spill] sm:$0xff] }
 0x335   : > { %v5871_v3 = vsel %vm5868_vm0, %v5870_v32, %v5866_v48  ;;  %v5618_v42 = vadd.f32 %v5552_v0, %v5039_v17  ;;  %v10613_v37 = vadd.f32 %v10408_v41, %v6252_v51  ;;  %6333 = vst [vmem:[%s10583_s28] sm:$0xff] %v6317_v47  ;;  %v6318_v53 = vmul.f32 %v7790_v11, %v10405_v9  ;;  %v11026_v48 = vld [vmem:[#allocation26_spill] sm:$0xff]  ;;  %vm10651_vm0 = vmor %vm6045_vm3, %vm6046_vm8  ;;  %v5763_v17 = vpop.permute.xlu0 %5762  ;;  %v11039_v21 = vld [vmem:[#allocation5_spill] sm:$0xff] }
 0x336   : > { %v6104_v1 = vmul.f32 %v7788_v24, %v5871_v3  ;;  %7795 = vtanh.f32 %v6111_v52  ;;  %v5882_v59 = vand.u32 2147483647, %v10996_v30  ;;  %vm5908_vm2 = vweird.f32 %v11022_v6  ;;  %6327 = vst [vmem:[%s10482_s25 + $0x10] sm:$0xff] %v6111_v52  ;;  %v4975_v52 = vpop.f32.mrf.mxu3 }
 0x337   : > { %7797 = vrcp.f32 %v10563_v62  ;;  %v5881_v9 = vsel %vm10621_vm6, %v11011_v28, %v5877_v12  ;;  %v5770_v45 = vadd.f32 %v5758_v5, %v5618_v42  ;;  %v11023_v46 = vand.u32 2147483647, %v11018_v14  ;;  %6334 = vst [vmem:[%s10583_s28 + $0x8] sm:$0xff] %v6318_v53  ;;  %vm10693_vm6 = vmor %vm6060_vm7, %vm6061_vm5 }
 0x338   : > { %v6112_v51 = vadd.f32 %v6104_v1, %v6096_v29  ;;  %v6038_v19 = vsel %vm10535_vm10, %v11026_v48, %v6033_v35  ;;  %v5892_v38 = vadd.f32 %v11028_v22, %v11027_v2  ;;  %vm5894_vm4 = vweird.f32 %v11028_v22  ;;  %v11038_v1 = vld [vmem:[#allocation6_spill] sm:$0xff]  ;;  %vm10714_vm7 = vmor %vm6254_vm11, %vm6255_vm1 }
 0x339   : > { %vm10634_vm13 = vcmp.eq.f32.partialorder %v11023_v46, 8.507059e+37  ;;  %v5040_v15 = vadd.f32 %v4926_v60, %v11029_v55  ;;  %vm6076_vm12 = vweird.f32 %v10155_v10  ;;  %v6267_v56 = vmul.f32 %v10465_v27, %v6266_v25  ;;  %v11034_v25 = vld [vmem:[#allocation13_spill] sm:$0xff]  ;;  %vm10673_vm3 = vmor %vm5893_vm9, %vm5894_vm4 }
 0x33a   : > { %v10659_v32 = vmul.f32 %v10610_v23, %v10506_v49  ;;  %7799 = vtanh.f32 %v6112_v51  ;;  %6328 = vst [vmem:[%s10482_s25 + $0x18] sm:$0xff] %v6112_v51  ;;  %v11032_v54 = vand.u32 2147483648, %v10996_v30  ;;  %vm5883_vm10 = vcmp.eq.f32.partialorder %v5882_v59, 8.507059e+37  ;;  %v7794_v33 = vpop.eup %7793  ;;  %v11040_v60 = vld [vmem:[#allocation21_spill] sm:$0xff]  ;;  %v11045_v59 = vld [vmem:[#allocation27_spill] sm:$0xff] }
 0x33b   : > { %v6048_v28 = vsel %vm10651_vm0, %v10116_v26, %v11033_v16  ;;  %7801 = vtanh.f32 %v5770_v45  ;;  %v5619_v12 = vadd.f32 %v5505_v50, %v5040_v15  ;;  %vm6075_vm8 = vweird.f32 %v11034_v25  ;;  %v11047_v45 = vld [vmem:[#allocation9_spill] sm:$0xff] }
 0x33c   : > { %v5885_v20 = vor.u32 1.1754944e-38, %v11032_v54  ;;  %v6097_v39 = vmul.f32 %v6038_v19, %v5777_v61  ;;  %v5897_v40 = vand.u32 2147483647, %v11008_v8  ;;  %v11037_v26 = vand.u32 2147483648, %v11008_v8  ;;  %v7796_v3 = vpop.eup %7795  ;;  %v11050_v61 = vld [vmem:[#allocation32_spill] sm:$0xff]  ;;  %v5779_v50 = vld [vmem:[%s10386_s21 + $0x30] sm:$0xff] }
 0x33d   : > { %vm6270_vm14 = vweird.f32 %v10465_v27  ;;  %v5896_v0 = vsel %vm10673_vm3, %v11028_v22, %v5892_v38  ;;  %v5771_v11 = vadd.f32 %v5763_v17, %v5619_v12  ;;  %v4238_v35 = vadd.f32 %v11039_v21, %v11038_v1  ;;  %v10686_v42 = vpop.eup %7797 }
 0x33e   : > { %v5886_v24 = vsel %vm5883_vm10, %v5885_v20, %v5881_v9  ;;  %v5900_v47 = vor.u32 1.1754944e-38, %v11037_v26  ;;  %vm5923_vm9 = vweird.f32 %v11040_v60  ;;  %vm10699_vm4 = vcmp.eq.f32.partialorder %v6258_v13, 8.507059e+37  ;;  %v11046_v9 = vld [vmem:[#allocation23_spill] sm:$0xff]  ;;  %v11058_v26 = vld [vmem:[#allocation16_spill] sm:$0xff]  ;;  %v11070_v13 = vld [vmem:[#allocation29_spill] sm:$0xff] }
 0x33f   : > { %v6105_v29 = vmul.f32 %v7794_v33, %v5886_v24  ;;  %v6319_v34 = vmul.f32 %v7796_v3, %v10473_v18  ;;  %v6053_v51 = vsel %vm10599_vm15, %v11045_v59, %v6048_v28  ;;  %v5907_v14 = vadd.f32 %v11047_v45, %v11046_v9  ;;  %v5778_v18 = vld [vmem:[%s10386_s21 + $0x28] sm:$0xff]  ;;  %v5780_v9 = vld [vmem:[%s10386_s21 + $0x38] sm:$0xff] }
 0x340   : > { %vm5909_vm5 = vweird.f32 %v11047_v45  ;;  %v6063_v57 = vsel %vm10693_vm6, %v10132_v43, %v11050_v61  ;;  %7803 = vtanh.f32 %v5771_v11  ;;  %v5041_v48 = vadd.f32 %v4975_v52, %v4238_v35  ;;  %v7800_v19 = vpop.eup %7799  ;;  %v5554_v43 = vpop.f32.mrf.mxu1  ;;  %v11062_v11 = vld [vmem:[#allocation33_spill] sm:$0xff] }
 0x341   : > { %v6113_v46 = vadd.f32 %v6105_v29, %v6097_v39  ;;  %v11051_v2 = vand.u32 2147483647, %v11034_v25  ;;  %v6257_v31 = vsel %vm10714_vm7, %v10408_v41, %v10613_v37  ;;  %v6281_v38 = vsub.f32 1.0, %v10659_v32  ;;  %6335 = vst [vmem:[%s10583_s28 + $0x10] sm:$0xff] %v6319_v34  ;;  %v7802_v15 = vpop.eup %7801  ;;  %vm10742_vm11 = vmor %vm5908_vm2, %vm5909_vm5 }
 0x342   : > { %vm5898_vm1 = vcmp.eq.f32.partialorder %v5897_v40, 8.507059e+37  ;;  %v5912_v55 = vand.u32 2147483647, %v11022_v6  ;;  %v6320_v5 = vmul.f32 %v7800_v19, %v10550_v4  ;;  %v5620_v37 = vadd.f32 %v5554_v43, %v5041_v48  ;;  %v11056_v4 = vld [vmem:[#allocation28_spill] sm:$0xff] }
 0x343   : > { %vm10725_vm15 = vcmp.eq.f32.partialorder %v11051_v2, 8.507059e+37  ;;  %7805 = vtanh.f32 %v6113_v46  ;;  %6329 = vst [vmem:[%s10482_s25 + $0x20] sm:$0xff] %v6113_v46  ;;  %v5901_v54 = vsel %vm5898_vm1, %v5900_v47, %v5896_v0  ;;  %v6098_v32 = vmul.f32 %v6053_v51, %v5778_v18  ;;  %v11059_v47 = vld [vmem:[#allocation12_spill] sm:$0xff] }
 0x344   : > { %v6106_v20 = vmul.f32 %v7802_v15, %v5901_v54  ;;  %v5911_v16 = vsel %vm10742_vm11, %v11047_v45, %v5907_v14  ;;  %v6068_v28 = vsel %vm10634_vm13, %v11056_v4, %v6063_v57  ;;  %v6268_v12 = vadd.f32 %v10465_v27, %v6267_v56  ;;  %6336 = vst [vmem:[%s10583_s28 + $0x18] sm:$0xff] %v6320_v5  ;;  %vm10766_vm13 = vmor %vm6075_vm8, %vm6076_vm12 }
 0x345   : > { %v6295_v33 = vmul.f32 %v10686_v42, %v10563_v62  ;;  %v11057_v24 = vand.u32 2147483648, %v11022_v6  ;;  %v5772_v30 = vadd.f32 %v5763_v17, %v5620_v37  ;;  %vm5913_vm2 = vcmp.eq.f32.partialorder %v5912_v55, 8.507059e+37 }
 0x346   : > { %v6114_v40 = vadd.f32 %v6106_v20, %v6098_v32  ;;  %v5922_v52 = vadd.f32 %v11059_v47, %v11058_v26  ;;  %vm5924_vm0 = vweird.f32 %v11059_v47  ;;  %v7804_v44 = vpop.eup %7803  ;;  %v6282_v6 = vmul.f32 %v10610_v23, %v6281_v38 }
 0x347   : > { %v5915_v39 = vor.u32 1.1754944e-38, %v11057_v24  ;;  %v6099_v17 = vmul.f32 %v6068_v28, %v5779_v50  ;;  %7807 = vtanh.f32 %v5772_v30  ;;  %v5927_v0 = vand.u32 2147483647, %v11040_v60  ;;  %vm10791_vm8 = vmor %vm5923_vm9, %vm5924_vm0 }
 0x348   : > { %7809 = vtanh.f32 %v6114_v40  ;;  %6330 = vst [vmem:[%s10482_s25 + $0x28] sm:$0xff] %v6114_v40  ;;  %v6078_v25 = vsel %vm10766_vm13, %v10155_v10, %v11062_v11  ;;  %v6262_v21 = vsel %vm10699_vm4, %v10476_v7, %v6257_v31  ;;  %vm6269_vm12 = vweird.f32 %v10340_v58 }
 0x349   : > { %v5916_v3 = vsel %vm5913_vm2, %v5915_v39, %v5911_v16  ;;  %v7806_v1 = vpop.eup %7805  ;;  %vm10783_vm10 = vcmp.eq.f32.partialorder %v6273_v63, 8.507059e+37  ;;  %v6296_v8 = vsub.f32 1.0, %v6295_v33  ;;  %vm10797_vm3 = vmor %vm6269_vm12, %vm6270_vm14  ;;  %vm6285_vm6 = vweird.f32 %v10610_v23 }
 0x34a   : > { %v6107_v29 = vmul.f32 %v7804_v44, %v5916_v3  ;;  %v6321_v63 = vmul.f32 %v7806_v1, %v6262_v21  ;;  %v5926_v34 = vsel %vm10791_vm8, %v11059_v47, %v5922_v52  ;;  %v6272_v59 = vsel %vm10797_vm3, %v10465_v27, %v6268_v12 }
 0x34b   : > { %v6283_v51 = vadd.f32 %v10610_v23, %v6282_v6  ;;  %v11069_v45 = vand.u32 2147483648, %v11040_v60  ;;  %v6083_v46 = vsel %vm10725_vm15, %v11070_v13, %v6078_v25  ;;  %v6276_v18 = vor.u32 1.1754944e-38, %v6275_v36 }
 0x34c   : > { %v6115_v53 = vadd.f32 %v6107_v29, %v6099_v17  ;;  %v6290_v61 = vand.u32 2147483648, %v10506_v49  ;;  %6337 = vst [vmem:[%s10583_s28 + $0x20] sm:$0xff] %v6321_v63  ;;  %vm5928_vm14 = vcmp.eq.f32.partialorder %v5927_v0, 8.507059e+37  ;;  %vm6284_vm9 = vweird.f32 %v10506_v49 }
 0x34d   : > { %v5930_v14 = vor.u32 1.1754944e-38, %v11069_v45  ;;  %v7808_v57 = vpop.eup %7807  ;;  %v6288_v27 = vand.u32 2147483647, %v10506_v49  ;;  %v6297_v60 = vmul.f32 %v10686_v42, %v6296_v8  ;;  %v6277_v58 = vsel %vm10783_vm10, %v6276_v18, %v6272_v59  ;;  %vm6286_vm4 = vmor %vm6284_vm9, %vm6285_vm6 }
 0x34e   : > { %7811 = vtanh.f32 %v6115_v53  ;;  %6331 = vst [vmem:[%s10482_s25 + $0x30] sm:$0xff] %v6115_v53  ;;  %v7810_v19 = vpop.eup %7809  ;;  %v6100_v36 = vmul.f32 %v6083_v46, %v5780_v9  ;;  %v6287_v22 = vsel %vm6286_vm4, %v10610_v23, %v6283_v51  ;;  %v6291_v38 = vor.u32 1.1754944e-38, %v6290_v61 }
 0x34f   : > { %v5931_v48 = vsel %vm5928_vm14, %v5930_v14, %v5926_v34  ;;  %v6322_v31 = vmul.f32 %v7810_v19, %v6277_v58  ;;  %vm6289_vm5 = vcmp.eq.f32.partialorder %v6288_v27, 8.507059e+37  ;;  %v6298_v43 = vadd.f32 %v10686_v42, %v6297_v60 }
 0x350   : > { %v6108_v2 = vmul.f32 %v7808_v57, %v5931_v48  ;;  %vm6300_vm7 = vweird.f32 %v10686_v42  ;;  %v6292_v15 = vsel %vm6289_vm5, %v6291_v38, %v6287_v22  ;;  %v6305_v5 = vand.u32 2147483648, %v10563_v62 }
 0x351   : > { %6338 = vst [vmem:[%s10583_s28 + $0x28] sm:$0xff] %v6322_v31  ;;  %vm6299_vm15 = vweird.f32 %v10563_v62  ;;  %v6303_v23 = vand.u32 2147483647, %v10563_v62 }
 0x352   : > { %v6116_v49 = vadd.f32 %v6108_v2, %v6100_v36  ;;  %vm6301_vm1 = vmor %vm6299_vm15, %vm6300_vm7  ;;  %v6306_v37 = vor.u32 1.1754944e-38, %v6305_v5 }
 0x353   : > { %v6302_v41 = vsel %vm6301_vm1, %v10686_v42, %v6298_v43  ;;  %vm6304_vm11 = vcmp.eq.f32.partialorder %v6303_v23, 8.507059e+37 }
 0x354   : > { %v7812_v55 = vpop.eup %7811  ;;  %7813 = vtanh.f32 %v6116_v49  ;;  %6332 = vst [vmem:[%s10482_s25 + $0x38] sm:$0xff] %v6116_v49  ;;  %v6307_v20 = vsel %vm6304_vm11, %v6306_v37, %v6302_v41 }
 0x355   : > { %v6323_v54 = vmul.f32 %v7812_v55, %v6292_v15 }
 0x357   : > { %6339 = vst [vmem:[%s10583_s28 + $0x30] sm:$0xff] %v6323_v54 }
 0x35a   : > { %v7814_v32 = vpop.eup %7813 }
 0x35b   : > { %v6324_v50 = vmul.f32 %v7814_v32, %v6307_v20 }
 0x35d   : > { %6340 = vst [vmem:[%s10583_s28 + $0x38] sm:$0xff] %v6324_v50 }
 0x35e PF: > { %s16_s18 = sadd.s32 1, %s7821_s18  }
 0x35f   : > { %p13_p4 = scmp.ge.s32.totalorder %s16_s18, 4  }
 0x361   :  { %15 = sbr.rel (!%p13_p4) target bundleno = 1 (0x1), region = 91 }

</bundles_post_ra>
